<compile_context>
chip_gen: v6e
topology: v6e:2x2x1
jax: 0.10.0
libtpu: 0.0.40
codegen_flags: <defaults>
</compile_context>

<pallas_src>
import functools
import math

import jax
import jax.numpy as jnp
from jax import lax
from jax.experimental import pallas as pl
from jax.experimental.pallas import tpu as pltpu

# Exact f32 matmuls everywhere (kernel + wrapper prep + reference) for the parity check.
jax.config.update("jax_default_matmul_precision", "highest")


def _silu(x):
    return x * jax.nn.sigmoid(x)


def _softplus(x):
    # Numerically stable softplus.
    return jnp.maximum(x, 0.0) + jnp.log(1.0 + jnp.exp(-jnp.abs(x)))


def _mxu_dot(a, b, mm_dtype):
    return jnp.dot(a.astype(mm_dtype), b.astype(mm_dtype),
                   preferred_element_type=jnp.float32)


def _round_up(x, m):
    return ((x + m - 1) // m) * m


# --------------------------------------------------------------------------------------
# Pallas kernel: `nb` batch elements (nb*L rows) per grid step.
# --------------------------------------------------------------------------------------
def cross_ssm_kernel(
        xcat_ref,                       # (nb, L, 2*d_model)   [x | x1]
        w_in_ref,                       # (2*d_model, 3*d_inner)      -> [u0 | u1 | z]
        conv_w_ref, conv_b_ref,         # (d_conv, 2*d_inner), (1, 2*d_inner)
        w_big_ref,                      # (2*d_inner, xp_cols) -> [delta_pre|B0|B1|C0|C1|0]
        a_ref, d_ref,                   # (d_state, 2*d_inner), (1, 2*d_inner)
        w_out_ref,                      # (2*d_inner, dm_pad)  (out_proj.T stacked twice)
        out_ref,                        # (nb, L, dm_pad)
        dlt_scr, du_scr, bc_scr, y_scr, # VMEM scratch
        *, nb, seq_len, d_inner, d_state, d_conv, chunk_t, mxu_dtype):

    f32 = jnp.float32
    d2 = 2 * d_inner
    N = d_state
    rows = nb * seq_len

    xcat = xcat_ref[...].reshape(rows, xcat_ref.shape[-1])

    # ---- fused input projection: one matmul -> [u0 | u1 | z] -------------------------
    proj = _mxu_dot(xcat, w_in_ref[...], mxu_dtype)                 # (rows, 3*d_inner) f32
    u_cat = proj[:, :d2]                                            # both conv/ssm inputs
    z = proj[:, d2:]                                                # shared gate
    z_cat = jnp.concatenate([z, z], axis=1)                         # duplicate on lanes

    # ---- causal depthwise conv + SiLU (both paths fused on lanes) --------------------
    # XLU sublane rolls + causal mask; the mask also zeroes rows whose roll crossed a
    # batch boundary (or wrapped circularly) inside the flattened (nb*L) row block.
    t_idx = lax.broadcasted_iota(jnp.int32, (nb, seq_len, 1), 1).reshape(rows, 1)
    conv_w = conv_w_ref[...]                                        # (d_conv, 2*d_inner)
    acc = u_cat * conv_w[d_conv - 1:d_conv, :]                      # zero-shift tap
    for k in range(d_conv - 1):
        shift = d_conv - 1 - k
        rolled = pltpu.roll(u_cat, shift, axis=0)                   # rolled[r] = u_cat[r-shift]
        rolled = jnp.where(t_idx >= shift, rolled, 0.0)
        acc = acc + rolled * conv_w[k:k + 1, :]
    c_cat = _silu(acc + conv_b_ref[...])                            # (rows, 2*d_inner) f32

    # ---- ONE lane-dense matmul for delta / B / C of both paths -----------------------
    xdbl = _mxu_dot(c_cat, w_big_ref[...], mxu_dtype)               # (rows, xp_cols) f32
    delta = _softplus(xdbl[:, :d2])                                 # (rows, 2*d_inner)
    bc = xdbl[:, d2:d2 + 4 * N]                                     # (rows, 4*d_state)

    # Stage the scan operands in VMEM scratch (read back per time-chunk).
    dlt_scr[...] = delta.reshape(nb, seq_len, d2)
    du_scr[...] = (delta * c_cat).reshape(nb, seq_len, d2)
    bc_scr[...] = bc.reshape(nb, seq_len, 4 * N)

    a_cat = a_ref[...]                                              # (d_state, 2*d_inner)
    is_p0 = lax.broadcasted_iota(jnp.int32, (1, 1, 1, d2), 3) < d_inner
    n_chunks = seq_len // chunk_t

    # ---- time-chunked selective scan; both paths share one (d_state, 2*d_inner) state.
    # Per-chunk intermediates are (nb, chunk_t, d_state, 2*d_inner); exp() for the chunk
    # is computed off the serial h-recurrence chain so the EUP work overlaps it.
    # y_t is stored straight into VMEM scratch (no masked-where accumulation).
    # TODO(synk): for very long L, add a second grid axis over time chunks with h carried
    # in a scratch ref, so the staged delta/du/bc buffers also stay chunk-sized.
    def chunk_body(ci, h):
        t0 = pl.multiple_of(ci * chunk_t, chunk_t)
        dlt_c = dlt_scr[:, pl.ds(t0, chunk_t), :]                   # (nb, T, d2)
        du_c = du_scr[:, pl.ds(t0, chunk_t), :]
        bc_c = bc_scr[:, pl.ds(t0, chunk_t), :]                     # (nb, T, 4N)
        dA = jnp.exp(dlt_c[:, :, None, :] * a_cat[None, None, :, :])            # (nb,T,N,d2)
        bb = jnp.where(is_p0, bc_c[:, :, 0 * N:1 * N, None], bc_c[:, :, 1 * N:2 * N, None])
        dBu = du_c[:, :, None, :] * bb
        cb = jnp.where(is_p0, bc_c[:, :, 2 * N:3 * N, None], bc_c[:, :, 3 * N:4 * N, None])
        for t in range(chunk_t):
            h = dA[:, t] * h + dBu[:, t]                            # (nb, N, d2)
            y_t = jnp.sum(cb[:, t] * h, axis=1)                     # (nb, d2)  (XLU reduce)
            y_scr[:, pl.ds(t0 + t, 1), :] = y_t[:, None, :]
        return h

    h0 = jnp.zeros((nb, N, d2), f32)
    lax.fori_loop(0, n_chunks, chunk_body, h0)

    # ---- D skip, gate (same z gates both paths), fused out-proj ----------------------
    y = y_scr[...].reshape(rows, d2) + c_cat * d_ref[...]
    g = y * _silu(z_cat)
    out = _mxu_dot(g, w_out_ref[...], mxu_dtype)                    # (rows, dm_pad)
    out_ref[...] = out.reshape(nb, seq_len, out_ref.shape[-1]).astype(out_ref.dtype)


# --------------------------------------------------------------------------------------
# Wrapper: weight fusion (plain JAX) + pallas_call
# --------------------------------------------------------------------------------------
def prepare_kernel_weights(p, *, mxu_dtype, dm_pad):
    """Fold the PyTorch parameters into fused, kernel-ready weights."""
    f32 = jnp.float32
    w_in = p['in_proj_w'].astype(f32)               # (2*d_inner, d_model)
    w_in1 = p['in_proj1_w'].astype(f32)             # (d_inner, d_model)
    din = w_in1.shape[0]
    dm = w_in.shape[1]
    N = p['A_log'].shape[1]
    rk = p['dt_proj_w'].shape[1]

    # ---- in-proj: (2*dm, 3*din) producing [u0 | u1 | z] ------------------------------
    wx_u0 = w_in[:din].T
    wx_z = w_in[din:].T
    wx1_u1 = w_in1.T
    zdm = jnp.zeros((dm, din), f32)
    w_in_fused = jnp.concatenate([
        jnp.concatenate([wx_u0, zdm, wx_z], axis=1),        # rows fed by x
        jnp.concatenate([zdm, wx1_u1, zdm], axis=1),        # rows fed by x1
    ], axis=0)                                              # (2*dm, 3*din)

    conv_w_cat = jnp.concatenate([p['conv_w'].T, p['conv_w1'].T], axis=1)      # (K, 2*din)
    conv_b_cat = jnp.concatenate([p['conv_b'], p['conv_b1']])[None, :]         # (1, 2*din)

    # ---- fused x-proj + dt-proj: one (2*din, xp_cols) weight -------------------------
    wx_dt = p['x_proj_w'][:rk].T.astype(f32)                # (din, rk)
    wx_b = p['x_proj_w'][rk:rk + N].T.astype(f32)
    wx_c = p['x_proj_w'][rk + N:].T.astype(f32)
    wx1_dt = p['x_proj1_w'][:rk].T.astype(f32)
    wx1_b = p['x_proj1_w'][rk:rk + N].T.astype(f32)
    wx1_c = p['x_proj1_w'][rk + N:].T.astype(f32)
    # dt_proj composed with x_proj's dt rows (associativity; dt bias unused in forward).
    w_delta0 = wx_dt @ p['dt_proj_w'].T.astype(f32)         # (din, din)
    w_delta1 = wx1_dt @ p['dt_proj1_w'].T.astype(f32)
    zdd = jnp.zeros((din, din), f32)
    zn = jnp.zeros((din, N), f32)
    w_delta = jnp.concatenate([jnp.concatenate([w_delta0, zdd], axis=1),
                               jnp.concatenate([zdd, w_delta1], axis=1)], axis=0)
    w_b0 = jnp.concatenate([wx_b, zn], axis=0)
    w_b1 = jnp.concatenate([zn, wx1_b], axis=0)
    w_c0 = jnp.concatenate([wx_c, zn], axis=0)
    w_c1 = jnp.concatenate([zn, wx1_c], axis=0)
    w_big = jnp.concatenate([w_delta, w_b0, w_b1, w_c0, w_c1], axis=1)   # (2din, 2din+4N)
    xp_cols = _round_up(w_big.shape[1], 128)
    if xp_cols > w_big.shape[1]:
        w_big = jnp.pad(w_big, ((0, 0), (0, xp_cols - w_big.shape[1])))

    a = -jnp.exp(p['A_log'].astype(f32))                    # (din, N)
    a1 = -jnp.exp(p['A_log1'].astype(f32))
    a_cat = jnp.concatenate([a.T, a1.T], axis=1)            # (N, 2*din)
    d_cat = jnp.concatenate([p['D'], p['D1']])[None, :].astype(f32)      # (1, 2*din)

    w_out2 = jnp.concatenate([p['out_proj_w'].T, p['out_proj_w'].T], axis=0)   # (2din, dm)
    if dm_pad > dm:
        w_out2 = jnp.pad(w_out2, ((0, 0), (0, dm_pad - dm)))

    return dict(w_in=w_in_fused.astype(mxu_dtype),
                conv_w=conv_w_cat.astype(f32), conv_b=conv_b_cat.astype(f32),
                w_big=w_big.astype(mxu_dtype),
                a=a_cat, d=d_cat,
                w_out=w_out2.astype(mxu_dtype))


def _pick_block_batches(batch, seq_len, target_rows=256):
    """Batch elements per grid step: keep >=2 grid steps (v7x has 2 TCs), big-ish blocks."""
    divisors = [n for n in range(1, batch + 1) if batch % n == 0]
    cands = [n for n in divisors if batch // n >= 2] or divisors
    best = cands[0]
    for n in cands:                       # ascending: pick largest nb within the row target
        if n * seq_len <= target_rows:
            best = n
    return best


def _pick_chunk(seq_len, max_chunk=16):
    for t in range(min(max_chunk, seq_len), 0, -1):
        if seq_len % t == 0:
            return t
    return 1


def _default_vmem_limit():
    try:
        cap = pltpu.get_tpu_info().vmem_capacity_bytes
    except Exception:
        cap = 64 << 20                    # conservative (v7x physical VMEM per TC)
    return int(max(32 << 20, min(cap - (16 << 20), 100 << 20)))


def cross_ssm_forward(x, x1, raw_params, *, mxu_dtype=jnp.float32,
                      target_rows=256, max_chunk=16):
    B, L, d_model = x.shape
    d_inner = raw_params['in_proj1_w'].shape[0]
    d_state = raw_params['A_log'].shape[1]
    d_conv = raw_params['conv_w'].shape[1]
    d2 = 2 * d_inner
    dm_pad = _round_up(max(d_model, 1), 128)

    w = prepare_kernel_weights(raw_params, mxu_dtype=mxu_dtype, dm_pad=dm_pad)
    nb = _pick_block_batches(B, L, target_rows)
    chunk_t = _pick_chunk(L, max_chunk)
    grid = (B // nb,)

    # [x | x1] on features; batch/seq kept 3D so the (8,128) block rule is always met.
    xcat = jnp.concatenate([x, x1], axis=-1).astype(mxu_dtype)      # (B, L, 2*d_model)

    weight_order = ['w_in', 'conv_w', 'conv_b', 'w_big', 'a', 'd', 'w_out']
    w_args = [w[k] for k in weight_order]

    kernel = functools.partial(
        cross_ssm_kernel, nb=nb, seq_len=L, d_inner=d_inner,
        d_state=d_state, d_conv=d_conv, chunk_t=chunk_t, mxu_dtype=mxu_dtype)

    in_specs = ([pl.BlockSpec((nb, L, 2 * d_model), lambda i: (i, 0, 0))]
                + [pl.BlockSpec(a.shape, lambda i: (0, 0)) for a in w_args])
    out_spec = pl.BlockSpec((nb, L, dm_pad), lambda i: (i, 0, 0))

    scratch_shapes = [
        pltpu.VMEM((nb, L, d2), jnp.float32),            # delta
        pltpu.VMEM((nb, L, d2), jnp.float32),            # delta * u
        pltpu.VMEM((nb, L, 4 * d_state), jnp.float32),   # [B0 | B1 | C0 | C1]
        pltpu.VMEM((nb, L, d2), jnp.float32),            # y (scan output)
    ]

    out = pl.pallas_call(
        kernel,
        out_shape=jax.ShapeDtypeStruct((B, L, dm_pad), jnp.float32),
        grid_spec=pltpu.PrefetchScalarGridSpec(
            num_scalar_prefetch=0,
            grid=grid,
            in_specs=in_specs,
            out_specs=out_spec,
            scratch_shapes=scratch_shapes,
        ),
        compiler_params=pltpu.CompilerParams(
            dimension_semantics=("parallel",),           # batch blocks are independent
            vmem_limit_bytes=_default_vmem_limit()),
    )(xcat, *w_args)
    return out[..., :d_model]


# --------------------------------------------------------------------------------------
# Deterministic parameter init (shapes from CrossSSM.__init__, PyTorch layouts)
# --------------------------------------------------------------------------------------
def init_params(key, d_model, d_state=16, d_conv=4, expand=2):
    d_inner = int(d_model * expand)
    dt_rank = math.ceil(d_model / 16)
    ks = jax.random.split(key, 12)

    def nrm(k, shape, scale):
        return jax.random.normal(k, shape, jnp.float32) * scale

    a_log = jnp.log(jnp.tile(jnp.arange(1, d_state + 1, dtype=jnp.float32)[None, :],
                             (d_inner, 1)))
    return {
        'in_proj_w': nrm(ks[0], (2 * d_inner, d_model), 1.0 / math.sqrt(d_model)),
        'in_proj1_w': nrm(ks[1], (d_inner, d_model), 1.0 / math.sqrt(d_model)),
        'conv_w': nrm(ks[2], (d_inner, d_conv), 1.0 / math.sqrt(d_conv)),
        'conv_b': nrm(ks[3], (d_inner,), 0.1),
        'conv_w1': nrm(ks[4], (d_inner, d_conv), 1.0 / math.sqrt(d_conv)),
        'conv_b1': nrm(ks[5], (d_inner,), 0.1),
        'x_proj_w': nrm(ks[6], (dt_rank + 2 * d_state, d_inner), 1.0 / math.sqrt(d_inner)),
        'x_proj1_w': nrm(ks[7], (dt_rank + 2 * d_state, d_inner), 1.0 / math.sqrt(d_inner)),
        'dt_proj_w': nrm(ks[8], (d_inner, dt_rank), 1.0 / math.sqrt(dt_rank)),
        'dt_proj1_w': nrm(ks[9], (d_inner, dt_rank), 1.0 / math.sqrt(dt_rank)),
        'out_proj_w': nrm(ks[10], (d_model, d_inner), 1.0 / math.sqrt(d_inner)),
        'A_log': a_log,
        'A_log1': a_log,
        'D': jnp.ones((d_inner,), jnp.float32),
        'D1': jnp.ones((d_inner,), jnp.float32),
    }


# --------------------------------------------------------------------------------------
# Pure-JAX reference (direct transcription of the PyTorch forward)
# --------------------------------------------------------------------------------------
def cross_ssm_reference(x, x1, p):
    B, L, _ = x.shape
    din = p['in_proj1_w'].shape[0]
    N = p['A_log'].shape[1]
    rk = p['dt_proj_w'].shape[1]
    K = p['conv_w'].shape[1]

    u0 = jnp.einsum('bld,kd->blk', x, p['in_proj_w'][:din])
    z = jnp.einsum('bld,kd->blk', x, p['in_proj_w'][din:])
    u1 = jnp.einsum('bld,kd->blk', x1, p['in_proj1_w'])

    def conv(u, w, b):
        acc = jnp.zeros_like(u)
        for k in range(K):
            s = K - 1 - k
            shifted = jnp.pad(u, ((0, 0), (s, 0), (0, 0)))[:, :L, :]
            acc = acc + shifted * w[:, k][None, None, :]
        acc = acc + b[None, None, :]
        return acc * jax.nn.sigmoid(acc)

    def ssm(u, x_proj_w, dt_w, a_log, d_vec):
        xdbl = jnp.einsum('bld,kd->blk', u, x_proj_w)
        delta = _softplus(jnp.einsum('blr,dr->bld', xdbl[..., :rk], dt_w))
        bm = xdbl[..., rk:rk + N]
        cm = xdbl[..., rk + N:]
        a = -jnp.exp(a_log)
        dA = jnp.exp(jnp.einsum('bld,dn->bldn', delta, a))
        dBu = jnp.einsum('bld,bln->bldn', delta * u, bm)

        def step(h, inp):
            dA_t, dBu_t, c_t = inp
            h = dA_t * h + dBu_t
            return h, jnp.einsum('bdn,bn->bd', h, c_t)

        h0 = jnp.zeros((B, u.shape[-1], N), jnp.float32)
        _, ys = lax.scan(step, h0, (dA.swapaxes(0, 1), dBu.swapaxes(0, 1), cm.swapaxes(0, 1)))
        return ys.swapaxes(0, 1) + u * d_vec[None, None, :]

    c0 = conv(u0, p['conv_w'], p['conv_b'])
    c1 = conv(u1, p['conv_w1'], p['conv_b1'])
    gate = z * jax.nn.sigmoid(z)
    out0 = ssm(c0, p['x_proj_w'], p['dt_proj_w'], p['A_log'], p['D']) * gate
    out1 = ssm(c1, p['x_proj1_w'], p['dt_proj1_w'], p['A_log1'], p['D1']) * gate
    return jnp.einsum('bld,md->blm', out0 + out1, p['out_proj_w'])


if __name__ == "__main__":
    d_model, d_state, d_conv, expand = 32, 16, 4, 2   # d_inner=64 (d2=128), dt_rank=2
    base = jax.random.PRNGKey(0)

    def run_case(B, L, case_id):
        key = jax.random.fold_in(base, case_id)
        k1, k2, k3 = jax.random.split(key, 3)
        x = jax.random.normal(k1, (B, L, d_model), jnp.float32)
        x1 = jax.random.normal(k2, (B, L, d_model), jnp.float32)
        p = init_params(k3, d_model, d_state, d_conv, expand)
        # f32 MXU operands for exact parity; use mxu_dtype=jnp.bfloat16 in production.
        out = jax.block_until_ready(cross_ssm_forward(x, x1, p, mxu_dtype=jnp.float32))
        ref = cross_ssm_reference(x, x1, p)
        err = float(jnp.max(jnp.abs(out - ref)))
        assert out.shape == (B, L, d_model)
        assert err < 1e-2, f"case {case_id}: max abs err {err}"

    run_case(2, 8, 1)   # grid=(2,), nb=1
    run_case(4, 8, 2)   # grid=(2,), nb=2 — exercises cross-batch conv masking in a block
    print("KERNEL_OK")
</pallas_src>

<mosaic_0001>
module attributes {stable_mosaic.version = 11 : i64} {
  func.func @cross_ssm_kernel(%arg0: i32, %arg1: memref<1x8x64xf32, #tpu.memory_space<vmem>>, %arg2: memref<64x192xf32, #tpu.memory_space<vmem>>, %arg3: memref<4x128xf32, #tpu.memory_space<vmem>>, %arg4: memref<1x128xf32, #tpu.memory_space<vmem>>, %arg5: memref<128x256xf32, #tpu.memory_space<vmem>>, %arg6: memref<16x128xf32, #tpu.memory_space<vmem>>, %arg7: memref<1x128xf32, #tpu.memory_space<vmem>>, %arg8: memref<128x128xf32, #tpu.memory_space<vmem>>, %arg9: memref<1x8x128xf32, #tpu.memory_space<vmem>>, %arg10: memref<1x8x128xf32, #tpu.memory_space<vmem>>, %arg11: memref<1x8x128xf32, #tpu.memory_space<vmem>>, %arg12: memref<1x8x64xf32, #tpu.memory_space<vmem>>, %arg13: memref<1x8x128xf32, #tpu.memory_space<vmem>>) attributes {dimension_semantics = [#tpu.dimension_semantics<parallel>], iteration_bounds = array<i64: 2>, scalar_prefetch = 0 : i64, scratch_operands = 4 : i64, tpu.core_type = #tpu.core_type<tc>, window_params = [{transform_indices = @transform_0, window_bounds = array<i64: 1, 8, 64>}, {pipeline_mode = #tpu.pipeline_mode<synchronous>, transform_indices = @transform_1, window_bounds = array<i64: 64, 192>}, {pipeline_mode = #tpu.pipeline_mode<synchronous>, transform_indices = @transform_2, window_bounds = array<i64: 4, 128>}, {pipeline_mode = #tpu.pipeline_mode<synchronous>, transform_indices = @transform_3, window_bounds = array<i64: 1, 128>}, {pipeline_mode = #tpu.pipeline_mode<synchronous>, transform_indices = @transform_4, window_bounds = array<i64: 128, 256>}, {pipeline_mode = #tpu.pipeline_mode<synchronous>, transform_indices = @transform_5, window_bounds = array<i64: 16, 128>}, {pipeline_mode = #tpu.pipeline_mode<synchronous>, transform_indices = @transform_6, window_bounds = array<i64: 1, 128>}, {pipeline_mode = #tpu.pipeline_mode<synchronous>, transform_indices = @transform_7, window_bounds = array<i64: 128, 128>}, {transform_indices = @transform_8, window_bounds = array<i64: 1, 8, 128>}]} {
    %c0 = arith.constant 0 : index
    %c0_0 = arith.constant 0 : index
    %c0_1 = arith.constant 0 : index
    %0 = vector.load %arg1[%c0, %c0_0, %c0_1] : memref<1x8x64xf32, #tpu.memory_space<vmem>>, vector<1x8x64xf32>
    %1 = vector.shape_cast %0 : vector<1x8x64xf32> to vector<8x64xf32>
    %c0_2 = arith.constant 0 : index
    %c0_3 = arith.constant 0 : index
    %2 = vector.load %arg2[%c0_2, %c0_3] : memref<64x192xf32, #tpu.memory_space<vmem>>, vector<64x192xf32>
    %cst = arith.constant dense<0.000000e+00> : vector<8x192xf32>
    %3 = tpu.matmul %1, %2, %cst {dimension_numbers = #tpu.dot_dimension_numbers<[1], [0], [0], [1], [0, 0, 1, 1], [], []>, precision = #tpu.contract_precision<fp32>} : vector<8x64xf32>, vector<64x192xf32>, vector<8x192xf32> -> vector<8x192xf32>
    %4 = vector.extract_strided_slice %3 {offsets = [0, 0], sizes = [8, 128], strides = [1, 1]} : vector<8x192xf32> to vector<8x128xf32>
    %5 = vector.extract_strided_slice %3 {offsets = [0, 128], sizes = [8, 64], strides = [1, 1]} : vector<8x192xf32> to vector<8x64xf32>
    %6 = tpu.concatenate %5, %5 in 1 : vector<8x64xf32>, vector<8x64xf32> -> vector<8x128xf32>
    %7 = tpu.iota {dimensions = array<i32: 1>} : vector<1x8x1xi32>
    %8 = vector.shape_cast %7 : vector<1x8x1xi32> to vector<8x1xi32>
    %c0_4 = arith.constant 0 : index
    %c0_5 = arith.constant 0 : index
    %9 = vector.load %arg3[%c0_4, %c0_5] : memref<4x128xf32, #tpu.memory_space<vmem>>, vector<4x128xf32>
    %10 = vector.extract_strided_slice %9 {offsets = [3, 0], sizes = [1, 128], strides = [1, 1]} : vector<4x128xf32> to vector<1x128xf32>
    %11 = vector.broadcast %10 : vector<1x128xf32> to vector<8x128xf32>
    %12 = arith.mulf %4, %11 : vector<8x128xf32>
    %c3_i32 = arith.constant 3 : i32
    %13 = tpu.dynamic_rotate %4 by %c3_i32 dim 0 : vector<8x128xf32>, i32 -> vector<8x128xf32>
    %c3_i32_6 = arith.constant 3 : i32
    %14 = vector.broadcast %c3_i32_6 : i32 to vector<8x1xi32>
    %15 = arith.cmpi sge, %8, %14 : vector<8x1xi32>
    %cst_7 = arith.constant 0.000000e+00 : f32
    %16 = vector.shape_cast %15 : vector<8x1xi1> to vector<8x1xi1>
    %17 = vector.broadcast %16 : vector<8x1xi1> to vector<8x128xi1>
    %18 = vector.broadcast %cst_7 : f32 to vector<8x128xf32>
    %19 = arith.select %17, %13, %18 : vector<8x128xi1>, vector<8x128xf32>
    %20 = vector.extract_strided_slice %9 {offsets = [0, 0], sizes = [1, 128], strides = [1, 1]} : vector<4x128xf32> to vector<1x128xf32>
    %21 = vector.broadcast %20 : vector<1x128xf32> to vector<8x128xf32>
    %22 = arith.mulf %19, %21 : vector<8x128xf32>
    %23 = arith.addf %12, %22 : vector<8x128xf32>
    %c2_i32 = arith.constant 2 : i32
    %24 = tpu.dynamic_rotate %4 by %c2_i32 dim 0 : vector<8x128xf32>, i32 -> vector<8x128xf32>
    %c2_i32_8 = arith.constant 2 : i32
    %25 = vector.broadcast %c2_i32_8 : i32 to vector<8x1xi32>
    %26 = arith.cmpi sge, %8, %25 : vector<8x1xi32>
    %cst_9 = arith.constant 0.000000e+00 : f32
    %27 = vector.shape_cast %26 : vector<8x1xi1> to vector<8x1xi1>
    %28 = vector.broadcast %27 : vector<8x1xi1> to vector<8x128xi1>
    %29 = vector.broadcast %cst_9 : f32 to vector<8x128xf32>
    %30 = arith.select %28, %24, %29 : vector<8x128xi1>, vector<8x128xf32>
    %31 = vector.extract_strided_slice %9 {offsets = [1, 0], sizes = [1, 128], strides = [1, 1]} : vector<4x128xf32> to vector<1x128xf32>
    %32 = vector.broadcast %31 : vector<1x128xf32> to vector<8x128xf32>
    %33 = arith.mulf %30, %32 : vector<8x128xf32>
    %34 = arith.addf %23, %33 : vector<8x128xf32>
    %c1_i32 = arith.constant 1 : i32
    %35 = tpu.dynamic_rotate %4 by %c1_i32 dim 0 : vector<8x128xf32>, i32 -> vector<8x128xf32>
    %c1_i32_10 = arith.constant 1 : i32
    %36 = vector.broadcast %c1_i32_10 : i32 to vector<8x1xi32>
    %37 = arith.cmpi sge, %8, %36 : vector<8x1xi32>
    %cst_11 = arith.constant 0.000000e+00 : f32
    %38 = vector.shape_cast %37 : vector<8x1xi1> to vector<8x1xi1>
    %39 = vector.broadcast %38 : vector<8x1xi1> to vector<8x128xi1>
    %40 = vector.broadcast %cst_11 : f32 to vector<8x128xf32>
    %41 = arith.select %39, %35, %40 : vector<8x128xi1>, vector<8x128xf32>
    %42 = vector.extract_strided_slice %9 {offsets = [2, 0], sizes = [1, 128], strides = [1, 1]} : vector<4x128xf32> to vector<1x128xf32>
    %43 = vector.broadcast %42 : vector<1x128xf32> to vector<8x128xf32>
    %44 = arith.mulf %41, %43 : vector<8x128xf32>
    %45 = arith.addf %34, %44 : vector<8x128xf32>
    %c0_12 = arith.constant 0 : index
    %c0_13 = arith.constant 0 : index
    %46 = vector.load %arg4[%c0_12, %c0_13] : memref<1x128xf32, #tpu.memory_space<vmem>>, vector<1x128xf32>
    %47 = vector.broadcast %46 : vector<1x128xf32> to vector<8x128xf32>
    %48 = arith.addf %45, %47 : vector<8x128xf32>
    %49 = arith.negf %48 : vector<8x128xf32>
    %50 = math.exp %49 : vector<8x128xf32>
    %cst_14 = arith.constant 1.000000e+00 : f32
    %51 = vector.broadcast %cst_14 : f32 to vector<8x128xf32>
    %52 = arith.addf %51, %50 : vector<8x128xf32>
    %53 = arith.divf %51, %52 : vector<8x128xf32>
    %54 = arith.mulf %48, %53 : vector<8x128xf32>
    %c0_15 = arith.constant 0 : index
    %c0_16 = arith.constant 0 : index
    %55 = vector.load %arg5[%c0_15, %c0_16] : memref<128x256xf32, #tpu.memory_space<vmem>>, vector<128x256xf32>
    %cst_17 = arith.constant dense<0.000000e+00> : vector<8x256xf32>
    %56 = tpu.matmul %54, %55, %cst_17 {dimension_numbers = #tpu.dot_dimension_numbers<[1], [0], [0], [1], [0, 0, 1, 1], [], []>, precision = #tpu.contract_precision<fp32>} : vector<8x128xf32>, vector<128x256xf32>, vector<8x256xf32> -> vector<8x256xf32>
    %57 = vector.extract_strided_slice %56 {offsets = [0, 0], sizes = [8, 128], strides = [1, 1]} : vector<8x256xf32> to vector<8x128xf32>
    %cst_18 = arith.constant 0.000000e+00 : f32
    %58 = vector.broadcast %cst_18 : f32 to vector<8x128xf32>
    %59 = arith.maximumf %57, %58 : vector<8x128xf32>
    %60 = math.absf %57 : vector<8x128xf32>
    %cst_19 = arith.constant 0.000000e+00 : f32
    %61 = vector.broadcast %cst_19 : f32 to vector<8x128xf32>
    %62 = arith.subf %61, %60 : vector<8x128xf32>
    %63 = math.exp %62 : vector<8x128xf32>
    %cst_20 = arith.constant 1.000000e+00 : f32
    %64 = vector.broadcast %cst_20 : f32 to vector<8x128xf32>
    %65 = arith.addf %64, %63 : vector<8x128xf32>
    %66 = math.log %65 : vector<8x128xf32>
    %67 = arith.addf %59, %66 : vector<8x128xf32>
    %68 = vector.extract_strided_slice %56 {offsets = [0, 128], sizes = [8, 64], strides = [1, 1]} : vector<8x256xf32> to vector<8x64xf32>
    %69 = vector.shape_cast %67 : vector<8x128xf32> to vector<1x8x128xf32>
    %c0_21 = arith.constant 0 : index
    %c0_22 = arith.constant 0 : index
    %c0_23 = arith.constant 0 : index
    %70 = vector.load %arg10[%c0_21, %c0_22, %c0_23] : memref<1x8x128xf32, #tpu.memory_space<vmem>>, vector<1x8x128xf32>
    tpu.vector_store %arg10[%c0_21, %c0_22, %c0_23], %69 {strides = array<i32>} : memref<1x8x128xf32, #tpu.memory_space<vmem>>, vector<1x8x128xf32>,
    %71 = arith.mulf %67, %54 : vector<8x128xf32>
    %72 = vector.shape_cast %71 : vector<8x128xf32> to vector<1x8x128xf32>
    %c0_24 = arith.constant 0 : index
    %c0_25 = arith.constant 0 : index
    %c0_26 = arith.constant 0 : index
    %73 = vector.load %arg11[%c0_24, %c0_25, %c0_26] : memref<1x8x128xf32, #tpu.memory_space<vmem>>, vector<1x8x128xf32>
    tpu.vector_store %arg11[%c0_24, %c0_25, %c0_26], %72 {strides = array<i32>} : memref<1x8x128xf32, #tpu.memory_space<vmem>>, vector<1x8x128xf32>,
    %74 = vector.shape_cast %68 : vector<8x64xf32> to vector<1x8x64xf32>
    %c0_27 = arith.constant 0 : index
    %c0_28 = arith.constant 0 : index
    %c0_29 = arith.constant 0 : index
    %75 = vector.load %arg12[%c0_27, %c0_28, %c0_29] : memref<1x8x64xf32, #tpu.memory_space<vmem>>, vector<1x8x64xf32>
    tpu.vector_store %arg12[%c0_27, %c0_28, %c0_29], %74 {strides = array<i32>} : memref<1x8x64xf32, #tpu.memory_space<vmem>>, vector<1x8x64xf32>,
    %c0_30 = arith.constant 0 : index
    %c0_31 = arith.constant 0 : index
    %76 = vector.load %arg6[%c0_30, %c0_31] : memref<16x128xf32, #tpu.memory_space<vmem>>, vector<16x128xf32>
    %77 = tpu.iota {dimensions = array<i32: 3>} : vector<1x1x1x128xi32>
    %c64_i32 = arith.constant 64 : i32
    %78 = vector.broadcast %c64_i32 : i32 to vector<1x1x1x128xi32>
    %79 = arith.cmpi slt, %77, %78 : vector<1x1x1x128xi32>
    %cst_32 = arith.constant 0.000000e+00 : f32
    %80 = vector.broadcast %cst_32 : f32 to vector<1x16x128xf32>
    %c0_i32 = arith.constant 0 : i32
    %c8_i32 = arith.constant 8 : i32
    %81 = arith.muli %c0_i32, %c8_i32 : i32
    %82 = tpu.assume_multiple %81, 8 : i32
    %c0_33 = arith.constant 0 : index
    %83 = arith.index_cast %82 : i32 to index
    %c0_34 = arith.constant 0 : index
    %84 = vector.load %arg10[%c0_33, %83, %c0_34] : memref<1x8x128xf32, #tpu.memory_space<vmem>>, vector<1x8x128xf32>
    %c0_35 = arith.constant 0 : index
    %85 = arith.index_cast %82 : i32 to index
    %c0_36 = arith.constant 0 : index
    %86 = vector.load %arg11[%c0_35, %85, %c0_36] : memref<1x8x128xf32, #tpu.memory_space<vmem>>, vector<1x8x128xf32>
    %c0_37 = arith.constant 0 : index
    %87 = arith.index_cast %82 : i32 to index
    %c0_38 = arith.constant 0 : index
    %88 = vector.load %arg12[%c0_37, %87, %c0_38] : memref<1x8x64xf32, #tpu.memory_space<vmem>>, vector<1x8x64xf32>
    %89 = vector.shape_cast %84 : vector<1x8x128xf32> to vector<1x8x1x128xf32>
    %90 = vector.shape_cast %76 : vector<16x128xf32> to vector<1x1x16x128xf32>
    %91 = vector.broadcast %89 : vector<1x8x1x128xf32> to vector<1x8x16x128xf32>
    %92 = vector.broadcast %90 : vector<1x1x16x128xf32> to vector<1x8x16x128xf32>
    %93 = arith.mulf %91, %92 : vector<1x8x16x128xf32>
    %94 = math.exp %93 : vector<1x8x16x128xf32>
    %95 = vector.extract_strided_slice %88 {offsets = [0, 0, 0], sizes = [1, 8, 16], strides = [1, 1, 1]} : vector<1x8x64xf32> to vector<1x8x16xf32>
    %96 = vector.shape_cast %95 : vector<1x8x16xf32> to vector<1x8x16x1xf32>
    %97 = vector.extract_strided_slice %88 {offsets = [0, 0, 16], sizes = [1, 8, 16], strides = [1, 1, 1]} : vector<1x8x64xf32> to vector<1x8x16xf32>
    %98 = vector.shape_cast %97 : vector<1x8x16xf32> to vector<1x8x16x1xf32>
    %99 = vector.shape_cast %79 : vector<1x1x1x128xi1> to vector<1x1x1x128xi1>
    %100 = vector.broadcast %99 : vector<1x1x1x128xi1> to vector<1x8x16x128xi1>
    %101 = vector.shape_cast %96 : vector<1x8x16x1xf32> to vector<1x8x16x1xf32>
    %102 = vector.broadcast %101 : vector<1x8x16x1xf32> to vector<1x8x16x128xf32>
    %103 = vector.shape_cast %98 : vector<1x8x16x1xf32> to vector<1x8x16x1xf32>
    %104 = vector.broadcast %103 : vector<1x8x16x1xf32> to vector<1x8x16x128xf32>
    %105 = arith.select %100, %102, %104 : vector<1x8x16x128xi1>, vector<1x8x16x128xf32>
    %106 = vector.shape_cast %86 : vector<1x8x128xf32> to vector<1x8x1x128xf32>
    %107 = vector.broadcast %106 : vector<1x8x1x128xf32> to vector<1x8x16x128xf32>
    %108 = arith.mulf %107, %105 : vector<1x8x16x128xf32>
    %109 = vector.extract_strided_slice %88 {offsets = [0, 0, 32], sizes = [1, 8, 16], strides = [1, 1, 1]} : vector<1x8x64xf32> to vector<1x8x16xf32>
    %110 = vector.shape_cast %109 : vector<1x8x16xf32> to vector<1x8x16x1xf32>
    %111 = vector.extract_strided_slice %88 {offsets = [0, 0, 48], sizes = [1, 8, 16], strides = [1, 1, 1]} : vector<1x8x64xf32> to vector<1x8x16xf32>
    %112 = vector.shape_cast %111 : vector<1x8x16xf32> to vector<1x8x16x1xf32>
    %113 = vector.shape_cast %79 : vector<1x1x1x128xi1> to vector<1x1x1x128xi1>
    %114 = vector.broadcast %113 : vector<1x1x1x128xi1> to vector<1x8x16x128xi1>
    %115 = vector.shape_cast %110 : vector<1x8x16x1xf32> to vector<1x8x16x1xf32>
    %116 = vector.broadcast %115 : vector<1x8x16x1xf32> to vector<1x8x16x128xf32>
    %117 = vector.shape_cast %112 : vector<1x8x16x1xf32> to vector<1x8x16x1xf32>
    %118 = vector.broadcast %117 : vector<1x8x16x1xf32> to vector<1x8x16x128xf32>
    %119 = arith.select %114, %116, %118 : vector<1x8x16x128xi1>, vector<1x8x16x128xf32>
    %120 = vector.extract_strided_slice %94 {offsets = [0, 0, 0, 0], sizes = [1, 1, 16, 128], strides = [1, 1, 1, 1]} : vector<1x8x16x128xf32> to vector<1x1x16x128xf32>
    %121 = vector.shape_cast %120 : vector<1x1x16x128xf32> to vector<1x16x128xf32>
    %122 = arith.mulf %121, %80 : vector<1x16x128xf32>
    %123 = vector.extract_strided_slice %108 {offsets = [0, 0, 0, 0], sizes = [1, 1, 16, 128], strides = [1, 1, 1, 1]} : vector<1x8x16x128xf32> to vector<1x1x16x128xf32>
    %124 = vector.shape_cast %123 : vector<1x1x16x128xf32> to vector<1x16x128xf32>
    %125 = arith.addf %122, %124 : vector<1x16x128xf32>
    %126 = vector.extract_strided_slice %119 {offsets = [0, 0, 0, 0], sizes = [1, 1, 16, 128], strides = [1, 1, 1, 1]} : vector<1x8x16x128xf32> to vector<1x1x16x128xf32>
    %127 = vector.shape_cast %126 : vector<1x1x16x128xf32> to vector<1x16x128xf32>
    %128 = arith.mulf %127, %125 : vector<1x16x128xf32>
    %cst_39 = arith.constant dense<0.000000e+00> : vector<1x128xf32>
    %129 = vector.multi_reduction <add>, %128, %cst_39 [1] : vector<1x16x128xf32> to vector<1x128xf32>
    %130 = vector.shape_cast %129 : vector<1x128xf32> to vector<1x1x128xf32>
    %c0_i32_40 = arith.constant 0 : i32
    %131 = arith.addi %82, %c0_i32_40 : i32
    %c0_41 = arith.constant 0 : index
    %132 = arith.index_cast %131 : i32 to index
    %c0_42 = arith.constant 0 : index
    %133 = vector.load %arg13[%c0_41, %132, %c0_42] : memref<1x8x128xf32, #tpu.memory_space<vmem>>, vector<1x1x128xf32>
    tpu.vector_store %arg13[%c0_41, %132, %c0_42], %130 {strides = array<i32>} : memref<1x8x128xf32, #tpu.memory_space<vmem>>, vector<1x1x128xf32>,
    %134 = vector.extract_strided_slice %94 {offsets = [0, 1, 0, 0], sizes = [1, 1, 16, 128], strides = [1, 1, 1, 1]} : vector<1x8x16x128xf32> to vector<1x1x16x128xf32>
    %135 = vector.shape_cast %134 : vector<1x1x16x128xf32> to vector<1x16x128xf32>
    %136 = arith.mulf %135, %125 : vector<1x16x128xf32>
    %137 = vector.extract_strided_slice %108 {offsets = [0, 1, 0, 0], sizes = [1, 1, 16, 128], strides = [1, 1, 1, 1]} : vector<1x8x16x128xf32> to vector<1x1x16x128xf32>
    %138 = vector.shape_cast %137 : vector<1x1x16x128xf32> to vector<1x16x128xf32>
    %139 = arith.addf %136, %138 : vector<1x16x128xf32>
    %140 = vector.extract_strided_slice %119 {offsets = [0, 1, 0, 0], sizes = [1, 1, 16, 128], strides = [1, 1, 1, 1]} : vector<1x8x16x128xf32> to vector<1x1x16x128xf32>
    %141 = vector.shape_cast %140 : vector<1x1x16x128xf32> to vector<1x16x128xf32>
    %142 = arith.mulf %141, %139 : vector<1x16x128xf32>
    %cst_43 = arith.constant dense<0.000000e+00> : vector<1x128xf32>
    %143 = vector.multi_reduction <add>, %142, %cst_43 [1] : vector<1x16x128xf32> to vector<1x128xf32>
    %144 = vector.shape_cast %143 : vector<1x128xf32> to vector<1x1x128xf32>
    %c1_i32_44 = arith.constant 1 : i32
    %145 = arith.addi %82, %c1_i32_44 : i32
    %c0_45 = arith.constant 0 : index
    %146 = arith.index_cast %145 : i32 to index
    %c0_46 = arith.constant 0 : index
    %147 = vector.load %arg13[%c0_45, %146, %c0_46] : memref<1x8x128xf32, #tpu.memory_space<vmem>>, vector<1x1x128xf32>
    tpu.vector_store %arg13[%c0_45, %146, %c0_46], %144 {strides = array<i32>} : memref<1x8x128xf32, #tpu.memory_space<vmem>>, vector<1x1x128xf32>,
    %148 = vector.extract_strided_slice %94 {offsets = [0, 2, 0, 0], sizes = [1, 1, 16, 128], strides = [1, 1, 1, 1]} : vector<1x8x16x128xf32> to vector<1x1x16x128xf32>
    %149 = vector.shape_cast %148 : vector<1x1x16x128xf32> to vector<1x16x128xf32>
    %150 = arith.mulf %149, %139 : vector<1x16x128xf32>
    %151 = vector.extract_strided_slice %108 {offsets = [0, 2, 0, 0], sizes = [1, 1, 16, 128], strides = [1, 1, 1, 1]} : vector<1x8x16x128xf32> to vector<1x1x16x128xf32>
    %152 = vector.shape_cast %151 : vector<1x1x16x128xf32> to vector<1x16x128xf32>
    %153 = arith.addf %150, %152 : vector<1x16x128xf32>
    %154 = vector.extract_strided_slice %119 {offsets = [0, 2, 0, 0], sizes = [1, 1, 16, 128], strides = [1, 1, 1, 1]} : vector<1x8x16x128xf32> to vector<1x1x16x128xf32>
    %155 = vector.shape_cast %154 : vector<1x1x16x128xf32> to vector<1x16x128xf32>
    %156 = arith.mulf %155, %153 : vector<1x16x128xf32>
    %cst_47 = arith.constant dense<0.000000e+00> : vector<1x128xf32>
    %157 = vector.multi_reduction <add>, %156, %cst_47 [1] : vector<1x16x128xf32> to vector<1x128xf32>
    %158 = vector.shape_cast %157 : vector<1x128xf32> to vector<1x1x128xf32>
    %c2_i32_48 = arith.constant 2 : i32
    %159 = arith.addi %82, %c2_i32_48 : i32
    %c0_49 = arith.constant 0 : index
    %160 = arith.index_cast %159 : i32 to index
    %c0_50 = arith.constant 0 : index
    %161 = vector.load %arg13[%c0_49, %160, %c0_50] : memref<1x8x128xf32, #tpu.memory_space<vmem>>, vector<1x1x128xf32>
    tpu.vector_store %arg13[%c0_49, %160, %c0_50], %158 {strides = array<i32>} : memref<1x8x128xf32, #tpu.memory_space<vmem>>, vector<1x1x128xf32>,
    %162 = vector.extract_strided_slice %94 {offsets = [0, 3, 0, 0], sizes = [1, 1, 16, 128], strides = [1, 1, 1, 1]} : vector<1x8x16x128xf32> to vector<1x1x16x128xf32>
    %163 = vector.shape_cast %162 : vector<1x1x16x128xf32> to vector<1x16x128xf32>
    %164 = arith.mulf %163, %153 : vector<1x16x128xf32>
    %165 = vector.extract_strided_slice %108 {offsets = [0, 3, 0, 0], sizes = [1, 1, 16, 128], strides = [1, 1, 1, 1]} : vector<1x8x16x128xf32> to vector<1x1x16x128xf32>
    %166 = vector.shape_cast %165 : vector<1x1x16x128xf32> to vector<1x16x128xf32>
    %167 = arith.addf %164, %166 : vector<1x16x128xf32>
    %168 = vector.extract_strided_slice %119 {offsets = [0, 3, 0, 0], sizes = [1, 1, 16, 128], strides = [1, 1, 1, 1]} : vector<1x8x16x128xf32> to vector<1x1x16x128xf32>
    %169 = vector.shape_cast %168 : vector<1x1x16x128xf32> to vector<1x16x128xf32>
    %170 = arith.mulf %169, %167 : vector<1x16x128xf32>
    %cst_51 = arith.constant dense<0.000000e+00> : vector<1x128xf32>
    %171 = vector.multi_reduction <add>, %170, %cst_51 [1] : vector<1x16x128xf32> to vector<1x128xf32>
    %172 = vector.shape_cast %171 : vector<1x128xf32> to vector<1x1x128xf32>
    %c3_i32_52 = arith.constant 3 : i32
    %173 = arith.addi %82, %c3_i32_52 : i32
    %c0_53 = arith.constant 0 : index
    %174 = arith.index_cast %173 : i32 to index
    %c0_54 = arith.constant 0 : index
    %175 = vector.load %arg13[%c0_53, %174, %c0_54] : memref<1x8x128xf32, #tpu.memory_space<vmem>>, vector<1x1x128xf32>
    tpu.vector_store %arg13[%c0_53, %174, %c0_54], %172 {strides = array<i32>} : memref<1x8x128xf32, #tpu.memory_space<vmem>>, vector<1x1x128xf32>,
    %176 = vector.extract_strided_slice %94 {offsets = [0, 4, 0, 0], sizes = [1, 1, 16, 128], strides = [1, 1, 1, 1]} : vector<1x8x16x128xf32> to vector<1x1x16x128xf32>
    %177 = vector.shape_cast %176 : vector<1x1x16x128xf32> to vector<1x16x128xf32>
    %178 = arith.mulf %177, %167 : vector<1x16x128xf32>
    %179 = vector.extract_strided_slice %108 {offsets = [0, 4, 0, 0], sizes = [1, 1, 16, 128], strides = [1, 1, 1, 1]} : vector<1x8x16x128xf32> to vector<1x1x16x128xf32>
    %180 = vector.shape_cast %179 : vector<1x1x16x128xf32> to vector<1x16x128xf32>
    %181 = arith.addf %178, %180 : vector<1x16x128xf32>
    %182 = vector.extract_strided_slice %119 {offsets = [0, 4, 0, 0], sizes = [1, 1, 16, 128], strides = [1, 1, 1, 1]} : vector<1x8x16x128xf32> to vector<1x1x16x128xf32>
    %183 = vector.shape_cast %182 : vector<1x1x16x128xf32> to vector<1x16x128xf32>
    %184 = arith.mulf %183, %181 : vector<1x16x128xf32>
    %cst_55 = arith.constant dense<0.000000e+00> : vector<1x128xf32>
    %185 = vector.multi_reduction <add>, %184, %cst_55 [1] : vector<1x16x128xf32> to vector<1x128xf32>
    %186 = vector.shape_cast %185 : vector<1x128xf32> to vector<1x1x128xf32>
    %c4_i32 = arith.constant 4 : i32
    %187 = arith.addi %82, %c4_i32 : i32
    %c0_56 = arith.constant 0 : index
    %188 = arith.index_cast %187 : i32 to index
    %c0_57 = arith.constant 0 : index
    %189 = vector.load %arg13[%c0_56, %188, %c0_57] : memref<1x8x128xf32, #tpu.memory_space<vmem>>, vector<1x1x128xf32>
    tpu.vector_store %arg13[%c0_56, %188, %c0_57], %186 {strides = array<i32>} : memref<1x8x128xf32, #tpu.memory_space<vmem>>, vector<1x1x128xf32>,
    %190 = vector.extract_strided_slice %94 {offsets = [0, 5, 0, 0], sizes = [1, 1, 16, 128], strides = [1, 1, 1, 1]} : vector<1x8x16x128xf32> to vector<1x1x16x128xf32>
    %191 = vector.shape_cast %190 : vector<1x1x16x128xf32> to vector<1x16x128xf32>
    %192 = arith.mulf %191, %181 : vector<1x16x128xf32>
    %193 = vector.extract_strided_slice %108 {offsets = [0, 5, 0, 0], sizes = [1, 1, 16, 128], strides = [1, 1, 1, 1]} : vector<1x8x16x128xf32> to vector<1x1x16x128xf32>
    %194 = vector.shape_cast %193 : vector<1x1x16x128xf32> to vector<1x16x128xf32>
    %195 = arith.addf %192, %194 : vector<1x16x128xf32>
    %196 = vector.extract_strided_slice %119 {offsets = [0, 5, 0, 0], sizes = [1, 1, 16, 128], strides = [1, 1, 1, 1]} : vector<1x8x16x128xf32> to vector<1x1x16x128xf32>
    %197 = vector.shape_cast %196 : vector<1x1x16x128xf32> to vector<1x16x128xf32>
    %198 = arith.mulf %197, %195 : vector<1x16x128xf32>
    %cst_58 = arith.constant dense<0.000000e+00> : vector<1x128xf32>
    %199 = vector.multi_reduction <add>, %198, %cst_58 [1] : vector<1x16x128xf32> to vector<1x128xf32>
    %200 = vector.shape_cast %199 : vector<1x128xf32> to vector<1x1x128xf32>
    %c5_i32 = arith.constant 5 : i32
    %201 = arith.addi %82, %c5_i32 : i32
    %c0_59 = arith.constant 0 : index
    %202 = arith.index_cast %201 : i32 to index
    %c0_60 = arith.constant 0 : index
    %203 = vector.load %arg13[%c0_59, %202, %c0_60] : memref<1x8x128xf32, #tpu.memory_space<vmem>>, vector<1x1x128xf32>
    tpu.vector_store %arg13[%c0_59, %202, %c0_60], %200 {strides = array<i32>} : memref<1x8x128xf32, #tpu.memory_space<vmem>>, vector<1x1x128xf32>,
    %204 = vector.extract_strided_slice %94 {offsets = [0, 6, 0, 0], sizes = [1, 1, 16, 128], strides = [1, 1, 1, 1]} : vector<1x8x16x128xf32> to vector<1x1x16x128xf32>
    %205 = vector.shape_cast %204 : vector<1x1x16x128xf32> to vector<1x16x128xf32>
    %206 = arith.mulf %205, %195 : vector<1x16x128xf32>
    %207 = vector.extract_strided_slice %108 {offsets = [0, 6, 0, 0], sizes = [1, 1, 16, 128], strides = [1, 1, 1, 1]} : vector<1x8x16x128xf32> to vector<1x1x16x128xf32>
    %208 = vector.shape_cast %207 : vector<1x1x16x128xf32> to vector<1x16x128xf32>
    %209 = arith.addf %206, %208 : vector<1x16x128xf32>
    %210 = vector.extract_strided_slice %119 {offsets = [0, 6, 0, 0], sizes = [1, 1, 16, 128], strides = [1, 1, 1, 1]} : vector<1x8x16x128xf32> to vector<1x1x16x128xf32>
    %211 = vector.shape_cast %210 : vector<1x1x16x128xf32> to vector<1x16x128xf32>
    %212 = arith.mulf %211, %209 : vector<1x16x128xf32>
    %cst_61 = arith.constant dense<0.000000e+00> : vector<1x128xf32>
    %213 = vector.multi_reduction <add>, %212, %cst_61 [1] : vector<1x16x128xf32> to vector<1x128xf32>
    %214 = vector.shape_cast %213 : vector<1x128xf32> to vector<1x1x128xf32>
    %c6_i32 = arith.constant 6 : i32
    %215 = arith.addi %82, %c6_i32 : i32
    %c0_62 = arith.constant 0 : index
    %216 = arith.index_cast %215 : i32 to index
    %c0_63 = arith.constant 0 : index
    %217 = vector.load %arg13[%c0_62, %216, %c0_63] : memref<1x8x128xf32, #tpu.memory_space<vmem>>, vector<1x1x128xf32>
    tpu.vector_store %arg13[%c0_62, %216, %c0_63], %214 {strides = array<i32>} : memref<1x8x128xf32, #tpu.memory_space<vmem>>, vector<1x1x128xf32>,
    %218 = vector.extract_strided_slice %94 {offsets = [0, 7, 0, 0], sizes = [1, 1, 16, 128], strides = [1, 1, 1, 1]} : vector<1x8x16x128xf32> to vector<1x1x16x128xf32>
    %219 = vector.shape_cast %218 : vector<1x1x16x128xf32> to vector<1x16x128xf32>
    %220 = arith.mulf %219, %209 : vector<1x16x128xf32>
    %221 = vector.extract_strided_slice %108 {offsets = [0, 7, 0, 0], sizes = [1, 1, 16, 128], strides = [1, 1, 1, 1]} : vector<1x8x16x128xf32> to vector<1x1x16x128xf32>
    %222 = vector.shape_cast %221 : vector<1x1x16x128xf32> to vector<1x16x128xf32>
    %223 = arith.addf %220, %222 : vector<1x16x128xf32>
    %224 = vector.extract_strided_slice %119 {offsets = [0, 7, 0, 0], sizes = [1, 1, 16, 128], strides = [1, 1, 1, 1]} : vector<1x8x16x128xf32> to vector<1x1x16x128xf32>
    %225 = vector.shape_cast %224 : vector<1x1x16x128xf32> to vector<1x16x128xf32>
    %226 = arith.mulf %225, %223 : vector<1x16x128xf32>
    %cst_64 = arith.constant dense<0.000000e+00> : vector<1x128xf32>
    %227 = vector.multi_reduction <add>, %226, %cst_64 [1] : vector<1x16x128xf32> to vector<1x128xf32>
    %228 = vector.shape_cast %227 : vector<1x128xf32> to vector<1x1x128xf32>
    %c7_i32 = arith.constant 7 : i32
    %229 = arith.addi %82, %c7_i32 : i32
    %c0_65 = arith.constant 0 : index
    %230 = arith.index_cast %229 : i32 to index
    %c0_66 = arith.constant 0 : index
    %231 = vector.load %arg13[%c0_65, %230, %c0_66] : memref<1x8x128xf32, #tpu.memory_space<vmem>>, vector<1x1x128xf32>
    tpu.vector_store %arg13[%c0_65, %230, %c0_66], %228 {strides = array<i32>} : memref<1x8x128xf32, #tpu.memory_space<vmem>>, vector<1x1x128xf32>,
    %c1_i32_67 = arith.constant 1 : i32
    %c0_68 = arith.constant 0 : index
    %c0_69 = arith.constant 0 : index
    %c0_70 = arith.constant 0 : index
    %232 = vector.load %arg13[%c0_68, %c0_69, %c0_70] : memref<1x8x128xf32, #tpu.memory_space<vmem>>, vector<1x8x128xf32>
    %233 = vector.shape_cast %232 : vector<1x8x128xf32> to vector<8x128xf32>
    %c0_71 = arith.constant 0 : index
    %c0_72 = arith.constant 0 : index
    %234 = vector.load %arg7[%c0_71, %c0_72] : memref<1x128xf32, #tpu.memory_space<vmem>>, vector<1x128xf32>
    %235 = vector.broadcast %234 : vector<1x128xf32> to vector<8x128xf32>
    %236 = arith.mulf %54, %235 : vector<8x128xf32>
    %237 = arith.addf %233, %236 : vector<8x128xf32>
    %238 = arith.negf %6 : vector<8x128xf32>
    %239 = math.exp %238 : vector<8x128xf32>
    %cst_73 = arith.constant 1.000000e+00 : f32
    %240 = vector.broadcast %cst_73 : f32 to vector<8x128xf32>
    %241 = arith.addf %240, %239 : vector<8x128xf32>
    %242 = arith.divf %240, %241 : vector<8x128xf32>
    %243 = arith.mulf %6, %242 : vector<8x128xf32>
    %244 = arith.mulf %237, %243 : vector<8x128xf32>
    %c0_74 = arith.constant 0 : index
    %c0_75 = arith.constant 0 : index
    %245 = vector.load %arg8[%c0_74, %c0_75] : memref<128x128xf32, #tpu.memory_space<vmem>>, vector<128x128xf32>
    %cst_76 = arith.constant dense<0.000000e+00> : vector<8x128xf32>
    %246 = tpu.matmul %244, %245, %cst_76 {dimension_numbers = #tpu.dot_dimension_numbers<[1], [0], [0], [1], [0, 0, 1, 1], [], []>, precision = #tpu.contract_precision<fp32>} : vector<8x128xf32>, vector<128x128xf32>, vector<8x128xf32> -> vector<8x128xf32>
    %247 = vector.shape_cast %246 : vector<8x128xf32> to vector<1x8x128xf32>
    %c0_77 = arith.constant 0 : index
    %c0_78 = arith.constant 0 : index
    %c0_79 = arith.constant 0 : index
    %248 = vector.load %arg9[%c0_77, %c0_78, %c0_79] : memref<1x8x128xf32, #tpu.memory_space<vmem>>, vector<1x8x128xf32>
    tpu.vector_store %arg9[%c0_77, %c0_78, %c0_79], %247 {strides = array<i32>} : memref<1x8x128xf32, #tpu.memory_space<vmem>>, vector<1x8x128xf32>,
    return
  }
  func.func @transform_0(%arg0: i32) -> (i32, i32, i32) {
    %c0_i32 = arith.constant 0 : i32
    %c0_i32_0 = arith.constant 0 : i32
    %c0_i32_1 = arith.constant 0 : i32
    return %arg0, %c0_i32, %c0_i32_0 : i32, i32, i32
  }
  func.func @transform_1(%arg0: i32) -> (i32, i32) {
    %c0_i32 = arith.constant 0 : i32
    %c0_i32_0 = arith.constant 0 : i32
    %c0_i32_1 = arith.constant 0 : i32
    return %c0_i32, %c0_i32_0 : i32, i32
  }
  func.func @transform_2(%arg0: i32) -> (i32, i32) {
    %c0_i32 = arith.constant 0 : i32
    %c0_i32_0 = arith.constant 0 : i32
    %c0_i32_1 = arith.constant 0 : i32
    return %c0_i32, %c0_i32_0 : i32, i32
  }
  func.func @transform_3(%arg0: i32) -> (i32, i32) {
    %c0_i32 = arith.constant 0 : i32
    %c0_i32_0 = arith.constant 0 : i32
    %c0_i32_1 = arith.constant 0 : i32
    return %c0_i32, %c0_i32_0 : i32, i32
  }
  func.func @transform_4(%arg0: i32) -> (i32, i32) {
    %c0_i32 = arith.constant 0 : i32
    %c0_i32_0 = arith.constant 0 : i32
    %c0_i32_1 = arith.constant 0 : i32
    return %c0_i32, %c0_i32_0 : i32, i32
  }
  func.func @transform_5(%arg0: i32) -> (i32, i32) {
    %c0_i32 = arith.constant 0 : i32
    %c0_i32_0 = arith.constant 0 : i32
    %c0_i32_1 = arith.constant 0 : i32
    return %c0_i32, %c0_i32_0 : i32, i32
  }
  func.func @transform_6(%arg0: i32) -> (i32, i32) {
    %c0_i32 = arith.constant 0 : i32
    %c0_i32_0 = arith.constant 0 : i32
    %c0_i32_1 = arith.constant 0 : i32
    return %c0_i32, %c0_i32_0 : i32, i32
  }
  func.func @transform_7(%arg0: i32) -> (i32, i32) {
    %c0_i32 = arith.constant 0 : i32
    %c0_i32_0 = arith.constant 0 : i32
    %c0_i32_1 = arith.constant 0 : i32
    return %c0_i32, %c0_i32_0 : i32, i32
  }
  func.func @transform_8(%arg0: i32) -> (i32, i32, i32) {
    %c0_i32 = arith.constant 0 : i32
    %c0_i32_0 = arith.constant 0 : i32
    %c0_i32_1 = arith.constant 0 : i32
    return %arg0, %c0_i32, %c0_i32_0 : i32, i32, i32
  }
}

</mosaic_0001>

<bundles_post_ra>
// kernel: tpu_custom_call.1
= control target key start
LH: loop header
LB: loop body
LE: loop exit
PB: predicated region body
PF: predicated region fallthrough
CT: control target
= control target key end

     0   :  { %s6072_s0 = inlined_call_operand.hbm [shape: f32[2,8,64], index: 0, kind: input, shape index: {}]   ;;  %s6073_s1 = inlined_call_operand.hbm [shape: f32[64,192], index: 1, kind: input, shape index: {}]   ;;  %s6074_s2 = inlined_call_operand.hbm [shape: f32[4,128], index: 2, kind: input, shape index: {}]   ;;  %s6075_s3 = inlined_call_operand.vmem [shape: f32[1,128], index: 3, kind: input, shape index: {}]   ;;  %s6076_s4 = inlined_call_operand.hbm [shape: f32[128,256], index: 4, kind: input, shape index: {}]   ;;  %s6077_s5 = inlined_call_operand.hbm [shape: f32[16,128], index: 5, kind: input, shape index: {}]   ;;  %s6078_s6 = inlined_call_operand.vmem [shape: f32[1,128], index: 6, kind: input, shape index: {}]   ;;  %s6079_s7 = inlined_call_operand.hbm [shape: f32[128,128], index: 7, kind: input, shape index: {}]   ;;  %s6080_s8 = inlined_call_operand.hbm [shape: f32[2,8,128], index: 8, kind: output, shape index: {}]  }
   0x1   :  { %6226 = sst [smem:[#allocation52_spill]] %s6073_s1 }
   0x2   :  { %6227 = sst [smem:[#allocation53_spill]] %s6074_s2 }
   0x3   :  { %6228 = sst [smem:[#allocation54_spill]] %s6076_s4 }
   0x4   :  { %13 = vsyncpa [#allocation7], 0 }
   0x5   :  { %15 = vsyncpa [#allocation7 + $0x1], 0 }
   0x6   :  { %16 = vsyncpa [#allocation10], 0 }
   0x7   :  { %17 = vsyncpa [#allocation13], 0 }
   0x8   :  { %18 = vsyncpa [#allocation16], 0 }
   0x9   :  { %19 = vsyncpa [#allocation8], 0 }
   0xa   :  { %21 = vsyncpa [#allocation8 + $0x1], 0  ;;  %s4311_s27 = smov 0   ;;  %s4313_s28 = smov 0  }
   0xb   :  { %s4315_s29 = smov 0   ;;  %s4317_s30 = smov 0  }
   0xc LB: > { %s4251_s9 = smov [#allocation9]   ;;  %s4332_s11 = sadd.s32 4294967295, %s4249_s30   ;;  %s4249_s30 = sphi %s4317_s30, %s6402_s30   ;;  %s4245_s29 = sphi %s4315_s29, %s6401_s29   ;;  %s4241_s28 = sphi %s4313_s28, %s6400_s28   ;;  %s4237_s27 = sphi %s4311_s27, %s6399_s27  }
   0xd   : > { %s243_s10 = sshll.u32 %s4251_s9, 4  ;;  %p3529_p0 = scmp.ge.s32.totalorder %s4249_s30, 1  ;;  %s244_s10 = int_to_ptr.vmem [resolvable:$true] %s243_s10 }
   0xe   : > { %p6081_p1 = scmp.eq.s32.totalorder %s4332_s11, 0  ;;  %p231_p2 = scmp.lt.s32.totalorder %s4249_s30, 3 }
   0xf   : > { %s4252_s13 = smov [#allocation12]   ;;  %s4253_s16 = smov [#allocation11]  }
  0x10   : > { %p4337_p3 = pnand %p3529_p0, %p231_p2  ;;  %s270_s14 = sshll.u32 %s4252_s13, 4  ;;  %s4350_s14 = int_to_ptr.vmem [resolvable:$true] %s270_s14 }
  0x11   : > { %s257_s17 = sshll.u32 %s4253_s16, 4  ;;  %s4026_s19 = scalar_lea.vmem %s244_s10, 2048  ;;  %s4352_s17 = int_to_ptr.vmem [resolvable:$true] %s257_s17 }
  0x12   : > { %s6229_s12 = scalar_select %p4337_p3, 1, 0 }
  0x13   : > { %p3890_p5 = pneg %p4337_p3  ;;  %p4027_p8 = scmp.ne.s32.totalorder %s244_s10, %s4026_s19 }
  0x14   : > { %p4034_p11 = scmp.lt.s32.totalorder %s244_s10, %s244_s10  ;;  %p4035_p12 = scmp.lt.s32.totalorder %s4026_s19, %s4026_s19 }
  0x15   : > { %p4346_p6 = pnand %p3890_p5, %p6081_p1 }
  0x16   : > { %p4036_p13 = por %p4035_p12, %p4034_p11 }
  0x17   : > { %p4356_p7 = pneg %p4346_p6 }
  0x19   : > { %p4029_p9 = pnand %p4027_p8, %p4356_p7 }
  0x1b   : > { %p4030_p10 = pneg %p4029_p9 }
  0x1d   : > { %p4037_p0 = pnand %p4036_p13, %p4030_p10 }
  0x1f   : > { %4040 = shalt.err (!%p4037_p0)
}
  0x20   : > { %s4254_s20 = smov 256   ;;  %s4255_s21 = smov 16  }
  0x21   : > { %s6232_s1 = sld [smem:[#allocation52_spill]]  ;;  %s4052_s24 = scalar_lea.vmem %s4350_s14, 4096 }
  0x22   : > { %p4053_p2 = scmp.ne.s32.totalorder %s4350_s14, %s4052_s24  ;;  %p4060_p9 = scmp.lt.s32.totalorder %s4350_s14, %s4350_s14 }
  0x23   : > { %p4061_p10 = scmp.lt.s32.totalorder %s4052_s24, %s4052_s24 }
  0x24   : > { %p4055_p5 = pnand %p4053_p2, %p4356_p7 }
  0x25   : > { %p4062_p11 = por %p4061_p10, %p4060_p9 }
  0x26   : > { %p4056_p8 = pneg %p4055_p5 }
  0x27   : > { %3893 = dma.hbm_to_vmem [thread:$0]  (!%p4346_p6), %s6232_s1, 2048, %s244_s10, [#allocation10], %s4254_s20, %s4254_s20, %s4255_s21  }
  0x28   : > { %p4063_p12 = pnand %p4062_p11, %p4056_p8 }
  0x2a   : > { %4066 = shalt.err (!%p4063_p12)
}
  0x2b   : > { %s6233_s4 = sld [smem:[#allocation54_spill]]  ;;  %s4078_s9 = scalar_lea.vmem %s4352_s17, 64 }
  0x2c   : > { %p4079_p13 = scmp.ne.s32.totalorder %s4352_s17, %s4078_s9  ;;  %p4086_p5 = scmp.lt.s32.totalorder %s4352_s17, %s4352_s17 }
  0x2d   : > { %p4087_p8 = scmp.lt.s32.totalorder %s4078_s9, %s4078_s9 }
  0x2e   : > { %p4081_p0 = pnand %p4079_p13, %p4356_p7 }
  0x2f   : > { %p4088_p9 = por %p4087_p8, %p4086_p5 }
  0x30   : > { %p4082_p2 = pneg %p4081_p0 }
  0x31   : > { %3899 = dma.hbm_to_vmem [thread:$0]  (!%p4346_p6), %s6233_s4, 4096, %s4350_s14, [#allocation13], %s4254_s20, %s4254_s20, %s4255_s21  }
  0x32   : > { %p4089_p10 = pnand %p4088_p9, %p4082_p2 }
  0x34   : > { %4092 = shalt.err (!%p4089_p10)
}
  0x35   : > { %s6234_s2 = sld [smem:[#allocation53_spill]]  ;;  %s4256_s14 = smov [#allocation14]  }
  0x36   : > { %s283_s16 = sshll.u32 %s4256_s14, 4  ;;  %s284_s16 = int_to_ptr.vmem [resolvable:$true] %s283_s16 }
  0x37   : > { %s4104_s19 = scalar_lea.vmem %s284_s16, 256  ;;  %p4112_p0 = scmp.lt.s32.totalorder %s284_s16, %s284_s16 }
  0x38   : > { %p4105_p11 = scmp.ne.s32.totalorder %s284_s16, %s4104_s19  ;;  %p4113_p5 = scmp.lt.s32.totalorder %s4104_s19, %s4104_s19 }
  0x3a   : > { %p4107_p12 = pnand %p4105_p11, %p4356_p7  ;;  %p4114_p2 = por %p4113_p5, %p4112_p0 }
  0x3b   : > { %3896 = dma.hbm_to_vmem [thread:$0]  (!%p4346_p6), %s6234_s2, 64, %s4352_s17, [#allocation10]  }
  0x3c   : > { %p4108_p13 = pneg %p4107_p12 }
  0x3e   : > { %p4115_p8 = pnand %p4114_p2, %p4108_p13 }
  0x40   : > { %4118 = shalt.err (!%p4115_p8)
}
  0x41   : > { %s4257_s20 = smov 128   ;;  %s4258_s21 = smov 8  }
  0x42   : > { %3902 = dma.hbm_to_vmem [thread:$0]  (!%p4346_p6), %s6077_s5, 256, %s284_s16, [#allocation13], %s4257_s20, %s4257_s20, %s4258_s21  }
  0x43   : > { %s4259_s23 = smov [#allocation15]  }
  0x44   : > { %s299_s24 = sshll.u32 %s4259_s23, 4  ;;  %s300_s24 = int_to_ptr.vmem [resolvable:$true] %s299_s24 }
  0x45   : > { %s4130_s25 = scalar_lea.vmem %s300_s24, 2048  ;;  %p4138_p12 = scmp.lt.s32.totalorder %s300_s24, %s300_s24 }
  0x46   : > { %p4131_p9 = scmp.ne.s32.totalorder %s300_s24, %s4130_s25  ;;  %p4139_p13 = scmp.lt.s32.totalorder %s4130_s25, %s4130_s25 }
  0x48   : > { %p4133_p10 = pnand %p4131_p9, %p4356_p7  ;;  %p4140_p0 = por %p4139_p13, %p4138_p12 }
  0x4a   : > { %p4134_p11 = pneg %p4133_p10 }
  0x4c   : > { %p4141_p5 = pnand %p4140_p0, %p4134_p11 }
  0x4e   : > { %4144 = shalt.err (!%p4141_p5)
}
  0x4f   : > { %3905 = dma.hbm_to_vmem [thread:$0]  (!%p4346_p6), %s6079_s7, 2048, %s300_s24, [#allocation16], %s4257_s20, %s4257_s20, %s4258_s21  }
  0x50   : > { %s3528_s18 = sadd.s32 4294967294, %s4249_s30   ;;  %s4407_s15 = sadd.s32 1, %s4249_s30  }
  0x51   : > { %s34_s10 = sadd.s32 1, %s4245_s29  ;;  %s31_s13 = ssub.s32 %s4249_s30, %s4407_s15 }
  0x52   : > { %p41_p7 = scmp.ne.s32.totalorder %s4245_s29, %s4241_s28  ;;  %p32_p2 = scmp.eq.s32.totalorder %s31_s13, 0 }
  0x53   : > { %p42_p8 = scmp.eq.s32.totalorder %s4249_s30, 0  ;;  %p47_p9 = scmp.ne.s32.totalorder %s4241_s28, %s4237_s27 }
  0x54   : > { %p218_p10 = scmp.eq.s32.totalorder %s4332_s11, 1  ;;  %p224_p13 = scmp.eq.s32.totalorder %s3528_s18, 1 }
  0x55   : > { %s4419_s14 = scalar_select %p32_p2, %s4245_s29, %s34_s10  }
  0x56   : > { %p43_p11 = por %p42_p8, %p41_p7  ;;  %p4423_p12 = por %p6081_p1, %p47_p9 }
  0x57   : > { %p4427_p6 = por %p218_p10, %p41_p7  ;;  %p3919_p0 = scmp.lt.s32.totalorder %s4249_s30, 2 }
  0x58   : > { %s6235_s16 = scalar_select %p4423_p12, 1, 0 }
  0x59   : > { %s6236_s19 = scalar_select %p4427_p6, 1, 0 }
  0x5a   : > { %s313_s20 = sand.u32 1, %s4245_s29   ;;  %p4433_p5 = por %p224_p13, %p47_p9 }
  0x5b   : > { %s3536_s22 = sshll.u32 %s313_s20, 3  ;;  %s3537_s17 = sshll.u32 %s4249_s30, 7 }
  0x5c   : > { %s6237_s21 = scalar_select %p4433_p5, 1, 0 }
  0x5d   : > { %s4441_s25 = scalar_lea.hbm %s6072_s0, %s3537_s17  ;;  %s317_s26 = scalar_lea.vmem [#allocation6], %s3536_s22 }
  0x5e   : > { %s324_s9 = sshll.u32 %s317_s26, 4  ;;  %p4443_p7 = pnand %p3919_p0, %p43_p11  ;;  %s325_s9 = int_to_ptr.vmem [resolvable:$true] %s324_s9 }
  0x5f   : > { %s314_s10 = scalar_lea.sflag [#allocation7], %s313_s20  ;;  %s4145_s13 = scalar_lea.hbm %s4441_s25, 128 }
  0x60   : > { %p4146_p2 = scmp.ne.s32.totalorder %s4441_s25, %s4145_s13  ;;  %p4147_p8 = pneg %p4443_p7 }
  0x61   : > { %s4150_s24 = scalar_lea.hbm %s6072_s0, 256  ;;  %p4151_p11 = scmp.lt.s32.totalorder %s4441_s25, %s6072_s0 }
  0x62   : > { %p4148_p9 = pnand %p4147_p8, %p4146_p2  ;;  %p4152_p13 = scmp.lt.s32.totalorder %s4150_s24, %s4145_s13 }
  0x64   : > { %p4149_p10 = pneg %p4148_p9  ;;  %p4153_p0 = por %p4152_p13, %p4151_p11 }
  0x66   : > { %p4154_p4 = pnand %p4153_p0, %p4149_p10 }
  0x68   : > { %4157 = shalt.err (!%p4154_p4)
}
  0x69   : > { %s4158_s26 = scalar_lea.vmem %s325_s9, 128  ;;  %s4260_s20 = smov [#allocation6]  }
  0x6a   : > { %p4159_p1 = scmp.ne.s32.totalorder %s325_s9, %s4158_s26  ;;  %s4163_s2 = sshll.u32 %s4260_s20, 4  ;;  %s4164_s2 = int_to_ptr.vmem [resolvable:$false] %s4163_s2 }
  0x6b   : > { %s4165_s4 = scalar_lea.vmem %s4164_s2, 256  ;;  %p4166_p2 = scmp.lt.s32.totalorder %s325_s9, %s4164_s2 }
  0x6c   : > { %p4161_p5 = pnand %p4159_p1, %p4147_p8  ;;  %p4167_p9 = scmp.lt.s32.totalorder %s4165_s4, %s4158_s26 }
  0x6e   : > { %p4162_p6 = pneg %p4161_p5  ;;  %p4168_p12 = por %p4167_p9, %p4166_p2 }
  0x70   : > { %p4169_p3 = pnand %p4168_p12, %p4162_p6 }
  0x72   : > { %4172 = shalt.err (!%p4169_p3)
}
  0x73   : > { %3909 = dma.hbm_to_vmem [thread:$0]  (!%p4443_p7), %s4441_s25, 128, %s325_s9, %s314_s10  }
  0x74   : > { %p6239_p10 = scmp.ne.s32.totalorder %s6229_s12, 0 }
  0x76   : > { %333 = sbr.rel (%p6239_p10) target bundleno = 1283 (0x503), region = 52 }
  0x7b   : > { %s4464_s1 = sand.u32 1, %s4241_s28   ;;  %p6240_p1 = scmp.ne.s32.totalorder %s6235_s16, 0 }
  0x7c   : > { %s3539_s13 = sshll.u32 %s4464_s1, 3  ;;  %s336_s2 = scalar_lea.sflag [#allocation7], %s4464_s1 }
  0x7d   : > { %s4470_s4 = scalar_lea.vmem [#allocation6], %s3539_s13 }
  0x7e   : > { %4216 = dma.done.wait (%p6240_p1), %s336_s2, 128  }
  0x7f   : > { %4218 = vsyncadd (%p6240_p1), %s336_s2, 4294967168  ;;  %p6241_p3 = scmp.eq.s32.totalorder %s4332_s11, 0 }
  0x81   : > { %4220 = dma.done.wait (%p6241_p3), [#allocation10], 2112   ;;  %p6242_p4 = pmov %p6241_p3 }
  0x82   : > { %p6243_p12 = pmov %p6241_p3 }
  0x83   : > { %4222 = vsyncadd (%p6242_p4), [#allocation10], 4294965184 }
  0x84   : > { %4224 = dma.done.wait (%p6243_p12), [#allocation13], 4352   ;;  %p6244_p6 = pmov %p6241_p3 }
  0x85   : > { %p6245_p5 = pmov %p6241_p3 }
  0x86   : > { %4226 = vsyncadd (%p6244_p6), [#allocation13], 4294962944 }
  0x87   : > { %4228 = dma.done.wait (%p6245_p5), [#allocation16], 2048   ;;  %p6246_p7 = pmov %p6241_p3 }
  0x88   : > { %v6105_v0 = vmov 0.0   ;;  %v408_v1 = vld [vmem:[#allocation9 + $0x78] sm:$0xff]  ;;  %v407_v2 = vld [vmem:[#allocation9 + $0x70] sm:$0xff]  ;;  %v406_v3 = vld [vmem:[#allocation9 + $0x68] sm:$0xff]  ;;  %vm409_vm0 = vcmask 523264   ;;  %s4262_s12 = smov 64  }
  0x89   : > { %4230 = vsyncadd (%p6246_p7), [#allocation16], 4294965248  ;;  %493 = vmatprep.mubr.f32.mxu0 %v6105_v0  ;;  %649 = vmatprep.mubr.f32.mxu1 %v6105_v0  ;;  %v4490_v4 = vand.u32 4294901760, %v408_v1  ;;  %v4492_v5 = vand.u32 4294901760, %v407_v2  ;;  %v4494_v6 = vand.u32 4294901760, %v406_v3  ;;  %v405_v7 = vld [vmem:[#allocation9 + $0x60] sm:$0xff] }
  0x8a   : > { %v404_v8 = vld [vmem:[#allocation9 + $0x58] sm:$0xff]  ;;  %v403_v9 = vld [vmem:[#allocation9 + $0x50] sm:$0xff]  ;;  %v4496_v10 = vand.u32 4294901760, %v405_v7  ;;  %v402_v13 = vld [vmem:[#allocation9 + $0x48] sm:$0xff]  ;;  %vm4264_vm5 = vmmov 0   ;;  %s3551_s10 = sshll.u32 %s4332_s11, 7 }
  0x8b   : > { %v4498_v11 = vand.u32 4294901760, %v404_v8  ;;  %v4500_v12 = vand.u32 4294901760, %v403_v9  ;;  %v401_v14 = vld [vmem:[#allocation9 + $0x40] sm:$0xff]  ;;  %v400_v15 = vld [vmem:[#allocation9 + $0x38] sm:$0xff]  ;;  %430 = vmatprep.subr.mxu0 %v4490_v4  ;;  %v4503_v16 = vand.u32 4294901760, %v402_v13  ;;  %v4510_v19 = vsub.f32 %v408_v1, %v4490_v4  ;;  %v399_v20 = vld [vmem:[#allocation9 + $0x30] sm:$0xff]  ;;  %s3401_s26 = scalar_lea.hbm %s6080_s8, %s3551_s10 }
  0x8c   : > { %v4505_v17 = vand.u32 4294901760, %v401_v14  ;;  %v4507_v18 = vand.u32 4294901760, %v400_v15  ;;  %v4512_v21 = vld [vmem:[#allocation9 + $0x28] sm:$0xff]  ;;  %v4514_v22 = vld [vmem:[#allocation9 + $0x20] sm:$0xff]  ;;  %432 = vmatpush1.msra.mxu0 %v4492_v5  ;;  %v4517_v23 = vand.u32 4294901760, %v399_v20  ;;  %v4520_v24 = vsub.f32 %v407_v2, %v4492_v5  ;;  %v4528_v27 = vld [vmem:[#allocation9 + $0x18] sm:$0xff] }
  0x8d   : > { %v4523_v25 = vand.u32 4294901760, %v4512_v21  ;;  %v4526_v26 = vsub.f32 %v406_v3, %v4494_v6  ;;  %v4530_v28 = vld [vmem:[#allocation9 + $0x10] sm:$0xff]  ;;  %v4532_v29 = vld [vmem:[#allocation9 + $0x8] sm:$0xff]  ;;  %434 = vmatprep.subr.mxu0 %v4494_v6  ;;  %v523_v30 = vand.u32 4294901760, %v4510_v19  ;;  %v4537_v31 = vand.u32 4294901760, %v4514_v22  ;;  %v4554_v38 = vld [vmem:[#allocation9] sm:$0xff] }
  0x8e   : > { %v4540_v32 = vsub.f32 %v405_v7, %v4496_v10  ;;  %v4543_v33 = vand.u32 4294901760, %v4528_v27  ;;  %436 = vmatpush1.msra.mxu0 %v4496_v10  ;;  %v529_v34 = vand.u32 4294901760, %v4520_v24  ;;  %v4549_v36 = vsub.f32 %v404_v8, %v4498_v11  ;;  %v392_v51 = vld [vmem:[%s4470_s4] sm:$0xff]  ;;  %s391_s17 = scalar_lea.vmem [#allocation17], %s3539_s13  ;;  %s3390_s20 = scalar_lea.sflag [#allocation8], %s4464_s1 }
  0x8f   : > { %v535_v35 = vand.u32 4294901760, %v4526_v26  ;;  %v4552_v37 = vand.u32 4294901760, %v4530_v28  ;;  %438 = vmatprep.subr.mxu0 %v4498_v11  ;;  %v524_v39 = vsub.f32 %v4510_v19, %v523_v30  ;;  %v4562_v41 = vsub.f32 %v403_v9, %v4500_v12  ;;  %s3403_s23 = sshll.u32 %s391_s17, 4  ;;  %p6396_p11 = scmp.ne.s32.totalorder %s6236_s19, 0  ;;  %s3404_s23 = int_to_ptr.vmem [resolvable:$true] %s3403_s23 }
  0x90   : > { %v541_v40 = vand.u32 4294901760, %v4540_v32  ;;  %v4565_v42 = vand.u32 4294901760, %v4532_v29  ;;  %440 = vmatpush1.msra.mxu0 %v4500_v12  ;;  %v530_v43 = vsub.f32 %v4520_v24, %v529_v34  ;;  %v547_v45 = vand.u32 4294901760, %v4549_v36  ;;  %s4173_s2 = scalar_lea.vmem %s3404_s23, 128  ;;  %s4265_s4 = smov [#allocation17]  }
  0x91   : > { %v536_v44 = vsub.f32 %v4526_v26, %v535_v35  ;;  %v4576_v46 = vsub.f32 %v402_v13, %v4503_v16  ;;  %442 = vmatprep.subr.mxu0 %v4503_v16  ;;  %v525_v47 = vand.u32 4294901760, %v524_v39  ;;  %v553_v49 = vand.u32 4294901760, %v4562_v41  ;;  %p4174_p8 = scmp.ne.s32.totalorder %s3404_s23, %s4173_s2  ;;  %s4177_s11 = sshll.u32 %s4265_s4, 4  ;;  %s4178_s11 = int_to_ptr.vmem [resolvable:$false] %s4177_s11 }
  0x92   : > { %v542_v48 = vsub.f32 %v4540_v32, %v541_v40  ;;  %v4584_v50 = vand.u32 4294901760, %v4554_v38  ;;  %444 = vmatpush1.msra.mxu0 %v4505_v17  ;;  %v531_v52 = vand.u32 4294901760, %v530_v43  ;;  %v548_v54 = vsub.f32 %v4549_v36, %v547_v45  ;;  %s4179_s13 = scalar_lea.vmem %s4178_s11, 256  ;;  %p4180_p2 = scmp.lt.s32.totalorder %s3404_s23, %s4178_s11 }
  0x93   : > { %v537_v53 = vand.u32 4294901760, %v536_v44  ;;  %v559_v55 = vand.u32 4294901760, %v4576_v46  ;;  %446 = vmatprep.subr.mxu0 %v4507_v18  ;;  %526 = vmatprep.subr.mxu1 %v525_v47  ;;  %v554_v57 = vsub.f32 %v4562_v41, %v553_v49  ;;  %v4597_v58 = vsub.f32 %v401_v14, %v4505_v17  ;;  %p4175_p13 = pnand %p4174_p8, %p6396_p11  ;;  %p4181_p9 = scmp.lt.s32.totalorder %s4179_s13, %s4173_s2 }
  0x94   : > { %v543_v56 = vand.u32 4294901760, %v542_v48  ;;  %v4600_v59 = vsub.f32 %v400_v15, %v4507_v18  ;;  %448 = vmatpush1.msra.mxu0 %v4517_v23  ;;  %532 = vmatpush1.msra.mxu1 %v531_v52  ;;  %v549_v60 = vand.u32 4294901760, %v548_v54  ;;  %v411_v62 = vsel %vm409_vm0, %v392_v51, 0 }
  0x95   : > { %v560_v61 = vsub.f32 %v4576_v46, %v559_v55  ;;  %v4608_v63 = vsub.f32 %v399_v20, %v4517_v23  ;;  %450 = vmatprep.subr.mxu0 %v4523_v25  ;;  %538 = vmatprep.subr.mxu1 %v537_v53  ;;  %v555_v1 = vand.u32 4294901760, %v554_v57  ;;  %v565_v2 = vand.u32 4294901760, %v4597_v58  ;;  %p4176_p0 = pneg %p4175_p13  ;;  %p4182_p10 = por %p4181_p9, %p4180_p2 }
  0x96   : > { %v571_v3 = vand.u32 4294901760, %v4600_v59  ;;  %v4613_v7 = vand.u32 4294901760, %v411_v62  ;;  %452 = vmatpush1.msra.mxu0 %v4537_v31  ;;  %544 = vmatpush1.msra.mxu1 %v543_v56  ;;  %v4619_v13 = vsub.f32 %v4512_v21, %v4523_v25  ;;  %v4623_v14 = vsub.f32 %v4514_v22, %v4537_v31 }
  0x97   : > { %v561_v8 = vand.u32 4294901760, %v560_v61  ;;  %v577_v9 = vand.u32 4294901760, %v4608_v63  ;;  %454 = vmatprep.subr.mxu0 %v4543_v33  ;;  %550 = vmatprep.subr.mxu1 %v549_v60  ;;  %v566_v15 = vsub.f32 %v4597_v58, %v565_v2  ;;  %v4643_v44 = vsub.f32 %v4528_v27, %v4543_v33  ;;  %p4183_p1 = pnand %p4182_p10, %p4176_p0 }
  0x98   : > { %v572_v20 = vsub.f32 %v4600_v59, %v571_v3  ;;  %v4633_v39 = vsub.f32 %v411_v62, %v4613_v7  ;;  %456 = vmatpush1.msra.mxu0 %v4552_v37  ;;  %556 = vmatpush1.msra.mxu1 %v555_v1  ;;  %v583_v22 = vand.u32 4294901760, %v4619_v13  ;;  %v589_v43 = vand.u32 4294901760, %v4623_v14 }
  0x99   : > { %v578_v21 = vsub.f32 %v4608_v63, %v577_v9  ;;  %458 = vmatprep.subr.mxu0 %v4565_v42  ;;  %562 = vmatprep.subr.mxu1 %v561_v8  ;;  %v567_v47 = vand.u32 4294901760, %v566_v15  ;;  %v4649_v52 = vsub.f32 %v4530_v28, %v4552_v37  ;;  %v595_v56 = vand.u32 4294901760, %v4643_v44 }
  0x9a   : > { %v573_v48 = vand.u32 4294901760, %v572_v20  ;;  %v496_v51 = vand.u32 4294901760, %v4633_v39  ;;  %460 = vmatpush1.msra.mxu0 %v4584_v50  ;;  %v584_v54 = vsub.f32 %v4619_v13, %v583_v22  ;;  %v590_v27 = vsub.f32 %v4623_v14, %v589_v43 }
  0x9b   : > { %v579_v53 = vand.u32 4294901760, %v578_v21  ;;  %568 = vmatpush1.msra.mxu1 %v567_v47  ;;  %675 = vmatprep.subr.mxu0 %v4510_v19  ;;  %v601_v57 = vand.u32 4294901760, %v4649_v52  ;;  %v4666_v60 = vsub.f32 %v4532_v29, %v4565_v42  ;;  %v4670_v61 = vsub.f32 %v4554_v38, %v4584_v50 }
  0x9c   : > { %v497_v28 = vsub.f32 %v4633_v39, %v496_v51  ;;  %574 = vmatprep.subr.mxu1 %v573_v48  ;;  %v585_v62 = vand.u32 4294901760, %v584_v54  ;;  %v591_v1 = vand.u32 4294901760, %v590_v27  ;;  %v596_v8 = vsub.f32 %v4643_v44, %v595_v56 }
  0x9d   : > { %580 = vmatpush1.msra.mxu1 %v579_v53  ;;  %v602_v20 = vsub.f32 %v4649_v52, %v601_v57  ;;  %v607_v29 = vand.u32 4294901760, %v4666_v60  ;;  %v613_v21 = vand.u32 4294901760, %v4670_v61 }
  0x9e   : > { %v498_v15 = vand.u32 4294901760, %v497_v28  ;;  %586 = vmatprep.subr.mxu1 %v585_v62  ;;  %v597_v38 = vand.u32 4294901760, %v596_v8 }
  0x9f   : > { %592 = vmatpush1.msra.mxu1 %v591_v1  ;;  %v603_v47 = vand.u32 4294901760, %v602_v20  ;;  %v608_v48 = vsub.f32 %v4666_v60, %v607_v29  ;;  %v614_v53 = vsub.f32 %v4670_v61, %v613_v21 }
  0xa0   : > { %499 = vmatmul.mubr.f32.vlgmr.msra.gmra.mxu0 %v498_v15  ;;  %598 = vmatprep.subr.mxu1 %v597_v38  ;;  %v1139_v15 = vld [vmem:[#allocation12 + $0x90] sm:$0xff] }
  0xa1   : > { %678 = vmatpush1.msra.mxu0 %v4520_v24  ;;  %604 = vmatpush1.msra.mxu1 %v603_v47  ;;  %v609_v54 = vand.u32 4294901760, %v608_v48  ;;  %v615_v27 = vand.u32 4294901760, %v614_v53  ;;  %v1138_v47 = vld [vmem:[#allocation12 + $0x88] sm:$0xff] }
  0xa2   : > { %681 = vmatprep.subr.mxu0 %v4526_v26  ;;  %753 = vmatprep.mubr.f32.mxu0 %v6105_v0 }
  0xa3   : > { %684 = vmatpush1.msra.mxu0 %v4540_v32  ;;  %610 = vmatprep.subr.mxu1 %v609_v54 }
  0xa4   : > { %687 = vmatprep.subr.mxu0 %v4549_v36  ;;  %616 = vmatpush1.msra.mxu1 %v615_v27 }
  0xa5   : > { %690 = vmatpush1.msra.mxu0 %v4562_v41  ;;  %651 = vmatmul.mubr.f32.vlgmr.msra.gmra.mxu1 %v4613_v7  ;;  %v1145_v41 = vld [vmem:[#allocation12 + $0xc0] sm:$0xff] }
  0xa6   : > { %693 = vmatprep.subr.mxu0 %v4576_v46  ;;  %779 = vmatprep.subr.mxu1 %v4490_v4 }
  0xa7   : > { %696 = vmatpush1.msra.mxu0 %v4597_v58  ;;  %781 = vmatpush1.msra.mxu1 %v4492_v5 }
  0xa8   : > { %699 = vmatprep.subr.mxu0 %v4600_v59  ;;  %783 = vmatprep.subr.mxu1 %v4494_v6 }
  0xa9   : > { %702 = vmatpush1.msra.mxu0 %v4608_v63  ;;  %785 = vmatpush1.msra.mxu1 %v4496_v10 }
  0xaa   : > { %705 = vmatprep.subr.mxu0 %v4619_v13  ;;  %787 = vmatprep.subr.mxu1 %v4498_v11 }
  0xab   : > { %708 = vmatpush1.msra.mxu0 %v4623_v14  ;;  %789 = vmatpush1.msra.mxu1 %v4500_v12  ;;  %v1142_v14 = vld [vmem:[#allocation12 + $0xa8] sm:$0xff] }
  0xac   : > { %711 = vmatprep.subr.mxu0 %v4643_v44  ;;  %791 = vmatprep.subr.mxu1 %v4503_v16  ;;  %v4861_v8 = vand.u32 4294901760, %v1142_v14 }
  0xad   : > { %714 = vmatpush1.msra.mxu0 %v4649_v52  ;;  %793 = vmatpush1.msra.mxu1 %v4505_v17 }
  0xae   : > { %717 = vmatprep.subr.mxu0 %v4666_v60  ;;  %795 = vmatprep.subr.mxu1 %v4507_v18  ;;  %v1140_v60 = vld [vmem:[#allocation12 + $0x98] sm:$0xff]  ;;  %v4875_v54 = vsub.f32 %v1142_v14, %v4861_v8 }
  0xaf   : > { %720 = vmatpush1.msra.mxu0 %v4670_v61  ;;  %797 = vmatpush1.msra.mxu1 %v4517_v23  ;;  %v4877_v27 = vand.u32 4294901760, %v1140_v60 }
  0xb0   : > { %756 = vmatmul.mubr.f32.vlgmr.msra.gmra.mxu0 %v4633_v39  ;;  %871 = vmatprep.subr.mxu0 %v523_v30  ;;  %v1147_v30 = vld [vmem:[#allocation12 + $0xd0] sm:$0xff] }
  0xb1   : > { %875 = vmatpush1.msra.mxu0 %v529_v34  ;;  %799 = vmatprep.subr.mxu1 %v4523_v25  ;;  %v1146_v34 = vld [vmem:[#allocation12 + $0xc8] sm:$0xff] }
  0xb2   : > { %879 = vmatprep.subr.mxu0 %v535_v35  ;;  %801 = vmatpush1.msra.mxu1 %v4537_v31 }
  0xb3   : > { %883 = vmatpush1.msra.mxu0 %v541_v40  ;;  %803 = vmatprep.subr.mxu1 %v4543_v33  ;;  %v4814_v40 = vand.u32 4294901760, %v1146_v34 }
  0xb4   : > { %887 = vmatprep.subr.mxu0 %v547_v45  ;;  %805 = vmatpush1.msra.mxu1 %v4552_v37 }
  0xb5   : > { %891 = vmatpush1.msra.mxu0 %v553_v49  ;;  %807 = vmatprep.subr.mxu1 %v4565_v42  ;;  %v4824_v49 = vand.u32 4294901760, %v1145_v41  ;;  %v4832_v63 = vsub.f32 %v1146_v34, %v4814_v40  ;;  %v6089_v34 = vand.u32 4294901760, %v4875_v54 }
  0xb6   : > { %895 = vmatprep.subr.mxu0 %v559_v55  ;;  %809 = vmatpush1.msra.mxu1 %v4584_v50 }
  0xb7   : > { %842 = vmatprep.mubr.f32.mxu1 %v6105_v0  ;;  %899 = vmatpush1.msra.mxu0 %v565_v2  ;;  %v1143_v2 = vld [vmem:[#allocation12 + $0xb0] sm:$0xff]  ;;  %v4840_v13 = vsub.f32 %v1145_v41, %v4824_v49  ;;  %v4894_v41 = vand.u32 4294901760, %v1138_v47 }
  0xb8   : > { %846 = vmatmul.mubr.f32.vlgmr.msra.gmra.mxu1 %v496_v51  ;;  %903 = vmatprep.subr.mxu0 %v571_v3  ;;  %v1141_v51 = vld [vmem:[#allocation12 + $0xa0] sm:$0xff] }
  0xb9   : > { %989 = vmatprep.subr.mxu1 %v4490_v4  ;;  %907 = vmatpush1.msra.mxu0 %v577_v9  ;;  %v1152_v4 = vld [vmem:[#allocation12 + $0xf8] sm:$0xff]  ;;  %v6093_v28 = vand.u32 4294901760, %v4840_v13  ;;  %v4870_v38 = vand.u32 4294901760, %v1141_v51 }
  0xba   : > { %991 = vmatpush1.msra.mxu1 %v4492_v5  ;;  %911 = vmatprep.subr.mxu0 %v583_v22  ;;  %v4777_v5 = vand.u32 4294901760, %v1152_v4 }
  0xbb   : > { %993 = vmatprep.subr.mxu1 %v4494_v6  ;;  %915 = vmatpush1.msra.mxu0 %v589_v43  ;;  %v1151_v6 = vld [vmem:[#allocation12 + $0xf0] sm:$0xff]  ;;  %v6095_v43 = vand.u32 4294901760, %v4832_v63 }
  0xbc   : > { %995 = vmatpush1.msra.mxu1 %v4496_v10  ;;  %919 = vmatprep.subr.mxu0 %v595_v56  ;;  %6247 = vst [vmem:[#allocation23_spill] sm:$0xff] %v4777_v5  ;;  %v4779_v10 = vand.u32 4294901760, %v1151_v6 }
  0xbd   : > { %997 = vmatprep.subr.mxu1 %v4498_v11  ;;  %923 = vmatpush1.msra.mxu0 %v601_v57  ;;  %v1150_v11 = vld [vmem:[#allocation12 + $0xe8] sm:$0xff]  ;;  %v4853_v57 = vand.u32 4294901760, %v1143_v2  ;;  %v1300_v62 = vsub.f32 %v4832_v63, %v6095_v43 }
  0xbe   : > { %999 = vmatpush1.msra.mxu1 %v4500_v12  ;;  %927 = vmatprep.subr.mxu0 %v607_v29  ;;  %v4782_v12 = vsub.f32 %v1152_v4, %v4777_v5  ;;  %v1306_v29 = vsub.f32 %v4840_v13, %v6093_v28  ;;  %v1137_v4 = vld [vmem:[#allocation12 + $0x80] sm:$0xff] }
  0xbf   : > { %1001 = vmatprep.subr.mxu1 %v4503_v16  ;;  %931 = vmatpush1.msra.mxu0 %v613_v21  ;;  %v4784_v16 = vand.u32 4294901760, %v1150_v11  ;;  %v4868_v21 = vsub.f32 %v1143_v2, %v4853_v57  ;;  %v1301_v48 = vand.u32 4294901760, %v1300_v62  ;;  %v1136_v2 = vld [vmem:[#allocation12 + $0x78] sm:$0xff] }
  0xc0   : > { %964 = vmatprep.mubr.f32.mxu0 %v6105_v0  ;;  %1003 = vmatpush1.msra.mxu1 %v4505_v17  ;;  %6248 = vst [vmem:[#allocation24_spill] sm:$0xff] %v4782_v12  ;;  %v1149_v17 = vld [vmem:[#allocation12 + $0xe0] sm:$0xff]  ;;  %v6103_v24 = vand.u32 4294901760, %v4782_v12 }
  0xc1   : > { %966 = vmatmul.mubr.f32.vlgmr.msra.gmra.mxu0 %v4613_v7  ;;  %1005 = vmatprep.subr.mxu1 %v4507_v18  ;;  %v4788_v18 = vsub.f32 %v1151_v6, %v4779_v10  ;;  %v4790_v19 = vand.u32 4294901760, %v1149_v17  ;;  %v1307_v6 = vand.u32 4294901760, %v1306_v29  ;;  %v4927_v29 = vand.u32 4294901760, %v1136_v2 }
  0xc2   : > { %1052 = vmatprep.mubr.f32.mxu1 %v6105_v0  ;;  %1007 = vmatpush1.msra.mxu1 %v4517_v23  ;;  %v1148_v23 = vld [vmem:[#allocation12 + $0xd8] sm:$0xff]  ;;  %v1264_v35 = vsub.f32 %v4782_v12, %v6103_v24  ;;  %v1125_v24 = vld [vmem:[#allocation12 + $0x20] sm:$0xff] }
  0xc3   : > { %1249 = vmatprep.mubr.f32.mxu0 %v6105_v0  ;;  %1009 = vmatprep.subr.mxu1 %v4523_v25  ;;  %v4795_v25 = vsub.f32 %v1150_v11, %v4784_v16  ;;  %v4797_v26 = vand.u32 4294901760, %v1148_v23  ;;  %v4802_v32 = vsub.f32 %v1149_v17, %v4790_v19  ;;  %v6091_v11 = vand.u32 4294901760, %v4868_v21 }
  0xc4   : > { %1011 = vmatpush1.msra.mxu1 %v4537_v31  ;;  %1154 = vmatprep.subr.mxu0 %v4777_v5  ;;  %v6102_v31 = vand.u32 4294901760, %v4788_v18  ;;  %v1265_v55 = vand.u32 4294901760, %v1264_v35  ;;  %v4882_v17 = vsub.f32 %v1141_v51, %v4870_v38  ;;  %v4892_v35 = vsub.f32 %v1140_v60, %v4877_v27 }
  0xc5   : > { %1013 = vmatprep.subr.mxu1 %v4543_v33  ;;  %1156 = vmatpush1.msra.mxu0 %v4779_v10  ;;  %v4804_v33 = vand.u32 4294901760, %v1147_v30  ;;  %v6100_v36 = vand.u32 4294901760, %v4795_v25  ;;  %v6099_v45 = vand.u32 4294901760, %v4802_v32 }
  0xc6   : > { %1015 = vmatpush1.msra.mxu1 %v4552_v37  ;;  %1158 = vmatprep.subr.mxu0 %v4784_v16  ;;  %v4812_v37 = vsub.f32 %v1148_v23, %v4797_v26  ;;  %v4884_v23 = vand.u32 4294901760, %v1139_v15  ;;  %v6085_v14 = vand.u32 4294901760, %v4892_v35 }
  0xc7   : > { %1017 = vmatprep.subr.mxu1 %v4565_v42  ;;  %1160 = vmatpush1.msra.mxu0 %v4790_v19  ;;  %v1270_v42 = vsub.f32 %v4788_v18, %v6102_v31  ;;  %v4822_v46 = vsub.f32 %v1147_v30, %v4804_v33  ;;  %v1276_v58 = vsub.f32 %v4795_v25, %v6100_v36  ;;  %v1126_v36 = vld [vmem:[#allocation12 + $0x28] sm:$0xff] }
  0xc8   : > { %1019 = vmatpush1.msra.mxu1 %v4584_v50  ;;  %1162 = vmatprep.subr.mxu0 %v4797_v26  ;;  %v1144_v50 = vld [vmem:[#allocation12 + $0xb8] sm:$0xff]  ;;  %v6098_v59 = vand.u32 4294901760, %v4812_v37 }
  0xc9   : > { %1054 = vmatmul.mubr.f32.vlgmr.msra.gmra.mxu1 %v4613_v7  ;;  %1164 = vmatpush1.msra.mxu0 %v4804_v33  ;;  %v1271_v3 = vand.u32 4294901760, %v1270_v42  ;;  %v1282_v7 = vsub.f32 %v4802_v32, %v6099_v45  ;;  %v6096_v9 = vand.u32 4294901760, %v4822_v46  ;;  %v1277_v39 = vand.u32 4294901760, %v1276_v58 }
  0xca   : > { %1485 = vmatprep.mubr.f32.mxu1 %v6105_v0  ;;  %1166 = vmatprep.subr.mxu0 %v4814_v40  ;;  %v1288_v22 = vsub.f32 %v4812_v37, %v6098_v59  ;;  %v4847_v44 = vand.u32 4294901760, %v1144_v50  ;;  %v1318_v42 = vsub.f32 %v4868_v21, %v6091_v11  ;;  %v4904_v58 = vand.u32 4294901760, %v1137_v4 }
  0xcb   : > { %1168 = vmatpush1.msra.mxu0 %v4824_v49  ;;  %1266 = vmatprep.subr.mxu1 %v1265_v55  ;;  %v1283_v52 = vand.u32 4294901760, %v1282_v7  ;;  %v1294_v56 = vsub.f32 %v4822_v46, %v6096_v9  ;;  %v4902_v55 = vsub.f32 %v1139_v15, %v4884_v23  ;;  %v1324_v7 = vsub.f32 %v4875_v54, %v6089_v34 }
  0xcc   : > { %1272 = vmatpush1.msra.mxu1 %v1271_v3  ;;  %v1289_v61 = vand.u32 4294901760, %v1288_v22  ;;  %v4859_v1 = vsub.f32 %v1144_v50, %v4847_v44  ;;  %1170 = vmatprep.subr.mxu0 %v4847_v44  ;;  %v6088_v50 = vand.u32 4294901760, %v4882_v17  ;;  %v1135_v22 = vld [vmem:[#allocation12 + $0x70] sm:$0xff]  ;;  %v1319_v51 = vand.u32 4294901760, %v1318_v42 }
  0xcd   : > { %1278 = vmatprep.subr.mxu1 %v1277_v39  ;;  %v1295_v20 = vand.u32 4294901760, %v1294_v56  ;;  %1172 = vmatpush1.msra.mxu0 %v4853_v57  ;;  %v4912_v39 = vsub.f32 %v1138_v47, %v4894_v41  ;;  %v6086_v56 = vand.u32 4294901760, %v4902_v55  ;;  %v4920_v60 = vsub.f32 %v1137_v4, %v4904_v58  ;;  %v1133_v47 = vld [vmem:[#allocation12 + $0x60] sm:$0xff] }
  0xce   : > { %1284 = vmatpush1.msra.mxu1 %v1283_v52  ;;  %v6092_v53 = vand.u32 4294901760, %v4859_v1  ;;  %1174 = vmatprep.subr.mxu0 %v4861_v8  ;;  %v1330_v52 = vsub.f32 %v4882_v17, %v6088_v50  ;;  %v1325_v62 = vand.u32 4294901760, %v1324_v7  ;;  %v1336_v15 = vsub.f32 %v4892_v35, %v6085_v14 }
  0xcf   : > { %1290 = vmatprep.subr.mxu1 %v1289_v61  ;;  %1176 = vmatpush1.msra.mxu0 %v4870_v38  ;;  %v1134_v61 = vld [vmem:[#allocation12 + $0x68] sm:$0xff]  ;;  %v1342_v4 = vsub.f32 %v4902_v55, %v6086_v56  ;;  %v4939_v7 = vsub.f32 %v1136_v2, %v4927_v29 }
  0xd0   : > { %1296 = vmatpush1.msra.mxu1 %v1295_v20  ;;  %v1312_v30 = vsub.f32 %v4859_v1, %v6092_v53  ;;  %1178 = vmatprep.subr.mxu0 %v4877_v27  ;;  %v6087_v20 = vand.u32 4294901760, %v4912_v39  ;;  %v1337_v42 = vand.u32 4294901760, %v1336_v15  ;;  %v4941_v14 = vand.u32 4294901760, %v1134_v61  ;;  %v1129_v53 = vld [vmem:[#allocation12 + $0x40] sm:$0xff] }
  0xd1   : > { %1302 = vmatprep.subr.mxu1 %v1301_v48  ;;  %1180 = vmatpush1.msra.mxu0 %v4884_v23  ;;  %v1331_v48 = vand.u32 4294901760, %v1330_v52  ;;  %v1343_v52 = vand.u32 4294901760, %v1342_v4  ;;  %v4950_v15 = vand.u32 4294901760, %v1133_v47  ;;  %v6094_v50 = vand.u32 4294901760, %v4939_v7 }
  0xd2   : > { %1308 = vmatpush1.msra.mxu1 %v1307_v6  ;;  %v1313_v3 = vand.u32 4294901760, %v1312_v30  ;;  %1182 = vmatprep.subr.mxu0 %v4894_v41  ;;  %v6090_v6 = vand.u32 4294901760, %v4920_v60  ;;  %v4933_v30 = vand.u32 4294901760, %v1135_v22  ;;  %v4955_v34 = vsub.f32 %v1134_v61, %v4941_v14 }
  0xd3   : > { %1184 = vmatpush1.msra.mxu0 %v4904_v58  ;;  %v1360_v61 = vsub.f32 %v4939_v7, %v6094_v50  ;;  %v4987_v9 = vand.u32 4294901760, %v1129_v53 }
  0xd4   : > { %1314 = vmatprep.subr.mxu1 %v1313_v3  ;;  %v1348_v3 = vsub.f32 %v4912_v39, %v6087_v20  ;;  %1186 = vmatprep.subr.mxu0 %v4927_v29  ;;  %v1354_v56 = vsub.f32 %v4920_v60, %v6090_v6  ;;  %v1131_v20 = vld [vmem:[#allocation12 + $0x50] sm:$0xff]  ;;  %6250 = vst [vmem:[#allocation26_spill] sm:$0xff] %v4955_v34 }
  0xd5   : > { %1320 = vmatpush1.msra.mxu1 %v1319_v51  ;;  %v1132_v51 = vld [vmem:[#allocation12 + $0x58] sm:$0xff]  ;;  %1188 = vmatpush1.msra.mxu0 %v4933_v30  ;;  %v4960_v6 = vsub.f32 %v1133_v47, %v4950_v15  ;;  %v1361_v50 = vand.u32 4294901760, %v1360_v61  ;;  %v5000_v31 = vsub.f32 %v1129_v53, %v4987_v9  ;;  %v1123_v53 = vld [vmem:[#allocation12 + $0x10] sm:$0xff] }
  0xd6   : > { %1326 = vmatprep.subr.mxu1 %v1325_v62  ;;  %v4948_v62 = vsub.f32 %v1135_v22, %v4933_v30  ;;  %v1349_v2 = vand.u32 4294901760, %v1348_v3  ;;  %1190 = vmatprep.subr.mxu0 %v4941_v14  ;;  %v1355_v4 = vand.u32 4294901760, %v1354_v56  ;;  %v4962_v11 = vand.u32 4294901760, %v1132_v51 }
  0xd7   : > { %1332 = vmatpush1.msra.mxu1 %v1331_v48  ;;  %v1130_v48 = vld [vmem:[#allocation12 + $0x48] sm:$0xff]  ;;  %6251 = vst [vmem:[#allocation27_spill] sm:$0xff] %v4960_v6  ;;  %1192 = vmatpush1.msra.mxu0 %v4950_v15  ;;  %v4969_v3 = vand.u32 4294901760, %v1131_v20  ;;  %v6104_v47 = vand.u32 4294901760, %v4960_v6  ;;  %6255 = vst [vmem:[#allocation31_spill] sm:$0xff] %v5000_v31 }
  0xd8   : > { %6249 = vst [vmem:[#allocation25_spill] sm:$0xff] %v4948_v62  ;;  %1338 = vmatprep.subr.mxu1 %v1337_v42  ;;  %v6097_v22 = vand.u32 4294901760, %v4948_v62  ;;  %v6101_v42 = vand.u32 4294901760, %v4955_v34  ;;  %v4978_v28 = vand.u32 4294901760, %v1130_v48  ;;  %1194 = vmatprep.subr.mxu0 %v4962_v11 }
  0xd9   : > { %1344 = vmatpush1.msra.mxu1 %v1343_v52  ;;  %v4976_v52 = vsub.f32 %v1132_v51, %v4962_v11  ;;  %1196 = vmatpush1.msra.mxu0 %v4969_v3  ;;  %v1378_v59 = vsub.f32 %v4960_v6, %v6104_v47 }
  0xda   : > { %1350 = vmatprep.subr.mxu1 %v1349_v2  ;;  %v1366_v56 = vsub.f32 %v4948_v62, %v6097_v22  ;;  %v1128_v2 = vld [vmem:[#allocation12 + $0x38] sm:$0xff]  ;;  %v1372_v43 = vsub.f32 %v4955_v34, %v6101_v42  ;;  %v1127_v22 = vld [vmem:[#allocation12 + $0x30] sm:$0xff]  ;;  %v4995_v61 = vsub.f32 %v1130_v48, %v4978_v28  ;;  %1198 = vmatprep.subr.mxu0 %v4978_v28  ;;  %v1122_v62 = vld [vmem:[#allocation12 + $0x8] sm:$0xff] }
  0xdb   : > { %1356 = vmatpush1.msra.mxu1 %v1355_v4  ;;  %6252 = vst [vmem:[#allocation28_spill] sm:$0xff] %v4976_v52  ;;  %v4985_v4 = vsub.f32 %v1131_v20, %v4969_v3  ;;  %v6109_v45 = vand.u32 4294901760, %v4976_v52  ;;  %1200 = vmatpush1.msra.mxu0 %v4987_v9  ;;  %v1379_v47 = vand.u32 4294901760, %v1378_v59  ;;  %v1124_v59 = vld [vmem:[#allocation12 + $0x18] sm:$0xff] }
  0xdc   : > { %v1367_v51 = vand.u32 4294901760, %v1366_v56  ;;  %6254 = vst [vmem:[#allocation30_spill] sm:$0xff] %v4995_v61  ;;  %1362 = vmatprep.subr.mxu1 %v1361_v50  ;;  %v1373_v20 = vand.u32 4294901760, %v1372_v43  ;;  %v5002_v56 = vand.u32 4294901760, %v1128_v2  ;;  %v6119_v0 = vand.u32 4294901760, %v4995_v61 }
  0xdd   : > { %6253 = vst [vmem:[#allocation29_spill] sm:$0xff] %v4985_v4  ;;  %v6112_v42 = vand.u32 4294901760, %v4985_v4  ;;  %v1384_v48 = vsub.f32 %v4976_v52, %v6109_v45  ;;  %v5009_v50 = vand.u32 4294901760, %v1127_v22 }
  0xde   : > { %1368 = vmatpush1.msra.mxu1 %v1367_v51  ;;  %v5016_v6 = vsub.f32 %v1128_v2, %v5002_v56  ;;  %v5018_v51 = vand.u32 4294901760, %v1126_v36  ;;  %1202 = vmatprep.subr.mxu0 %v5002_v56 }
  0xdf   : > { %6256 = vst [vmem:[#allocation32_spill] sm:$0xff] %v5009_v50  ;;  %1374 = vmatprep.subr.mxu1 %v1373_v20  ;;  %v1390_v43 = vsub.f32 %v4985_v4, %v6112_v42  ;;  %v1385_v45 = vand.u32 4294901760, %v1384_v48  ;;  %v1396_v20 = vsub.f32 %v4995_v61, %v6119_v0  ;;  %v5025_v52 = vsub.f32 %v1127_v22, %v5009_v50 }
  0xe0   : > { %6257 = vst [vmem:[#allocation33_spill] sm:$0xff] %v5016_v6  ;;  %6258 = vst [vmem:[#allocation34_spill] sm:$0xff] %v5018_v51  ;;  %1380 = vmatpush1.msra.mxu1 %v1379_v47  ;;  %v5027_v42 = vand.u32 4294901760, %v1125_v24  ;;  %1204 = vmatpush1.msra.mxu0 %v5009_v50  ;;  %v6261_v4 = vand.u32 4294901760, %v5000_v31  ;;  %v6128_v47 = vand.u32 4294901760, %v5016_v6  ;;  %v5035_v48 = vsub.f32 %v1126_v36, %v5018_v51  ;;  %v1121_v50 = vld [vmem:[#allocation12] sm:$0xff] }
  0xe1   : > { %6259 = vst [vmem:[#allocation35_spill] sm:$0xff] %v5025_v52  ;;  %v1391_v2 = vand.u32 4294901760, %v1390_v43  ;;  %1206 = vmatprep.subr.mxu0 %v5018_v51  ;;  %1386 = vmatprep.subr.mxu1 %v1385_v45  ;;  %v1397_v22 = vand.u32 4294901760, %v1396_v20  ;;  %v6131_v0 = vand.u32 4294901760, %v5025_v52  ;;  %v5042_v43 = vand.u32 4294901760, %v1124_v59 }
  0xe2   : > { %6260 = vst [vmem:[#allocation36_spill] sm:$0xff] %v5027_v42  ;;  %v1402_v34 = vsub.f32 %v5000_v31, %v6261_v4  ;;  %6262 = vst [vmem:[#allocation37_spill] sm:$0xff] %v5035_v48  ;;  %v5040_v61 = vsub.f32 %v1125_v24, %v5027_v42  ;;  %1208 = vmatpush1.msra.mxu0 %v5027_v42  ;;  %v1408_v36 = vsub.f32 %v5016_v6, %v6128_v47 }
  0xe3   : > { %6264 = vst [vmem:[#allocation39_spill] sm:$0xff] %v5042_v43  ;;  %1392 = vmatpush1.msra.mxu1 %v1391_v2  ;;  %v6134_v31 = vand.u32 4294901760, %v5035_v48  ;;  %v5049_v45 = vand.u32 4294901760, %v1123_v53  ;;  %v1414_v24 = vsub.f32 %v5025_v52, %v6131_v0  ;;  %v5056_v51 = vsub.f32 %v1124_v59, %v5042_v43  ;;  %1210 = vmatprep.subr.mxu0 %v5042_v43 }
  0xe4   : > { %6263 = vst [vmem:[#allocation38_spill] sm:$0xff] %v5040_v61  ;;  %v1403_v4 = vand.u32 4294901760, %v1402_v34  ;;  %1398 = vmatprep.subr.mxu1 %v1397_v22  ;;  %v6135_v20 = vand.u32 4294901760, %v5040_v61  ;;  %v5058_v2 = vand.u32 4294901760, %v1122_v62  ;;  %v1409_v34 = vand.u32 4294901760, %v1408_v36 }
  0xe5   : > { %6265 = vst [vmem:[#allocation40_spill] sm:$0xff] %v5049_v45  ;;  %6266 = vst [vmem:[#allocation41_spill] sm:$0xff] %v5056_v51  ;;  %v1420_v47 = vsub.f32 %v5035_v48, %v6134_v31  ;;  %v5065_v22 = vsub.f32 %v1123_v53, %v5049_v45  ;;  %v5067_v6 = vand.u32 4294901760, %v1121_v50  ;;  %1212 = vmatpush1.msra.mxu0 %v5049_v45  ;;  %v1415_v0 = vand.u32 4294901760, %v1414_v24 }
  0xe6   : > { %6267 = vst [vmem:[#allocation42_spill] sm:$0xff] %v5058_v2  ;;  %1404 = vmatpush1.msra.mxu1 %v1403_v4  ;;  %v1426_v59 = vsub.f32 %v5040_v61, %v6135_v20  ;;  %v6136_v52 = vand.u32 4294901760, %v5056_v51  ;;  %v5075_v4 = vsub.f32 %v1122_v62, %v5058_v2  ;;  %1214 = vmatprep.subr.mxu0 %v5058_v2 }
  0xe7   : > { %6268 = vst [vmem:[#allocation43_spill] sm:$0xff] %v5065_v22  ;;  %6269 = vst [vmem:[#allocation44_spill] sm:$0xff] %v5067_v6  ;;  %1410 = vmatprep.subr.mxu1 %v1409_v34  ;;  %v1421_v36 = vand.u32 4294901760, %v1420_v47  ;;  %v6138_v53 = vand.u32 4294901760, %v5065_v22  ;;  %v5080_v31 = vsub.f32 %v1121_v50, %v5067_v6  ;;  %1216 = vmatpush1.msra.mxu0 %v5067_v6 }
  0xe8   : > { %6270 = vst [vmem:[#allocation45_spill] sm:$0xff] %v5075_v4  ;;  %1416 = vmatpush1.msra.mxu1 %v1415_v0  ;;  %v1427_v24 = vand.u32 4294901760, %v1426_v59  ;;  %v1432_v20 = vsub.f32 %v5056_v51, %v6136_v52  ;;  %v6145_v62 = vand.u32 4294901760, %v5075_v4  ;;  %1495 = vmatprep.subr.mxu0 %v4782_v12  ;;  %v6160_v51 = vlaneseq }
  0xe9   : > { %6271 = vst [vmem:[#allocation46_spill] sm:$0xff] %v5080_v31  ;;  %1422 = vmatprep.subr.mxu1 %v1421_v36  ;;  %v1438_v47 = vsub.f32 %v5065_v22, %v6138_v53  ;;  %v6150_v50 = vand.u32 4294901760, %v5080_v31 }
  0xea   : > { %1428 = vmatpush1.msra.mxu1 %v1427_v24  ;;  %v1433_v34 = vand.u32 4294901760, %v1432_v20  ;;  %v1444_v0 = vsub.f32 %v5075_v4, %v6145_v62  ;;  %v5100_v48 = vshrl.u32 %v6160_v51, 7 }
  0xeb   : > { %v1439_v59 = vand.u32 4294901760, %v1438_v47  ;;  %v1450_v52 = vsub.f32 %v5080_v31, %v6150_v50  ;;  %v1067_v31 = vld [vmem:[#allocation11] sm:$0xf] }
  0xec   : > { %1434 = vmatprep.subr.mxu1 %v1433_v34  ;;  %v1445_v12 = vand.u32 4294901760, %v1444_v0  ;;  %6272 = vst [vmem:[#allocation47_spill] sm:$0xff] %v5100_v48  ;;  %v6169_v45 = vsub.s32 1, %v5100_v48  ;;  %vm1074_vm1 = vcmp.ge.s32.totalorder %v5100_v48, 3  ;;  %vm1085_vm2 = vcmp.ge.s32.totalorder %v5100_v48, 2 }
  0xed   : > { %1440 = vmatpush1.msra.mxu1 %v1439_v59  ;;  %v1451_v36 = vand.u32 4294901760, %v1450_v52  ;;  %vm1096_vm3 = vcmp.ge.s32.totalorder %v5100_v48, 1 }
  0xee   : > { %1446 = vmatprep.subr.mxu1 %v1445_v12 }
  0xef   : > { %1452 = vmatpush1.msra.mxu1 %v1451_v36  ;;  %v6161_v36 = vsub.s32 3, %v5100_v48 }
  0xf0   : > { %1631 = vmatprep.subr.mxu1 %v4777_v5  ;;  %v5104_v5 = vsub.s32 0, %v5100_v48 }
  0xf2   : > { %6273 = vst [vmem:[#allocation48_spill] sm:$0xff] %v5104_v5 }
 0x160   : > { %v500_v53 = vpop.f32.mrf.mxu0 }
 0x162   : > { %v502_v24 = vpop.f32.mrf.mxu0 }
 0x165   : > { %v652_v20 = vpop.f32.mrf.mxu1 }
 0x166   : > { %v653_v62 = vadd.f32 %v652_v20, %v500_v53 }
 0x167   : > { %v654_v61 = vpop.f32.mrf.mxu1 }
 0x168   : > { %v655_v59 = vadd.f32 %v654_v61, %v502_v24  ;;  %v6168_v61 = vsub.s32 2, %v5100_v48  ;;  %v6297_v48 = vld [vmem:[#allocation41_spill] sm:$0xff] }
 0x170   : > { %v757_v22 = vpop.f32.mrf.mxu0 }
 0x171   : > { %v758_v34 = vadd.f32 %v757_v22, %v653_v62  ;;  %v1071_v22 = vrot.slane %v1067_v31, %v6161_v36  ;;  %v1081_v62 = vrot.slane %v1067_v31, %v5104_v5 }
 0x172   : > { %v759_v47 = vpop.f32.mrf.mxu0 }
 0x173   : > { %v760_v50 = vadd.f32 %v759_v47, %v655_v59 }
 0x178   : > { %v847_v4 = vpop.f32.mrf.mxu1 }
 0x179   : > { %v848_v52 = vadd.f32 %v847_v4, %v758_v34 }
 0x17a   : > { %v849_v12 = vpop.f32.mrf.mxu1 }
 0x17b   : > { %v850_v53 = vadd.f32 %v849_v12, %v760_v50 }
 0x181   : > { %v967_v0 = vpop.f32.mrf.mxu0 }
 0x182   : > { %v968_v6 = vadd.f32 %v967_v0, %v848_v52  ;;  %v1092_v0 = vrot.slane %v1067_v31, %v6169_v45  ;;  %v6294_v45 = vld [vmem:[#allocation35_spill] sm:$0xff] }
 0x183   : > { %v969_v2 = vpop.f32.mrf.mxu0 }
 0x184   : > { %v970_v4 = vadd.f32 %v969_v2, %v850_v53  ;;  %v1103_v53 = vrot.slane %v1067_v31, %v6168_v61  ;;  %v6293_v61 = vld [vmem:[#allocation23_spill] sm:$0xff] }
 0x189   : > { %v1055_v20 = vpop.f32.mrf.mxu1 }
 0x18a   : > { %v1056_v51 = vadd.f32 %v1055_v20, %v968_v6 }
 0x18b   : > { %v1057_v24 = vpop.f32.mrf.mxu1 }
 0x18c   : > { %v1073_v47 = vrot.slane %v1056_v51, 5  ;;  %v1084_v34 = vrot.slane %v1056_v51, 6  ;;  %v1095_v50 = vrot.slane %v1056_v51, 7  ;;  %v5116_v6 = vadd.f32 %v1057_v24, %v970_v4  ;;  %v3546_v4 = vld [vmem:[%s6075_s3] ss:$0 sm:$0xff] }
 0x18d   : > { %v1072_v2 = vmul.f32 %v1071_v22, %v1056_v51 }
 0x18e   : > { %6274 = vst [vmem:[#allocation49_spill] sm:$0xff] %v5116_v6  ;;  %v1077_v59 = vsel %vm1074_vm1, %v1073_v47, 0.0  ;;  %v1088_v52 = vsel %vm1085_vm2, %v1084_v34, 0.0  ;;  %1061 = vrot.lane.b32.xlu0 %v5116_v6, %s4262_s12  ;;  %v1099_v20 = vsel %vm1096_vm3, %v1095_v50, 0.0  ;;  %v6295_v6 = vld [vmem:[#allocation37_spill] sm:$0xff] }
 0x18f   : > { %v1082_v12 = vmul.f32 %v1081_v62, %v1077_v59  ;;  %v1093_v5 = vmul.f32 %v1092_v0, %v1088_v52  ;;  %v1104_v42 = vmul.f32 %v1103_v53, %v1099_v20  ;;  %v6278_v59 = vld [vmem:[#allocation25_spill] sm:$0xff]  ;;  %v6279_v52 = vld [vmem:[#allocation32_spill] sm:$0xff]  ;;  %v6282_v53 = vld [vmem:[#allocation27_spill] sm:$0xff] }
 0x190   : > { %v6283_v20 = vld [vmem:[#allocation36_spill] sm:$0xff] }
 0x191   : > { %v1083_v36 = vadd.f32 %v1082_v12, %v1072_v2  ;;  %v6280_v2 = vld [vmem:[#allocation26_spill] sm:$0xff] }
 0x192   : > { %v6281_v12 = vld [vmem:[#allocation34_spill] sm:$0xff] }
 0x193   : > { %v1094_v43 = vadd.f32 %v1093_v5, %v1083_v36 }
 0x195   : > { %v1105_v24 = vadd.f32 %v1104_v42, %v1094_v43  ;;  %v6277_v42 = vmov 0.0  }
 0x197   : > { %v1113_v47 = vadd.f32 %v3546_v4, %v1105_v24  ;;  %v6284_v4 = vld [vmem:[#allocation28_spill] sm:$0xff]  ;;  %v6285_v24 = vld [vmem:[#allocation39_spill] sm:$0xff] }
 0x199   : > { %v3547_v34 = vmul.f32 -1.442695, %v1113_v47 }
 0x19b   : > { %3971 = vpow2.f32 %v3547_v34  ;;  %v6287_v34 = vld [vmem:[#allocation40_spill] sm:$0xff] }
 0x1a8   : > { %v3972_v51 = vpop.eup %3971 }
 0x1a9   : > { %v1117_v22 = vadd.f32 1.0, %v3972_v51  ;;  %v6288_v51 = vld [vmem:[#allocation30_spill] sm:$0xff] }
 0x1ab   : > { %3973 = vrcp.f32 %v1117_v22  ;;  %v6289_v22 = vld [vmem:[#allocation42_spill] sm:$0xff] }
 0x1b8   : > { %v3974_v31 = vpop.eup %3973 }
 0x1b9   : > { %v5124_v62 = vmul.f32 %v3974_v31, %v1113_v47  ;;  %v6286_v47 = vld [vmem:[#allocation29_spill] sm:$0xff]  ;;  %v6290_v31 = vld [vmem:[#allocation31_spill] sm:$0xff] }
 0x1bb   : > { %6275 = vst [vmem:[#allocation50_spill] sm:$0xff] %v5124_v62  ;;  %v5127_v50 = vand.u32 4294901760, %v5124_v62 }
 0x1bd   : > { %6276 = vst [vmem:[#allocation51_spill] sm:$0xff] %v5127_v50  ;;  %1487 = vmatmul.mubr.f32.vlgmr.msra.gmra.mxu1 %v5127_v50  ;;  %v5132_v5 = vsub.f32 %v5124_v62, %v5127_v50  ;;  %v6296_v62 = vld [vmem:[#allocation38_spill] sm:$0xff]  ;;  %v6298_v50 = vld [vmem:[#allocation43_spill] sm:$0xff] }
 0x1be   : > { %1633 = vmatpush1.msra.mxu1 %v4779_v10  ;;  %1726 = vmatprep.mubr.f32.mxu1 %v6277_v42 }
 0x1bf   : > { %1635 = vmatprep.subr.mxu1 %v4784_v16  ;;  %v1252_v43 = vand.u32 4294901760, %v5132_v5 }
 0x1c0   : > { %1637 = vmatpush1.msra.mxu1 %v4790_v19 }
 0x1c1   : > { %1639 = vmatprep.subr.mxu1 %v4797_v26  ;;  %v1253_v36 = vsub.f32 %v5132_v5, %v1252_v43 }
 0x1c2   : > { %1641 = vmatpush1.msra.mxu1 %v4804_v33 }
 0x1c3   : > { %1643 = vmatprep.subr.mxu1 %v4814_v40  ;;  %v1254_v0 = vand.u32 4294901760, %v1253_v36  ;;  %v6291_v36 = vld [vmem:[#allocation44_spill] sm:$0xff] }
 0x1c4   : > { %1645 = vmatpush1.msra.mxu1 %v4824_v49 }
 0x1c5   : > { %1647 = vmatprep.subr.mxu1 %v4847_v44  ;;  %1255 = vmatmul.mubr.f32.vlgmr.msra.gmra.mxu0 %v1254_v0  ;;  %v6292_v0 = vld [vmem:[#allocation33_spill] sm:$0xff] }
 0x1c6   : > { %1498 = vmatpush1.msra.mxu0 %v4788_v18  ;;  %1649 = vmatpush1.msra.mxu1 %v4853_v57 }
 0x1c7   : > { %1501 = vmatprep.subr.mxu0 %v4795_v25  ;;  %1651 = vmatprep.subr.mxu1 %v4861_v8 }
 0x1c8   : > { %1504 = vmatpush1.msra.mxu0 %v4802_v32  ;;  %1653 = vmatpush1.msra.mxu1 %v4870_v38 }
 0x1c9   : > { %1507 = vmatprep.subr.mxu0 %v4812_v37  ;;  %1655 = vmatprep.subr.mxu1 %v4877_v27 }
 0x1ca   : > { %1510 = vmatpush1.msra.mxu0 %v4822_v46  ;;  %1657 = vmatpush1.msra.mxu1 %v4884_v23 }
 0x1cb   : > { %1513 = vmatprep.subr.mxu0 %v4832_v63  ;;  %1659 = vmatprep.subr.mxu1 %v4894_v41 }
 0x1cc   : > { %1516 = vmatpush1.msra.mxu0 %v4840_v13  ;;  %1661 = vmatpush1.msra.mxu1 %v4904_v58 }
 0x1cd   : > { %1519 = vmatprep.subr.mxu0 %v4859_v1  ;;  %1663 = vmatprep.subr.mxu1 %v4927_v29 }
 0x1ce   : > { %1522 = vmatpush1.msra.mxu0 %v4868_v21  ;;  %1665 = vmatpush1.msra.mxu1 %v4933_v30 }
 0x1cf   : > { %1525 = vmatprep.subr.mxu0 %v4875_v54  ;;  %1667 = vmatprep.subr.mxu1 %v4941_v14 }
 0x1d0   : > { %1528 = vmatpush1.msra.mxu0 %v4882_v17  ;;  %1669 = vmatpush1.msra.mxu1 %v4950_v15 }
 0x1d1   : > { %1531 = vmatprep.subr.mxu0 %v4892_v35  ;;  %1671 = vmatprep.subr.mxu1 %v4962_v11 }
 0x1d2   : > { %1534 = vmatpush1.msra.mxu0 %v4902_v55  ;;  %1673 = vmatpush1.msra.mxu1 %v4969_v3 }
 0x1d3   : > { %1537 = vmatprep.subr.mxu0 %v4912_v39  ;;  %1675 = vmatprep.subr.mxu1 %v4978_v28 }
 0x1d4   : > { %1540 = vmatpush1.msra.mxu0 %v4920_v60  ;;  %1677 = vmatpush1.msra.mxu1 %v4987_v9 }
 0x1d5   : > { %1543 = vmatprep.subr.mxu0 %v4939_v7  ;;  %1679 = vmatprep.subr.mxu1 %v5002_v56 }
 0x1d6   : > { %1546 = vmatpush1.msra.mxu0 %v6278_v59  ;;  %1681 = vmatpush1.msra.mxu1 %v6279_v52 }
 0x1d7   : > { %1549 = vmatprep.subr.mxu0 %v6280_v2  ;;  %1683 = vmatprep.subr.mxu1 %v6281_v12 }
 0x1d8   : > { %1552 = vmatpush1.msra.mxu0 %v6282_v53  ;;  %1685 = vmatpush1.msra.mxu1 %v6283_v20 }
 0x1d9   : > { %1555 = vmatprep.subr.mxu0 %v6284_v4  ;;  %1687 = vmatprep.subr.mxu1 %v6285_v24 }
 0x1da   : > { %1558 = vmatpush1.msra.mxu0 %v6286_v47  ;;  %1689 = vmatpush1.msra.mxu1 %v6287_v34 }
 0x1db   : > { %1561 = vmatprep.subr.mxu0 %v6288_v51  ;;  %1691 = vmatprep.subr.mxu1 %v6289_v22 }
 0x1dc   : > { %1564 = vmatpush1.msra.mxu0 %v6290_v31  ;;  %1693 = vmatpush1.msra.mxu1 %v6291_v36 }
 0x1dd   : > { %1567 = vmatprep.subr.mxu0 %v6292_v0  ;;  %1730 = vmatmul.mubr.f32.vlgmr.msra.gmra.mxu1 %v1252_v43 }
 0x1de   : > { %1905 = vmatprep.subr.mxu1 %v6293_v61  ;;  %1570 = vmatpush1.msra.mxu0 %v6294_v45  ;;  %v6299_v61 = vld [vmem:[#allocation45_spill] sm:$0xff] }
 0x1df   : > { %1907 = vmatpush1.msra.mxu1 %v4779_v10  ;;  %1573 = vmatprep.subr.mxu0 %v6295_v6  ;;  %v6300_v10 = vld [vmem:[#allocation46_spill] sm:$0xff] }
 0x1e0   : > { %1909 = vmatprep.subr.mxu1 %v4784_v16  ;;  %1576 = vmatpush1.msra.mxu0 %v6296_v62  ;;  %v6301_v16 = vld [vmem:[#allocation24_spill] sm:$0xff] }
 0x1e1   : > { %1911 = vmatpush1.msra.mxu1 %v4790_v19  ;;  %1579 = vmatprep.subr.mxu0 %v6297_v48  ;;  %v6302_v19 = vand.u32 4294901760, %v6301_v16 }
 0x1e2   : > { %1913 = vmatprep.subr.mxu1 %v4797_v26  ;;  %1582 = vmatpush1.msra.mxu0 %v6298_v50  ;;  %v6303_v26 = vand.u32 4294901760, %v4788_v18  ;;  %v6307_v18 = vand.u32 4294901760, %v4822_v46  ;;  %v6311_v46 = vand.u32 4294901760, %v4868_v21  ;;  %v6318_v21 = vand.u32 4294901760, %v4939_v7 }
 0x1e3   : > { %1915 = vmatpush1.msra.mxu1 %v4804_v33  ;;  %1585 = vmatprep.subr.mxu0 %v6299_v61  ;;  %v6304_v33 = vand.u32 4294901760, %v4795_v25  ;;  %v6308_v25 = vand.u32 4294901760, %v4832_v63  ;;  %v6312_v63 = vand.u32 4294901760, %v4875_v54  ;;  %v6320_v54 = vand.u32 4294901760, %v6280_v2 }
 0x1e4   : > { %1917 = vmatprep.subr.mxu1 %v4814_v40  ;;  %1588 = vmatpush1.msra.mxu0 %v6300_v10  ;;  %v6305_v40 = vand.u32 4294901760, %v4802_v32  ;;  %v6309_v32 = vand.u32 4294901760, %v4840_v13  ;;  %v6313_v13 = vand.u32 4294901760, %v4882_v17  ;;  %v6325_v17 = vand.u32 4294901760, %v6290_v31 }
 0x1e5   : > { %1621 = vmatprep.mubr.f32.mxu0 %v6277_v42  ;;  %1919 = vmatpush1.msra.mxu1 %v4824_v49  ;;  %v6306_v49 = vand.u32 4294901760, %v4812_v37  ;;  %v6310_v37 = vand.u32 4294901760, %v4859_v1  ;;  %v6316_v1 = vand.u32 4294901760, %v4912_v39  ;;  %v6332_v39 = vand.u32 4294901760, %v6298_v50 }
 0x1e6   : > { %1624 = vmatmul.mubr.f32.vlgmr.msra.gmra.mxu0 %v5132_v5  ;;  %1739 = vmatprep.subr.mxu0 %v6302_v19 }
 0x1e7   : > { %1921 = vmatprep.subr.mxu1 %v4847_v44  ;;  %1743 = vmatpush1.msra.mxu0 %v6303_v26  ;;  %v6314_v44 = vand.u32 4294901760, %v4892_v35  ;;  %v6327_v35 = vld [vmem:[#allocation51_spill] sm:$0xff] }
 0x1e8   : > { %1923 = vmatpush1.msra.mxu1 %v4853_v57  ;;  %1747 = vmatprep.subr.mxu0 %v6304_v33  ;;  %v6315_v57 = vand.u32 4294901760, %v4902_v55  ;;  %v6329_v55 = vand.u32 4294901760, %v6295_v6 }
 0x1e9   : > { %1925 = vmatprep.subr.mxu1 %v4861_v8  ;;  %1751 = vmatpush1.msra.mxu0 %v6305_v40  ;;  %v6317_v8 = vand.u32 4294901760, %v4920_v60  ;;  %v6333_v60 = vand.u32 4294901760, %v6299_v61 }
 0x1ea   : > { %1927 = vmatpush1.msra.mxu1 %v4870_v38  ;;  %1755 = vmatprep.subr.mxu0 %v6306_v49  ;;  %v6319_v38 = vand.u32 4294901760, %v6278_v59 }
 0x1eb   : > { %1929 = vmatprep.subr.mxu1 %v4877_v27  ;;  %1759 = vmatpush1.msra.mxu0 %v6307_v18  ;;  %v6323_v27 = vand.u32 4294901760, %v6286_v47 }
 0x1ec   : > { %1931 = vmatpush1.msra.mxu1 %v4884_v23  ;;  %1763 = vmatprep.subr.mxu0 %v6308_v25  ;;  %v6326_v23 = vand.u32 4294901760, %v6292_v0 }
 0x1ed   : > { %1933 = vmatprep.subr.mxu1 %v4894_v41  ;;  %1767 = vmatpush1.msra.mxu0 %v6309_v32  ;;  %v6328_v41 = vand.u32 4294901760, %v6294_v45 }
 0x1ee   : > { %1935 = vmatpush1.msra.mxu1 %v4904_v58  ;;  %1771 = vmatprep.subr.mxu0 %v6310_v37  ;;  %v6330_v58 = vand.u32 4294901760, %v6296_v62 }
 0x1ef   : > { %1937 = vmatprep.subr.mxu1 %v4927_v29  ;;  %1775 = vmatpush1.msra.mxu0 %v6311_v46  ;;  %v6334_v29 = vand.u32 4294901760, %v6300_v10 }
 0x1f0   : > { %1939 = vmatpush1.msra.mxu1 %v4933_v30  ;;  %1779 = vmatprep.subr.mxu0 %v6312_v63 }
 0x1f1   : > { %1941 = vmatprep.subr.mxu1 %v4941_v14  ;;  %1783 = vmatpush1.msra.mxu0 %v6313_v13  ;;  %v6331_v14 = vand.u32 4294901760, %v6297_v48 }
 0x1f2   : > { %1943 = vmatpush1.msra.mxu1 %v4950_v15  ;;  %1787 = vmatprep.subr.mxu0 %v6314_v44 }
 0x1f3   : > { %1945 = vmatprep.subr.mxu1 %v4962_v11  ;;  %1791 = vmatpush1.msra.mxu0 %v6315_v57  ;;  %v6324_v11 = vand.u32 4294901760, %v6288_v51 }
 0x1f4   : > { %1947 = vmatpush1.msra.mxu1 %v4969_v3  ;;  %1795 = vmatprep.subr.mxu0 %v6316_v1 }
 0x1f5   : > { %1949 = vmatprep.subr.mxu1 %v4978_v28  ;;  %1799 = vmatpush1.msra.mxu0 %v6317_v8  ;;  %v6321_v28 = vand.u32 4294901760, %v6282_v53  ;;  %v4263_v8 = vmov 1966171168  }
 0x1f6   : > { %1951 = vmatpush1.msra.mxu1 %v4987_v9  ;;  %1803 = vmatprep.subr.mxu0 %v6318_v21  ;;  %v6322_v9 = vand.u32 4294901760, %v6284_v4  ;;  %v2032_v21 = vunpack.c.l.s4 %v4263_v8 }
 0x1f7   : > { %1953 = vmatprep.subr.mxu1 %v5002_v56  ;;  %1807 = vmatpush1.msra.mxu0 %v6319_v38 }
 0x1f8   : > { %1955 = vmatpush1.msra.mxu1 %v6279_v52  ;;  %1811 = vmatprep.subr.mxu0 %v6320_v54 }
 0x1f9   : > { %1957 = vmatprep.subr.mxu1 %v6281_v12  ;;  %1815 = vmatpush1.msra.mxu0 %v6321_v28  ;;  %v2033_v28 = vunpack.c.0.s8 %v2032_v21 }
 0x1fa   : > { %1959 = vmatpush1.msra.mxu1 %v6283_v20  ;;  %1819 = vmatprep.subr.mxu0 %v6322_v9 }
 0x1fb   : > { %1961 = vmatprep.subr.mxu1 %v6285_v24  ;;  %1823 = vmatpush1.msra.mxu0 %v6323_v27 }
 0x1fc   : > { %1963 = vmatpush1.msra.mxu1 %v6287_v34  ;;  %1827 = vmatprep.subr.mxu0 %v6324_v11 }
 0x1fd   : > { %1965 = vmatprep.subr.mxu1 %v6289_v22  ;;  %1831 = vmatpush1.msra.mxu0 %v6325_v17  ;;  %v6335_v22 = vld [vmem:[#allocation48_spill] sm:$0xff] }
 0x1fe   : > { %1967 = vmatpush1.msra.mxu1 %v6291_v36  ;;  %2000 = vmatprep.mubr.f32.mxu1 %v6277_v42  ;;  %v6336_v36 = vld [vmem:[#allocation47_spill] sm:$0xff] }
 0x1ff   : > { %1835 = vmatprep.subr.mxu0 %v6326_v23  ;;  %2002 = vmatmul.mubr.f32.vlgmr.msra.gmra.mxu1 %v6327_v35  ;;  %v6337_v0 = vsub.s32 1, %v6336_v36  ;;  %v6338_v10 = vsub.s32 2, %v6336_v36  ;;  %v6339_v19 = vsub.s32 3, %v6336_v36  ;;  %v2213_v40 = vsub.s32 4, %v6336_v36 }
 0x200   : > { %1839 = vmatpush1.msra.mxu0 %v6328_v41  ;;  %1896 = vmatprep.mubr.f32.mxu0 %v6277_v42  ;;  %v2224_v32 = vsub.s32 5, %v6336_v36  ;;  %v2235_v46 = vsub.s32 6, %v6336_v36  ;;  %v2246_v57 = vsub.s32 7, %v6336_v36  ;;  %v5374_v11 = vsub.s32 %v2033_v28, %v6336_v36 }
 0x201   : > { %1843 = vmatprep.subr.mxu0 %v6329_v55  ;;  %3691 = vmatprep.subr.mxu1 %v6277_v42  ;;  %v5385_v55 = vld [vmem:[#allocation14] sm:$0xff] }
 0x202   : > { %1847 = vmatpush1.msra.mxu0 %v6330_v58  ;;  %3723 = vmatprep.mubr.msk.f32.mxu1 %vm4264_vm5, %v6277_v42 }
 0x203   : > { %1851 = vmatprep.subr.mxu0 %v6331_v14 }
 0x204   : > { %1855 = vmatpush1.msra.mxu0 %v6332_v39  ;;  %v5391_v39 = vld [vmem:[#allocation14 + $0x8] sm:$0xff] }
 0x205   : > { %1859 = vmatprep.subr.mxu0 %v6333_v60 }
 0x206   : > { %1863 = vmatpush1.msra.mxu0 %v6334_v29 }
 0x207   : > { %1898 = vmatmul.mubr.f32.vlgmr.msra.gmra.mxu0 %v6327_v35  ;;  %3656 = vmatprep.subr.mxu0 %v6277_v42 }
 0x208   : > { %3688 = vmatprep.mubr.msk.f32.mxu0 %vm4264_vm5, %v6277_v42 }
 0x27d   : > { %v1488_v30 = vpop.f32.mrf.mxu1 }
 0x27f   : > { %v1490_v56 = vpop.f32.mrf.mxu1 }
 0x285   : > { %v1256_v7 = vpop.f32.mrf.mxu0 }
 0x286   : > { %v1489_v15 = vadd.f32 %v1488_v30, %v1256_v7 }
 0x287   : > { %v1258_v3 = vpop.f32.mrf.mxu0 }
 0x288   : > { %v1491_v5 = vadd.f32 %v1490_v56, %v1258_v3  ;;  %v6340_v56 = vld [vmem:[#allocation50_spill] sm:$0xff] }
 0x29d   : > { %v1731_v6 = vpop.f32.mrf.mxu1 }
 0x29f   : > { %v1733_v59 = vpop.f32.mrf.mxu1 }
 0x2a6   : > { %v1625_v48 = vpop.f32.mrf.mxu0 }
 0x2a7   : > { %v1626_v45 = vadd.f32 %v1625_v48, %v1489_v15 }
 0x2a8   : > { %v1627_v50 = vpop.f32.mrf.mxu0 }
 0x2a9   : > { %v1732_v62 = vadd.f32 %v1731_v6, %v1626_v45  ;;  %v1628_v43 = vadd.f32 %v1627_v50, %v1491_v5 }
 0x2ab   : > { %v1734_v53 = vadd.f32 %v1733_v59, %v1628_v43 }
 0x2bf   : > { %v2003_v52 = vpop.f32.mrf.mxu1 }
 0x2c1   : > { %v2005_v47 = vpop.f32.mrf.mxu1 }
 0x2c7   : > { %v1899_v2 = vpop.f32.mrf.mxu0 }
 0x2c8   : > { %v1900_v12 = vadd.f32 %v1899_v2, %v1732_v62 }
 0x2c9   : > { %v1901_v20 = vpop.f32.mrf.mxu0 }
 0x2ca   : > { %v5303_v4 = vadd.f32 %v2003_v52, %v1900_v12  ;;  %v1902_v24 = vadd.f32 %v1901_v20, %v1734_v53 }
 0x2cc   : > { %v2006_v34 = vadd.f32 %v2005_v47, %v1902_v24  ;;  %v2009_v33 = vand.u32 2147483647, %v5303_v4  ;;  %v2008_v9 = vmax.f32 %v5303_v4, 0.0  ;;  %v6341_v24 = vlaneseq }
 0x2ce   : > { %2020 = vst.msk [vmem:[#allocation4] sm:$0xff] %vm409_vm0, %v2006_v34  ;;  %v2010_v49 = vsub.f32 0.0, %v2009_v33  ;;  %v5415_v47 = vand.u32 127, %v6341_v24 }
 0x2d0   : > { %v2011_v25 = vmul.f32 1.442695, %v2010_v49  ;;  %vm2025_vm4 = vcmp.lt.s32.totalorder %v5415_v47, 64 }
 0x2d2   : > { %3975 = vpow2.f32 %v2011_v25 }
 0x2d5   : > { %v2028_v51 = vld [vmem:[#allocation4] sm:$0xff] }
 0x2d6   : > { %v5307_v31 = vrot.slane %v2028_v51, %v6335_v22  ;;  %v5315_v61 = vrot.slane %v2028_v51, %v6337_v0  ;;  %v5323_v16 = vrot.slane %v2028_v51, %v6338_v10  ;;  %v5331_v26 = vrot.slane %v2028_v51, %v6339_v19  ;;  %v5425_v19 = vpop.permute.xlu0 %1061 }
 0x2d7   : > { %v5339_v18 = vrot.slane %v2028_v51, %v2213_v40  ;;  %v5346_v37 = vrot.slane %v2028_v51, %v2224_v32  ;;  %v5353_v63 = vrot.slane %v2028_v51, %v2235_v46  ;;  %v5360_v1 = vrot.slane %v2028_v51, %v2246_v57 }
 0x2d8   : > { %2257 = vbcast.lane.b32.xlu1 %v5307_v31, 272  ;;  %2172 = vbcast.lane.b32.xlu0 %v5307_v31, 256 }
 0x2dc   : > { %2261 = vbcast.lane.b32.xlu1 %v5307_v31, 280  ;;  %2176 = vbcast.lane.b32.xlu0 %v5307_v31, 264 }
 0x2df   : > { %v3976_v13 = vpop.eup %3975 }
 0x2e0   : > { %2187 = vbcast.lane.b32.xlu1 %v5315_v61, 264  ;;  %2183 = vbcast.lane.b32.xlu0 %v5315_v61, 256  ;;  %v2013_v44 = vadd.f32 1.0, %v3976_v13 }
 0x2e2   : > { %3977 = vlog2.f32 %v2013_v44 }
 0x2e4   : > { %2269 = vbcast.lane.b32.xlu1 %v5315_v61, 280  ;;  %2265 = vbcast.lane.b32.xlu0 %v5315_v61, 272 }
 0x2e8   : > { %2198 = vbcast.lane.b32.xlu1 %v5323_v16, 264  ;;  %2194 = vbcast.lane.b32.xlu0 %v5323_v16, 256 }
 0x2ec   : > { %2277 = vbcast.lane.b32.xlu1 %v5323_v16, 280  ;;  %2273 = vbcast.lane.b32.xlu0 %v5323_v16, 272 }
 0x2ef   : > { %v3978_v38 = vpop.eup %3977 }
 0x2f0   : > { %2209 = vbcast.lane.b32.xlu1 %v5331_v26, 264  ;;  %2205 = vbcast.lane.b32.xlu0 %v5331_v26, 256  ;;  %v2015_v54 = vmul.f32 0.6931472, %v3978_v38 }
 0x2f2   : > { %v2016_v27 = vadd.f32 %v2015_v54, %v2008_v9 }
 0x2f4   : > { %2285 = vbcast.lane.b32.xlu1 %v5331_v26, 280  ;;  %2281 = vbcast.lane.b32.xlu0 %v5331_v26, 272  ;;  %v2037_v17 = vrot.slane %v2016_v27, %v5374_v11  ;;  %v2030_v60 = vcombine.high %v2016_v27, %v2016_v27  ;;  %v2018_v48 = vmul.f32 %v2016_v27, %v6340_v56 }
 0x2f6   : > { %v2053_v23 = vrot.slane %v2037_v17, %v5374_v11  ;;  %v2045_v35 = vcombine.high %v2037_v17, %v2037_v17  ;;  %v2044_v15 = vrot.slane %v2030_v60, %v5374_v11  ;;  %v2345_v59 = vrot.slane %v2018_v48, %v5374_v11 }
 0x2f7   : > { %v2338_v51 = vcombine.high %v2018_v48, %v2018_v48 }
 0x2f8   : > { %2220 = vbcast.lane.b32.xlu1 %v5339_v18, 264  ;;  %2216 = vbcast.lane.b32.xlu0 %v5339_v18, 256  ;;  %v2082_v41 = vrot.slane %v2053_v23, %v6335_v22  ;;  %v2067_v58 = vrot.slane %v2045_v35, %v5374_v11  ;;  %v2075_v45 = vcombine.high %v2053_v23, %v2053_v23 }
 0x2f9   : > { %v2046_v62 = vcombine.high %v2044_v15, %v2044_v15  ;;  %v2060_v50 = vrot.slane %v2044_v15, %v5374_v11  ;;  %v5418_v34 = vrot.slane %v2345_v59, %v5374_v11  ;;  %v2353_v0 = vcombine.high %v2345_v59, %v2345_v59  ;;  %v2744_v15 = vld [vmem:[#allocation15 + $0x68] sm:$0xff] }
 0x2fa   : > { %v2119_v14 = vmul.f32 %v2082_v41, %v5385_v55  ;;  %v2086_v29 = vrot.slane %v2067_v58, %v6335_v22  ;;  %v2120_v7 = vmul.f32 %v2082_v41, %v5391_v39  ;;  %v2077_v52 = vcombine.high %v2067_v58, %v2067_v58  ;;  %v2745_v41 = vld [vmem:[#allocation15 + $0x70] sm:$0xff] }
 0x2fb   : > { %v2090_v2 = vrot.slane %v2075_v45, %v6335_v22  ;;  %v5409_v12 = vrot.slane %v2046_v62, %v5374_v11  ;;  %v2076_v53 = vcombine.high %v2060_v50, %v2060_v50  ;;  %v2098_v20 = vrot.slane %v2060_v50, %v6335_v22 }
 0x2fc   : > { %2293 = vbcast.lane.b32.xlu1 %v5339_v18, 280  ;;  %2289 = vbcast.lane.b32.xlu0 %v5339_v18, 272  ;;  %v2135_v30 = vmul.f32 1.442695, %v2119_v14  ;;  %v2121_v3 = vmul.f32 %v2086_v29, %v5385_v55  ;;  %v2137_v6 = vmul.f32 1.442695, %v2120_v7  ;;  %v2122_v5 = vmul.f32 %v2086_v29, %v5391_v39 }
 0x2fd   : > { %v2123_v36 = vmul.f32 %v2090_v2, %v5385_v55  ;;  %v2124_v10 = vmul.f32 %v2090_v2, %v5391_v39  ;;  %v2127_v33 = vmul.f32 %v2098_v20, %v5385_v55  ;;  %v2128_v40 = vmul.f32 %v2098_v20, %v5391_v39 }
 0x2fe   : > { %3979 = vpow2.f32 %v2135_v30  ;;  %v2139_v43 = vmul.f32 1.442695, %v2121_v3  ;;  %v2141_v4 = vmul.f32 1.442695, %v2122_v5  ;;  %v2390_v49 = vrot.slane %v5418_v34, %v6335_v22 }
 0x2ff   : > { %3981 = vpow2.f32 %v2137_v6  ;;  %v5436_v25 = vrot.slane %v2338_v51, %v5374_v11  ;;  %v2143_v13 = vmul.f32 1.442695, %v2123_v36  ;;  %v5442_v44 = vrot.slane %v2353_v0, %v5374_v11  ;;  %v2742_v36 = vld [vmem:[#allocation15 + $0x58] sm:$0xff] }
 0x300   : > { %2231 = vbcast.lane.b32.xlu1 %v5346_v37, 264  ;;  %2227 = vbcast.lane.b32.xlu0 %v5346_v37, 256  ;;  %3983 = vpow2.f32 %v2139_v43  ;;  %v2145_v38 = vmul.f32 1.442695, %v2124_v10  ;;  %v2151_v17 = vmul.f32 1.442695, %v2127_v33  ;;  %v2383_v5 = vcombine.high %v5418_v34, %v5418_v34 }
 0x301   : > { %3985 = vpow2.f32 %v2141_v4  ;;  %v2153_v58 = vmul.f32 1.442695, %v2128_v40  ;;  %v5466_v29 = vand.u32 4294901760, %v2745_v41  ;;  %v5471_v7 = vrot.slane %v5442_v44, %v6335_v22 }
 0x302   : > { %3987 = vpow2.f32 %v2143_v13  ;;  %v5478_v6 = vand.u32 4294901760, %v2744_v15 }
 0x303   : > { %3989 = vpow2.f32 %v2145_v38  ;;  %v5476_v45 = vsub.f32 %v2745_v41, %v5466_v29 }
 0x304   : > { %2301 = vbcast.lane.b32.xlu1 %v5346_v37, 280  ;;  %2297 = vbcast.lane.b32.xlu0 %v5346_v37, 272  ;;  %3991 = vpow2.f32 %v2151_v17 }
 0x305   : > { %v6182_v4 = vand.u32 4294901760, %v5476_v45  ;;  %3993 = vpow2.f32 %v2153_v58  ;;  %v2740_v58 = vld [vmem:[#allocation15 + $0x48] sm:$0xff] }
 0x308   : > { %2238 = vbcast.lane.b32.xlu1 %v5353_v63, 256  ;;  %2242 = vbcast.lane.b32.xlu0 %v5353_v63, 264 }
 0x30b   : > { %v3980_v57 = vpop.eup %3979 }
 0x30c   : > { %2305 = vbcast.lane.b32.xlu1 %v5353_v63, 272  ;;  %2309 = vbcast.lane.b32.xlu0 %v5353_v63, 280  ;;  %v3982_v3 = vpop.eup %3981 }
 0x30d   : > { %v3984_v2 = vpop.eup %3983  ;;  %v2588_v34 = vmul.f32 0.0, %v3982_v3 }
 0x310   : > { %2249 = vbcast.lane.b32.xlu1 %v5360_v1, 256  ;;  %2253 = vbcast.lane.b32.xlu0 %v5360_v1, 264 }
 0x314   : > { %2313 = vbcast.lane.b32.xlu1 %v5360_v1, 272  ;;  %2317 = vbcast.lane.b32.xlu0 %v5360_v1, 280 }
 0x318   : > { %2445 = vbcast.lane.b32.xlu1 %v5307_v31, 288  ;;  %2449 = vbcast.lane.b32.xlu0 %v5307_v31, 296 }
 0x31c   : > { %2453 = vbcast.lane.b32.xlu1 %v5315_v61, 288  ;;  %2457 = vbcast.lane.b32.xlu0 %v5315_v61, 296 }
 0x320   : > { %2461 = vbcast.lane.b32.xlu1 %v5323_v16, 288  ;;  %2465 = vbcast.lane.b32.xlu0 %v5323_v16, 296 }
 0x324   : > { %2469 = vbcast.lane.b32.xlu1 %v5331_v26, 288  ;;  %2473 = vbcast.lane.b32.xlu0 %v5331_v26, 296 }
 0x328   : > { %2477 = vbcast.lane.b32.xlu1 %v5339_v18, 288  ;;  %2481 = vbcast.lane.b32.xlu0 %v5339_v18, 296 }
 0x32c   : > { %2485 = vbcast.lane.b32.xlu1 %v5346_v37, 288  ;;  %2489 = vbcast.lane.b32.xlu0 %v5346_v37, 296 }
 0x330   : > { %2493 = vbcast.lane.b32.xlu1 %v5353_v63, 288  ;;  %2497 = vbcast.lane.b32.xlu0 %v5353_v63, 296 }
 0x334   : > { %2501 = vbcast.lane.b32.xlu1 %v5360_v1, 288  ;;  %2505 = vbcast.lane.b32.xlu0 %v5360_v1, 296 }
 0x338   : > { %2509 = vbcast.lane.b32.xlu1 %v5307_v31, 304  ;;  %2513 = vbcast.lane.b32.xlu0 %v5307_v31, 312  ;;  %v2094_v31 = vrot.slane %v2077_v52, %v6335_v22  ;;  %v2743_v52 = vld [vmem:[#allocation15 + $0x60] sm:$0xff] }
 0x33a   : > { %v2125_v46 = vmul.f32 %v2094_v31, %v5385_v55  ;;  %v2126_v8 = vmul.f32 %v2094_v31, %v5391_v39  ;;  %v5500_v31 = vand.u32 4294901760, %v2743_v52 }
 0x33c   : > { %2517 = vbcast.lane.b32.xlu1 %v5315_v61, 304  ;;  %2521 = vbcast.lane.b32.xlu0 %v5315_v61, 312  ;;  %v2102_v61 = vrot.slane %v5409_v12, %v6335_v22  ;;  %v2147_v59 = vmul.f32 1.442695, %v2125_v46  ;;  %v2149_v46 = vmul.f32 1.442695, %v2126_v8  ;;  %v5515_v13 = vsub.f32 %v2743_v52, %v5500_v31 }
 0x33e   : > { %v5446_v21 = vmul.f32 %v2102_v61, %v5385_v55  ;;  %v5451_v28 = vmul.f32 %v2102_v61, %v5391_v39  ;;  %v2849_v61 = vsub.f32 %v5476_v45, %v6182_v4  ;;  %3995 = vpow2.f32 %v2147_v59 }
 0x33f   : > { %v6180_v41 = vand.u32 4294901760, %v5515_v13  ;;  %3997 = vpow2.f32 %v2149_v46 }
 0x340   : > { %2525 = vbcast.lane.b32.xlu1 %v5323_v16, 304  ;;  %2529 = vbcast.lane.b32.xlu0 %v5323_v16, 312  ;;  %v2106_v16 = vrot.slane %v2076_v53, %v6335_v22  ;;  %v2850_v38 = vand.u32 4294901760, %v2849_v61  ;;  %v5545_v59 = vmul.f32 1.442695, %v5446_v21 }
 0x341   : > { %v2863_v52 = vsub.f32 %v5515_v13, %v6180_v41 }
 0x342   : > { %v5454_v9 = vmul.f32 %v2106_v16, %v5385_v55  ;;  %v5457_v27 = vmul.f32 %v2106_v16, %v5391_v39  ;;  %v5507_v16 = vand.u32 4294901760, %v2742_v36 }
 0x344   : > { %2533 = vbcast.lane.b32.xlu1 %v5331_v26, 304  ;;  %2537 = vbcast.lane.b32.xlu0 %v5331_v26, 312  ;;  %v2746_v26 = vld [vmem:[#allocation15 + $0x78] sm:$0xff] }
 0x345   : > { %v5448_v54 = vand.u32 4294901760, %v2746_v26 }
 0x347   : > { %v5464_v60 = vsub.f32 %v2746_v26, %v5448_v54  ;;  %3657 = vmatpush3.msra.mxu0 %v5448_v54  ;;  %v2741_v26 = vld [vmem:[#allocation15 + $0x50] sm:$0xff] }
 0x348   : > { %2541 = vbcast.lane.b32.xlu1 %v5339_v18, 304  ;;  %2545 = vbcast.lane.b32.xlu0 %v5339_v18, 312  ;;  %v2587_v18 = vmul.f32 0.0, %v3980_v57  ;;  %v3986_v57 = vpop.eup %3985 }
 0x349   : > { %3658 = vmatprep.subr.mxu0 %v6277_v42  ;;  %v6183_v48 = vand.u32 4294901760, %v5464_v60  ;;  %v3988_v61 = vpop.eup %3987 }
 0x34a   : > { %v2258_v23 = vpop.permute.xlu1 %2257  ;;  %v2173_v35 = vpop.permute.xlu0 %2172  ;;  %3659 = vmatpush3.msra.mxu0 %v5466_v29 }
 0x34b   : > { %v2321_v14 = vsel %vm2025_vm4, %v2173_v35, %v2258_v23  ;;  %v2842_v20 = vsub.f32 %v5464_v60, %v6183_v48  ;;  %3660 = vmatprep.subr.mxu0 %v6277_v42  ;;  %v5521_v23 = vsub.f32 %v2742_v36, %v5507_v16 }
 0x34c   : > { %v2427_v30 = vmul.f32 %v2390_v49, %v2321_v14  ;;  %2549 = vbcast.lane.b32.xlu1 %v5346_v37, 304  ;;  %2553 = vbcast.lane.b32.xlu0 %v5346_v37, 312  ;;  %v5494_v37 = vsub.f32 %v2744_v15, %v5478_v6  ;;  %v5536_v15 = vand.u32 4294901760, %v2740_v58 }
 0x34d   : > { %3661 = vmatpush3.msra.mxu0 %v5478_v6  ;;  %v2843_v0 = vand.u32 4294901760, %v2842_v20 }
 0x34e   : > { %v2262_v62 = vpop.permute.xlu1 %2261  ;;  %v2177_v50 = vpop.permute.xlu0 %2176  ;;  %v5485_v43 = vadd.f32 %v2587_v18, %v2427_v30  ;;  %v6181_v10 = vand.u32 4294901760, %v5494_v37  ;;  %3662 = vmatprep.subr.mxu0 %v6277_v42  ;;  %v6178_v30 = vand.u32 4294901760, %v5521_v23  ;;  %v5563_v36 = vsub.f32 %v2740_v58, %v5536_v15 }
 0x34f   : > { %v2322_v53 = vsel %vm2025_vm4, %v2177_v50, %v2262_v62  ;;  %3692 = vmatpush3.msra.mxu1 %v2843_v0  ;;  %3663 = vmatpush3.msra.mxu0 %v5500_v31  ;;  %v5542_v50 = vrot.slane %v2383_v5, %v6335_v22  ;;  %v2738_v0 = vld [vmem:[#allocation15 + $0x38] sm:$0xff] }
 0x350   : > { %v2428_v24 = vmul.f32 %v2390_v49, %v2322_v53  ;;  %v5498_v51 = vmul.f32 %v3984_v2, %v5485_v43  ;;  %2557 = vbcast.lane.b32.xlu1 %v5353_v63, 304  ;;  %2561 = vbcast.lane.b32.xlu0 %v5353_v63, 312  ;;  %v2856_v17 = vsub.f32 %v5494_v37, %v6181_v10  ;;  %v5523_v63 = vand.u32 4294901760, %v2741_v26  ;;  %v2739_v2 = vld [vmem:[#allocation15 + $0x40] sm:$0xff] }
 0x351   : > { %3693 = vmatprep.subr.mxu1 %v6277_v42  ;;  %3664 = vmatprep.subr.mxu0 %v6277_v42  ;;  %v2870_v5 = vsub.f32 %v5521_v23, %v6178_v30  ;;  %6343 = vst [vmem:[#allocation32_spill] sm:$0xff] %v5563_v36  ;;  %v5570_v46 = vand.u32 4294901760, %v2739_v2 }
 0x352   : > { %v2188_v33 = vpop.permute.xlu1 %2187  ;;  %v2184_v40 = vpop.permute.xlu0 %2183  ;;  %v5512_v49 = vadd.f32 %v2588_v34, %v2428_v24  ;;  %3694 = vmatpush3.msra.mxu1 %v2850_v38  ;;  %v2857_v14 = vand.u32 4294901760, %v2856_v17  ;;  %v5534_v18 = vsub.f32 %v2741_v26, %v5523_v63  ;;  %3665 = vmatpush3.msra.mxu0 %v5507_v16  ;;  %v2864_v34 = vand.u32 4294901760, %v2863_v52 }
 0x353   : > { %3695 = vmatprep.subr.mxu1 %v6277_v42  ;;  %3666 = vmatprep.subr.mxu0 %v6277_v42  ;;  %v5572_v26 = vand.u32 4294901760, %v2738_v0 }
 0x354   : > { %v2602_v35 = vmul.f32 %v3986_v57, %v5512_v49  ;;  %6342 = vst [vmem:[#allocation25_spill] sm:$0xff] %v5534_v18  ;;  %2565 = vbcast.lane.b32.xlu1 %v5360_v1, 304  ;;  %2569 = vbcast.lane.b32.xlu0 %v5360_v1, 312  ;;  %v6177_v21 = vand.u32 4294901760, %v5534_v18 }
 0x355   : > { %3696 = vmatpush3.msra.mxu1 %v2857_v14  ;;  %3667 = vmatpush3.msra.mxu0 %v5523_v63  ;;  %v5581_v14 = vmul.f32 1.442695, %v5451_v28  ;;  %v2736_v28 = vld [vmem:[#allocation15 + $0x28] sm:$0xff] }
 0x356   : > { %v2270_v3 = vpop.permute.xlu1 %2269  ;;  %v2266_v62 = vpop.permute.xlu0 %2265  ;;  %3697 = vmatprep.subr.mxu1 %v6277_v42  ;;  %3668 = vmatprep.subr.mxu0 %v6277_v42 }
 0x357   : > { %v2324_v53 = vsel %vm2025_vm4, %v2188_v33, %v2270_v3  ;;  %v2323_v1 = vsel %vm2025_vm4, %v2184_v40, %v2266_v62  ;;  %v2871_v33 = vand.u32 4294901760, %v2870_v5  ;;  %v2877_v40 = vsub.f32 %v5534_v18, %v6177_v21  ;;  %3698 = vmatpush3.msra.mxu1 %v2864_v34  ;;  %v2737_v62 = vld [vmem:[#allocation15 + $0x30] sm:$0xff]  ;;  %3669 = vmatpush3.msra.mxu0 %v5536_v15  ;;  %v2735_v5 = vld [vmem:[#allocation15 + $0x20] sm:$0xff] }
 0x358   : > { %v2430_v20 = vmul.f32 %v5471_v7, %v2324_v53  ;;  %v2429_v24 = vmul.f32 %v5471_v7, %v2323_v1  ;;  %v3990_v7 = vpop.eup %3989  ;;  %v6179_v3 = vand.u32 4294901760, %v5563_v36  ;;  %3699 = vmatprep.subr.mxu1 %v6277_v42  ;;  %v5589_v1 = vsub.f32 %v2739_v2, %v5570_v46  ;;  %3670 = vmatprep.subr.mxu0 %v6277_v42 }
 0x359   : > { %v5585_v52 = vpop.eup %3991  ;;  %v2878_v53 = vand.u32 4294901760, %v2877_v40  ;;  %3700 = vmatpush3.msra.mxu1 %v2871_v33  ;;  %v5602_v40 = vand.u32 4294901760, %v2736_v28  ;;  %3671 = vmatpush3.msra.mxu0 %v5570_v46  ;;  %3999 = vpow2.f32 %v5581_v14 }
 0x35a   : > { %v2199_v57 = vpop.permute.xlu1 %2198  ;;  %v2195_v38 = vpop.permute.xlu0 %2194  ;;  %v5576_v17 = vadd.f32 %v5498_v51, %v2429_v24  ;;  %v5578_v58 = vadd.f32 %v2602_v35, %v2430_v20  ;;  %6344 = vst [vmem:[#allocation26_spill] sm:$0xff] %v5589_v1  ;;  %v5592_v51 = vsub.f32 %v2738_v0, %v5572_v26  ;;  %v5594_v35 = vand.u32 4294901760, %v2737_v62  ;;  %v2734_v20 = vld [vmem:[#allocation15 + $0x18] sm:$0xff]  ;;  %v2733_v0 = vld [vmem:[#allocation15 + $0x10] sm:$0xff]  ;;  %3701 = vmatprep.subr.mxu1 %v6277_v42 }
 0x35b   : > { %v2884_v2 = vsub.f32 %v5563_v36, %v6179_v3  ;;  %6346 = vst [vmem:[#allocation27_spill] sm:$0xff] %v5602_v40  ;;  %v6186_v21 = vand.u32 4294901760, %v5589_v1  ;;  %3672 = vmatprep.subr.mxu0 %v6277_v42  ;;  %3702 = vmatpush3.msra.mxu1 %v2878_v53  ;;  %v5615_v10 = vsub.f32 %v2736_v28, %v5602_v40  ;;  %v5618_v4 = vand.u32 4294901760, %v2734_v20  ;;  %v5622_v32 = vpop.eup %3993 }
 0x35c   : > { %6345 = vst [vmem:[#allocation34_spill] sm:$0xff] %v5592_v51  ;;  %v2617_v24 = vmul.f32 %v3988_v61, %v5576_v17  ;;  %v2618_v34 = vmul.f32 %v3990_v7, %v5578_v58  ;;  %v6191_v30 = vand.u32 4294901760, %v5592_v51  ;;  %v5609_v61 = vsub.f32 %v2737_v62, %v5594_v35  ;;  %3673 = vmatpush3.msra.mxu0 %v5572_v26 }
 0x35d   : > { %v5611_v7 = vand.u32 4294901760, %v2735_v5  ;;  %v2885_v41 = vand.u32 4294901760, %v2884_v2  ;;  %6349 = vst [vmem:[#allocation39_spill] sm:$0xff] %v5615_v10  ;;  %6350 = vst [vmem:[#allocation29_spill] sm:$0xff] %v5618_v4  ;;  %v5620_v48 = vand.u32 4294901760, %v2733_v0  ;;  %3703 = vmatprep.subr.mxu1 %v6277_v42  ;;  %v2891_v53 = vsub.f32 %v5589_v1, %v6186_v21  ;;  %3674 = vmatprep.subr.mxu0 %v6277_v42 }
 0x35e   : > { %6347 = vst [vmem:[#allocation36_spill] sm:$0xff] %v5609_v61  ;;  %v2278_v33 = vpop.permute.xlu1 %2277  ;;  %v2274_v3 = vpop.permute.xlu0 %2273  ;;  %v2898_v28 = vsub.f32 %v5592_v51, %v6191_v30  ;;  %3675 = vmatpush3.msra.mxu0 %v5594_v35  ;;  %4001 = vpow2.f32 %v5545_v59  ;;  %v5706_v59 = vrot.slane %v5436_v25, %v5374_v11 }
 0x35f   : > { %6348 = vst [vmem:[#allocation28_spill] sm:$0xff] %v5611_v7  ;;  %6351 = vst [vmem:[#allocation40_spill] sm:$0xff] %v5620_v48  ;;  %v2326_v62 = vsel %vm2025_vm4, %v2199_v57, %v2278_v33  ;;  %v2325_v8 = vsel %vm2025_vm4, %v2195_v38, %v2274_v3  ;;  %3704 = vmatpush3.msra.mxu1 %v2885_v41  ;;  %v6194_v57 = vand.u32 4294901760, %v5609_v61  ;;  %v2732_v38 = vld [vmem:[#allocation15 + $0x8] sm:$0xff]  ;;  %v3996_v3 = vpop.eup %3995  ;;  %v2892_v21 = vand.u32 4294901760, %v2891_v53 }
 0x360   : > { %v2432_v2 = vmul.f32 %v5542_v50, %v2326_v62  ;;  %v2431_v36 = vmul.f32 %v5542_v50, %v2325_v8  ;;  %3705 = vmatprep.subr.mxu1 %v6277_v42  ;;  %v2899_v1 = vand.u32 4294901760, %v2898_v28  ;;  %v5642_v18 = vsub.f32 %v2735_v5, %v5611_v7  ;;  %3676 = vmatprep.subr.mxu0 %v6277_v42 }
 0x361   : > { %v5645_v62 = vsub.f32 %v2734_v20, %v5618_v4  ;;  %v2905_v33 = vsub.f32 %v5609_v61, %v6194_v57  ;;  %v6354_v53 = vand.u32 4294901760, %v5615_v10  ;;  %v3998_v20 = vpop.eup %3997  ;;  %3706 = vmatpush3.msra.mxu1 %v2892_v21  ;;  %3677 = vmatpush3.msra.mxu0 %v5602_v40 }
 0x362   : > { %6352 = vst [vmem:[#allocation30_spill] sm:$0xff] %v5642_v18  ;;  %v2210_v8 = vpop.permute.xlu1 %2209  ;;  %v2206_v41 = vpop.permute.xlu0 %2205  ;;  %v5648_v50 = vadd.f32 %v2617_v24, %v2431_v36  ;;  %v5650_v30 = vadd.f32 %v2618_v34, %v2432_v2  ;;  %v6199_v28 = vand.u32 4294901760, %v5642_v18  ;;  %v5662_v36 = vsub.f32 %v2733_v0, %v5620_v48  ;;  %v2731_v34 = vld [vmem:[#allocation15] sm:$0xff]  ;;  %3707 = vmatprep.subr.mxu1 %v6277_v42 }
 0x363   : > { %6353 = vst [vmem:[#allocation42_spill] sm:$0xff] %v5645_v62  ;;  %v2912_v5 = vsub.f32 %v5615_v10, %v6354_v53  ;;  %v6200_v51 = vand.u32 4294901760, %v5645_v62  ;;  %v5665_v24 = vand.u32 4294901760, %v2732_v38  ;;  %v2906_v57 = vand.u32 4294901760, %v2905_v33  ;;  %3678 = vmatprep.subr.mxu0 %v6277_v42  ;;  %3708 = vmatpush3.msra.mxu1 %v2899_v1 }
 0x364   : > { %6355 = vst [vmem:[#allocation31_spill] sm:$0xff] %v5662_v36  ;;  %v2633_v2 = vmul.f32 %v3996_v3, %v5648_v50  ;;  %v2634_v53 = vmul.f32 %v3998_v20, %v5650_v30  ;;  %v2919_v0 = vsub.f32 %v5642_v18, %v6199_v28  ;;  %v6205_v61 = vand.u32 4294901760, %v5662_v36  ;;  %3679 = vmatpush3.msra.mxu0 %v5611_v7 }
 0x365   : > { %6356 = vst [vmem:[#allocation44_spill] sm:$0xff] %v5665_v24  ;;  %v2913_v21 = vand.u32 4294901760, %v2912_v5  ;;  %v2926_v10 = vsub.f32 %v5645_v62, %v6200_v51  ;;  %v5679_v3 = vsub.f32 %v2732_v38, %v5665_v24  ;;  %v6358_v33 = vcombine.high %v5442_v44, %v5442_v44  ;;  %3709 = vmatprep.subr.mxu1 %v6277_v42 }
 0x366   : > { %v2286_v5 = vpop.permute.xlu1 %2285  ;;  %v2282_v20 = vpop.permute.xlu0 %2281  ;;  %v5688_v28 = vand.u32 4294901760, %v2731_v34  ;;  %3680 = vmatprep.subr.mxu0 %v6277_v42  ;;  %3710 = vmatpush3.msra.mxu1 %v2906_v57  ;;  %v2920_v44 = vand.u32 4294901760, %v2919_v0  ;;  %v2933_v62 = vsub.f32 %v5662_v36, %v6205_v61 }
 0x367   : > { %6357 = vst [vmem:[#allocation33_spill] sm:$0xff] %v5679_v3  ;;  %v2402_v1 = vrot.slane %v6358_v33, %v6335_v22  ;;  %v2328_v38 = vsel %vm2025_vm4, %v2210_v8, %v2286_v5  ;;  %v2327_v51 = vsel %vm2025_vm4, %v2206_v41, %v2282_v20  ;;  %3711 = vmatprep.subr.mxu1 %v6277_v42  ;;  %v6204_v8 = vand.u32 4294901760, %v5679_v3 }
 0x368   : > { %6359 = vst [vmem:[#allocation23_spill] sm:$0xff] %v5688_v28  ;;  %3681 = vmatpush3.msra.mxu0 %v5618_v4  ;;  %3712 = vmatpush3.msra.mxu1 %v2913_v21  ;;  %v2927_v57 = vand.u32 4294901760, %v2926_v10  ;;  %v5709_v41 = vsub.f32 %v2731_v34, %v5688_v28  ;;  %v6361_v10 = vcombine.high %v5409_v12, %v5409_v12  ;;  %v2159_v20 = vmul.f32 1.442695, %v5454_v9 }
 0x369   : > { %v2434_v14 = vmul.f32 %v2402_v1, %v2328_v38  ;;  %v2433_v33 = vmul.f32 %v2402_v1, %v2327_v51  ;;  %3682 = vmatprep.subr.mxu0 %v6277_v42  ;;  %3713 = vmatprep.subr.mxu1 %v6277_v42  ;;  %v2940_v5 = vsub.f32 %v5679_v3, %v6204_v8 }
 0x36a   : > { %6360 = vst [vmem:[#allocation35_spill] sm:$0xff] %v5709_v41  ;;  %v2221_v51 = vpop.permute.xlu1 %2220  ;;  %3683 = vmatpush3.msra.mxu0 %v5620_v48  ;;  %v2110_v34 = vrot.slane %v6361_v10, %v6335_v22  ;;  %v2217_v21 = vpop.permute.xlu0 %2216  ;;  %3714 = vmatpush3.msra.mxu1 %v2920_v44  ;;  %4003 = vpow2.f32 %v2159_v20 }
 0x36b   : > { %v5712_v0 = vadd.f32 %v2633_v2, %v2433_v33  ;;  %v5714_v1 = vadd.f32 %v2634_v53, %v2434_v14  ;;  %v2934_v2 = vand.u32 4294901760, %v2933_v62  ;;  %v6203_v53 = vand.u32 4294901760, %v5709_v41  ;;  %3684 = vmatprep.subr.mxu0 %v6277_v42  ;;  %3715 = vmatprep.subr.mxu1 %v6277_v42 }
 0x36c   : > { %v2161_v33 = vmul.f32 1.442695, %v5457_v27  ;;  %3685 = vmatpush3.msra.mxu0 %v5665_v24  ;;  %3716 = vmatpush3.msra.mxu1 %v2927_v57  ;;  %v2941_v12 = vand.u32 4294901760, %v2940_v5  ;;  %v2133_v57 = vmul.f32 %v2110_v34, %v5385_v55  ;;  %v4000_v55 = vpop.eup %3999 }
 0x36d   : > { %v2649_v38 = vmul.f32 %v5585_v52, %v5712_v0  ;;  %v2650_v14 = vmul.f32 %v5622_v32, %v5714_v1  ;;  %v2947_v9 = vsub.f32 %v5709_v41, %v6203_v53  ;;  %3686 = vmatprep.subr.mxu0 %v6277_v42  ;;  %v2406_v52 = vrot.slane %v5706_v59, %v6335_v22 }
 0x36e   : > { %v2294_v62 = vpop.permute.xlu1 %2293  ;;  %v2354_v32 = vcombine.high %v5436_v25, %v5436_v25  ;;  %3717 = vmatprep.subr.mxu1 %v6277_v42  ;;  %3687 = vmatpush3.msra.mxu0 %v5688_v28  ;;  %v2290_v44 = vpop.permute.xlu0 %2289  ;;  %4005 = vpow2.f32 %v2161_v33  ;;  %v2134_v53 = vmul.f32 %v2110_v34, %v5391_v39 }
 0x36f   : > { %v2330_v27 = vsel %vm2025_vm4, %v2221_v51, %v2294_v62  ;;  %3718 = vmatpush3.msra.mxu1 %v2934_v2  ;;  %v2948_v5 = vand.u32 4294901760, %v2947_v9  ;;  %v2329_v25 = vsel %vm2025_vm4, %v2217_v21, %v2290_v44  ;;  %3726 = vmatprep.subr.mxu0 %v6277_v42  ;;  %v2163_v9 = vmul.f32 1.442695, %v2133_v57  ;;  %v4002_v62 = vpop.eup %4001 }
 0x370   : > { %v2436_v10 = vmul.f32 %v2406_v52, %v2330_v27  ;;  %3719 = vmatprep.subr.mxu1 %v6277_v42  ;;  %v2435_v51 = vmul.f32 %v2406_v52, %v2329_v25  ;;  %v2382_v39 = vrot.slane %v2354_v32, %v5374_v11  ;;  %v2165_v27 = vmul.f32 1.442695, %v2134_v53 }
 0x371   : > { %3720 = vmatpush3.msra.mxu1 %v2941_v12  ;;  %4007 = vpow2.f32 %v2163_v9  ;;  %v2384_v25 = vcombine.high %v5706_v59, %v5706_v59 }
 0x372   : > { %v5755_v20 = vadd.f32 %v2650_v14, %v2436_v10  ;;  %3721 = vmatprep.subr.mxu1 %v6277_v42  ;;  %v5758_v2 = vadd.f32 %v2649_v38, %v2435_v51  ;;  %v2232_v21 = vpop.permute.xlu1 %2231  ;;  %v2228_v33 = vpop.permute.xlu0 %2227  ;;  %v2410_v12 = vrot.slane %v2382_v39, %v6335_v22  ;;  %4009 = vpow2.f32 %v2165_v27 }
 0x373   : > { %3722 = vmatpush3.msra.mxu1 %v2948_v5  ;;  %v2414_v27 = vrot.slane %v2384_v25, %v6335_v22 }
 0x374   : > { %v2666_v34 = vmul.f32 %v4000_v55, %v5755_v20  ;;  %3761 = vmatprep.subr.mxu1 %v6277_v42  ;;  %v2665_v14 = vmul.f32 %v4002_v62, %v5758_v2 }
 0x376   : > { %v2302_v52 = vpop.permute.xlu1 %2301  ;;  %v2298_v38 = vpop.permute.xlu0 %2297 }
 0x377   : > { %v2332_v44 = vsel %vm2025_vm4, %v2232_v21, %v2302_v52  ;;  %v2331_v57 = vsel %vm2025_vm4, %v2228_v33, %v2298_v38  ;;  %v4004_v5 = vpop.eup %4003 }
 0x378   : > { %v2438_v11 = vmul.f32 %v2410_v12, %v2332_v44  ;;  %v2437_v32 = vmul.f32 %v2410_v12, %v2331_v57 }
 0x37a   : > { %v2239_v53 = vpop.permute.xlu1 %2238  ;;  %v2243_v10 = vpop.permute.xlu0 %2242  ;;  %v5771_v51 = vadd.f32 %v2665_v14, %v2437_v32  ;;  %v5773_v55 = vadd.f32 %v2666_v34, %v2438_v11  ;;  %v2386_v11 = vcombine.high %v2382_v39, %v2382_v39 }
 0x37b   : > { %v4006_v9 = vpop.eup %4005 }
 0x37c   : > { %v2681_v62 = vmul.f32 %v4004_v5, %v5771_v51  ;;  %v2682_v21 = vmul.f32 %v4006_v9, %v5773_v55 }
 0x37e   : > { %v2306_v33 = vpop.permute.xlu1 %2305  ;;  %v2310_v52 = vpop.permute.xlu0 %2309 }
 0x37f   : > { %v2333_v12 = vsel %vm2025_vm4, %v2239_v53, %v2306_v33  ;;  %v2334_v38 = vsel %vm2025_vm4, %v2243_v10, %v2310_v52  ;;  %v4008_v44 = vpop.eup %4007  ;;  %v2418_v53 = vrot.slane %v2386_v11, %v6335_v22 }
 0x380   : > { %v2439_v59 = vmul.f32 %v2414_v27, %v2333_v12  ;;  %v2440_v14 = vmul.f32 %v2414_v27, %v2334_v38  ;;  %v4010_v9 = vpop.eup %4009 }
 0x382   : > { %v2250_v34 = vpop.permute.xlu1 %2249  ;;  %v2254_v57 = vpop.permute.xlu0 %2253  ;;  %v5782_v32 = vadd.f32 %v2681_v62, %v2439_v59  ;;  %v5784_v5 = vadd.f32 %v2682_v21, %v2440_v14 }
 0x384   : > { %v2697_v25 = vmul.f32 %v4008_v44, %v5782_v32  ;;  %v2698_v8 = vmul.f32 %v4010_v9, %v5784_v5 }
 0x386   : > { %v2314_v33 = vpop.permute.xlu1 %2313  ;;  %v2318_v61 = vpop.permute.xlu0 %2317 }
 0x387   : > { %v2335_v10 = vsel %vm2025_vm4, %v2250_v34, %v2314_v33  ;;  %v2336_v27 = vsel %vm2025_vm4, %v2254_v57, %v2318_v61 }
 0x388   : > { %v2441_v39 = vmul.f32 %v2418_v53, %v2335_v10  ;;  %v2442_v62 = vmul.f32 %v2418_v53, %v2336_v27 }
 0x38a   : > { %v2446_v52 = vpop.permute.xlu1 %2445  ;;  %v2450_v21 = vpop.permute.xlu0 %2449  ;;  %v5793_v12 = vadd.f32 %v2697_v25, %v2441_v39  ;;  %v5795_v38 = vadd.f32 %v2698_v8, %v2442_v62 }
 0x38e   : > { %v2454_v59 = vpop.permute.xlu1 %2453  ;;  %v2458_v14 = vpop.permute.xlu0 %2457 }
 0x392   : > { %v2462_v44 = vpop.permute.xlu1 %2461  ;;  %v2466_v22 = vpop.permute.xlu0 %2465 }
 0x396   : > { %v2470_v11 = vpop.permute.xlu1 %2469  ;;  %v2474_v9 = vpop.permute.xlu0 %2473 }
 0x39a   : > { %v2478_v41 = vpop.permute.xlu1 %2477  ;;  %v2482_v3 = vpop.permute.xlu0 %2481 }
 0x39e   : > { %v5797_v34 = vpop.permute.xlu1 %2485  ;;  %v5799_v33 = vpop.permute.xlu0 %2489 }
 0x3a2   : > { %v5801_v61 = vpop.permute.xlu1 %2493  ;;  %v5803_v57 = vpop.permute.xlu0 %2497 }
 0x3a6   : > { %v5805_v25 = vpop.permute.xlu1 %2501  ;;  %v5807_v8 = vpop.permute.xlu0 %2505 }
 0x3aa   : > { %v2510_v53 = vpop.permute.xlu1 %2509  ;;  %v2514_v10 = vpop.permute.xlu0 %2513 }
 0x3ab   : > { %v2571_v27 = vsel %vm2025_vm4, %v2446_v52, %v2510_v53  ;;  %v2572_v39 = vsel %vm2025_vm4, %v2450_v21, %v2514_v10 }
 0x3ac   : > { %v2591_v62 = vmul.f32 %v5485_v43, %v2571_v27  ;;  %v2592_v36 = vmul.f32 %v5512_v49, %v2572_v39 }
 0x3ae   : > { %v2593_v28 = vadd.f32 %v2592_v36, %v2591_v62  ;;  %v2518_v18 = vpop.permute.xlu1 %2517  ;;  %v2522_v24 = vpop.permute.xlu0 %2521 }
 0x3af   : > { %v2573_v48 = vsel %vm2025_vm4, %v2454_v59, %v2518_v18  ;;  %v2574_v4 = vsel %vm2025_vm4, %v2458_v14, %v2522_v24 }
 0x3b0   : > { %v2594_v7 = vrot.slane %v2593_v28, 4  ;;  %v2605_v40 = vmul.f32 %v5576_v17, %v2573_v48  ;;  %v2606_v52 = vmul.f32 %v5578_v58, %v2574_v4  ;;  %v6362_v48 = vld [vmem:[#allocation49_spill] sm:$0xff] }
 0x3b1   : > { %v5830_v4 = vsel %vm409_vm0, %v6362_v48, %v5425_v19 }
 0x3b2   : > { %v2595_v53 = vadd.f32 %v2594_v7, %v2593_v28  ;;  %v2607_v21 = vadd.f32 %v2606_v52, %v2605_v40  ;;  %v2526_v10 = vpop.permute.xlu1 %2525  ;;  %v2530_v43 = vpop.permute.xlu0 %2529  ;;  %v3549_v62 = vmul.f32 -1.442695, %v5830_v4 }
 0x3b3   : > { %v2575_v49 = vsel %vm2025_vm4, %v2462_v44, %v2526_v10  ;;  %v2576_v36 = vsel %vm2025_vm4, %v2466_v22, %v2530_v43 }
 0x3b4   : > { %v2596_v27 = vrot.slane %v2595_v53, 2  ;;  %v2608_v18 = vrot.slane %v2607_v21, 4  ;;  %v2621_v59 = vmul.f32 %v5648_v50, %v2575_v49  ;;  %v2622_v24 = vmul.f32 %v5650_v30, %v2576_v36 }
 0x3b5   : > { %4011 = vpow2.f32 %v3549_v62 }
 0x3b6   : > { %v2597_v17 = vadd.f32 %v2596_v27, %v2595_v53  ;;  %v2609_v58 = vadd.f32 %v2608_v18, %v2607_v21  ;;  %v2623_v40 = vadd.f32 %v2622_v24, %v2621_v59  ;;  %v2534_v7 = vpop.permute.xlu1 %2533  ;;  %v2538_v28 = vpop.permute.xlu0 %2537 }
 0x3b7   : > { %v2577_v14 = vsel %vm2025_vm4, %v2470_v11, %v2534_v7  ;;  %v2578_v44 = vsel %vm2025_vm4, %v2474_v9, %v2538_v28 }
 0x3b8   : > { %v2598_v22 = vrot.slane %v2597_v17, 1  ;;  %v2610_v50 = vrot.slane %v2609_v58, 2  ;;  %v2624_v39 = vrot.slane %v2623_v40, 4  ;;  %v2637_v30 = vmul.f32 %v5712_v0, %v2577_v14 }
 0x3b9   : > { %v2638_v19 = vmul.f32 %v5714_v1, %v2578_v44 }
 0x3ba   : > { %v2599_v52 = vadd.f32 %v2598_v22, %v2597_v17  ;;  %v2611_v53 = vadd.f32 %v2610_v50, %v2609_v58  ;;  %v2625_v21 = vadd.f32 %v2624_v39, %v2623_v40  ;;  %v2542_v10 = vpop.permute.xlu1 %2541  ;;  %v2546_v43 = vpop.permute.xlu0 %2545 }
 0x3bb   : > { %v2639_v49 = vadd.f32 %v2638_v19, %v2637_v30  ;;  %v2579_v11 = vsel %vm2025_vm4, %v2478_v41, %v2542_v10  ;;  %v2580_v9 = vsel %vm2025_vm4, %v2482_v3, %v2546_v43 }
 0x3bc   : > { %2600 = vst [vmem:[#allocation5] sm:$0x1] %v2599_v52  ;;  %v2612_v36 = vrot.slane %v2611_v53, 1  ;;  %v2626_v27 = vrot.slane %v2625_v21, 2  ;;  %v2653_v0 = vmul.f32 %v5758_v2, %v2579_v11  ;;  %v2654_v18 = vmul.f32 %v5755_v20, %v2580_v9 }
 0x3bd   : > { %v2640_v1 = vrot.slane %v2639_v49, 4 }
 0x3be   : > { %v2613_v59 = vadd.f32 %v2612_v36, %v2611_v53  ;;  %v2627_v24 = vadd.f32 %v2626_v27, %v2625_v21  ;;  %v2655_v48 = vadd.f32 %v2654_v18, %v2653_v0  ;;  %v2550_v17 = vpop.permute.xlu1 %2549  ;;  %v2554_v58 = vpop.permute.xlu0 %2553 }
 0x3bf   : > { %v2641_v40 = vadd.f32 %v2640_v1, %v2639_v49  ;;  %v2581_v41 = vsel %vm2025_vm4, %v5797_v34, %v2550_v17  ;;  %v2582_v3 = vsel %vm2025_vm4, %v5799_v33, %v2554_v58 }
 0x3c0   : > { %2616 = vst [vmem:[#allocation5 + $0x1] sm:$0x1] %v2613_v59  ;;  %v2628_v2 = vrot.slane %v2627_v24, 1  ;;  %v2656_v7 = vrot.slane %v2655_v48, 4  ;;  %v2669_v20 = vmul.f32 %v5771_v51, %v2581_v41  ;;  %v2670_v28 = vmul.f32 %v5773_v55, %v2582_v3 }
 0x3c1   : > { %v2642_v14 = vrot.slane %v2641_v40, 2 }
 0x3c2   : > { %v2629_v44 = vadd.f32 %v2628_v2, %v2627_v24  ;;  %v2657_v22 = vadd.f32 %v2656_v7, %v2655_v48  ;;  %v2671_v50 = vadd.f32 %v2670_v28, %v2669_v20  ;;  %v2558_v39 = vpop.permute.xlu1 %2557  ;;  %v2562_v30 = vpop.permute.xlu0 %2561  ;;  %v3548_v28 = vld [vmem:[%s6078_s6] ss:$0 sm:$0xff] }
 0x3c3   : > { %v2643_v62 = vadd.f32 %v2642_v14, %v2641_v40  ;;  %v2583_v34 = vsel %vm2025_vm4, %v5801_v61, %v2558_v39  ;;  %v2584_v33 = vsel %vm2025_vm4, %v5803_v57, %v2562_v30  ;;  %v4012_v18 = vpop.eup %4011 }
 0x3c4   : > { %2632 = vst [vmem:[#allocation5 + $0x2] sm:$0x1] %v2629_v44  ;;  %v2658_v19 = vrot.slane %v2657_v22, 2  ;;  %v2672_v51 = vrot.slane %v2671_v50, 4  ;;  %v2685_v55 = vmul.f32 %v5782_v32, %v2583_v34  ;;  %v2686_v52 = vmul.f32 %v5784_v5, %v2584_v33 }
 0x3c5   : > { %v2644_v53 = vrot.slane %v2643_v62, 1  ;;  %v2726_v58 = vadd.f32 1.0, %v4012_v18  ;;  %v2721_v44 = vmul.f32 %v3548_v28, %v6340_v56 }
 0x3c6   : > { %v2659_v21 = vadd.f32 %v2658_v19, %v2657_v22  ;;  %v2673_v10 = vadd.f32 %v2672_v51, %v2671_v50  ;;  %v2687_v43 = vadd.f32 %v2686_v52, %v2685_v55  ;;  %v2566_v49 = vpop.permute.xlu1 %2565  ;;  %v2570_v11 = vpop.permute.xlu0 %2569  ;;  %v6363_v19 = vld [vmem:[#allocation25_spill] sm:$0xff]  ;;  %v6364_v51 = vld [vmem:[#allocation32_spill] sm:$0xff]  ;;  %v6365_v55 = vld [vmem:[#allocation27_spill] sm:$0xff] }
 0x3c7   : > { %v2645_v9 = vadd.f32 %v2644_v53, %v2643_v62  ;;  %v2585_v61 = vsel %vm2025_vm4, %v5805_v25, %v2566_v49  ;;  %v2586_v57 = vsel %vm2025_vm4, %v5807_v8, %v2570_v11  ;;  %4013 = vrcp.f32 %v2726_v58  ;;  %v6366_v52 = vld [vmem:[#allocation26_spill] sm:$0xff]  ;;  %v6367_v53 = vld [vmem:[#allocation28_spill] sm:$0xff]  ;;  %v6372_v11 = vld [vmem:[#allocation39_spill] sm:$0xff] }
 0x3c8   : > { %v2660_v36 = vrot.slane %v2659_v21, 1  ;;  %v2674_v27 = vrot.slane %v2673_v10, 2  ;;  %v2688_v32 = vrot.slane %v2687_v43, 4  ;;  %v2701_v5 = vmul.f32 %v5793_v12, %v2585_v61  ;;  %v6371_v49 = vld [vmem:[#allocation40_spill] sm:$0xff]  ;;  %v6374_v61 = vld [vmem:[#allocation30_spill] sm:$0xff] }
 0x3c9   : > { %2648 = vst [vmem:[#allocation5 + $0x3] sm:$0x1] %v2645_v9  ;;  %v2702_v0 = vmul.f32 %v5795_v38, %v2586_v57  ;;  %v6373_v9 = vld [vmem:[#allocation44_spill] sm:$0xff]  ;;  %v6375_v57 = vld [vmem:[#allocation23_spill] sm:$0xff] }
 0x3ca   : > { %v2661_v1 = vadd.f32 %v2660_v36, %v2659_v21  ;;  %v2675_v59 = vadd.f32 %v2674_v27, %v2673_v10  ;;  %v2689_v24 = vadd.f32 %v2688_v32, %v2687_v43  ;;  %v6368_v21 = vld [vmem:[#allocation34_spill] sm:$0xff]  ;;  %v6369_v10 = vld [vmem:[#allocation29_spill] sm:$0xff]  ;;  %v6370_v43 = vld [vmem:[#allocation36_spill] sm:$0xff] }
 0x3cb   : > { %v2703_v48 = vadd.f32 %v2702_v0, %v2701_v5  ;;  %v6376_v36 = vld [vmem:[#allocation42_spill] sm:$0xff]  ;;  %v6377_v27 = vld [vmem:[#allocation31_spill] sm:$0xff]  ;;  %v6378_v32 = vld [vmem:[#allocation33_spill] sm:$0xff] }
 0x3cc   : > { %2664 = vst [vmem:[#allocation5 + $0x4] sm:$0x1] %v2661_v1  ;;  %v2676_v17 = vrot.slane %v2675_v59, 1  ;;  %v2690_v25 = vrot.slane %v2689_v24, 2  ;;  %v6394_v5 = vand.u32 4294901760, %v6378_v32 }
 0x3cd   : > { %v2704_v40 = vrot.slane %v2703_v48, 4 }
 0x3ce   : > { %v2677_v47 = vadd.f32 %v2676_v17, %v2675_v59  ;;  %v2691_v8 = vadd.f32 %v2690_v25, %v2689_v24 }
 0x3cf   : > { %v2705_v41 = vadd.f32 %v2704_v40, %v2703_v48 }
 0x3d0   : > { %2680 = vst [vmem:[#allocation5 + $0x5] sm:$0x1] %v2677_v47  ;;  %v2692_v3 = vrot.slane %v2691_v8, 1 }
 0x3d1   : > { %v2706_v12 = vrot.slane %v2705_v41, 2 }
 0x3d2   : > { %v2693_v2 = vadd.f32 %v2692_v3, %v2691_v8 }
 0x3d3   : > { %v2707_v7 = vadd.f32 %v2706_v12, %v2705_v41 }
 0x3d4   : > { %2696 = vst [vmem:[#allocation5 + $0x6] sm:$0x1] %v2693_v2  ;;  %v4014_v14 = vpop.eup %4013 }
 0x3d5   : > { %v2708_v38 = vrot.slane %v2707_v7, 1  ;;  %v2729_v50 = vmul.f32 %v4014_v14, %v5830_v4 }
 0x3d7   : > { %v2709_v20 = vadd.f32 %v2708_v38, %v2707_v7 }
 0x3d9   : > { %2712 = vst [vmem:[#allocation5 + $0x7] sm:$0x1] %v2709_v20 }
 0x3e0   : > { %v2713_v22 = vld [vmem:[#allocation5] sm:$0xff] }
 0x3e1   : > { %v2722_v39 = vadd.f32 %v2721_v44, %v2713_v22 }
 0x3e3   : > { %v2730_v30 = vmul.f32 %v2729_v50, %v2722_v39 }
 0x3e5   : > { %v5874_v62 = vand.u32 4294901760, %v2730_v30 }
 0x3e7   : > { %v5877_v34 = vsub.f32 %v2730_v30, %v5874_v62  ;;  %3724 = vmatmul.mubr.f32.vlgmr.msra.gmra.mxu1 %v5874_v62 }
 0x3e8   : > { %3762 = vmatpush3.msra.mxu1 %v5448_v54  ;;  %3793 = vmatprep.mubr.msk.f32.mxu1 %vm4264_vm5, %v6277_v42 }
 0x3e9   : > { %3763 = vmatprep.subr.mxu1 %v6277_v42  ;;  %v2830_v56 = vand.u32 4294901760, %v5877_v34 }
 0x3ea   : > { %3764 = vmatpush3.msra.mxu1 %v5466_v29 }
 0x3eb   : > { %3765 = vmatprep.subr.mxu1 %v6277_v42  ;;  %v2831_v4 = vsub.f32 %v5877_v34, %v2830_v56 }
 0x3ec   : > { %3766 = vmatpush3.msra.mxu1 %v5478_v6 }
 0x3ed   : > { %3767 = vmatprep.subr.mxu1 %v6277_v42  ;;  %v2832_v33 = vand.u32 4294901760, %v2831_v4 }
 0x3ee   : > { %3768 = vmatpush3.msra.mxu1 %v5500_v31 }
 0x3ef   : > { %3769 = vmatprep.subr.mxu1 %v6277_v42  ;;  %3689 = vmatmul.mubr.f32.vlgmr.msra.gmra.mxu0 %v2832_v33 }
 0x3f0   : > { %3727 = vmatpush3.msra.mxu0 %v5464_v60  ;;  %3770 = vmatpush3.msra.mxu1 %v5507_v16 }
 0x3f1   : > { %3728 = vmatprep.subr.mxu0 %v6277_v42  ;;  %3771 = vmatprep.subr.mxu1 %v6277_v42 }
 0x3f2   : > { %3729 = vmatpush3.msra.mxu0 %v5476_v45  ;;  %3772 = vmatpush3.msra.mxu1 %v5523_v63 }
 0x3f3   : > { %3730 = vmatprep.subr.mxu0 %v6277_v42  ;;  %3773 = vmatprep.subr.mxu1 %v6277_v42 }
 0x3f4   : > { %3731 = vmatpush3.msra.mxu0 %v5494_v37  ;;  %3774 = vmatpush3.msra.mxu1 %v5536_v15 }
 0x3f5   : > { %3732 = vmatprep.subr.mxu0 %v6277_v42  ;;  %3775 = vmatprep.subr.mxu1 %v6277_v42 }
 0x3f6   : > { %3733 = vmatpush3.msra.mxu0 %v5515_v13  ;;  %3776 = vmatpush3.msra.mxu1 %v5570_v46 }
 0x3f7   : > { %3734 = vmatprep.subr.mxu0 %v6277_v42  ;;  %3777 = vmatprep.subr.mxu1 %v6277_v42 }
 0x3f8   : > { %3735 = vmatpush3.msra.mxu0 %v5521_v23  ;;  %3778 = vmatpush3.msra.mxu1 %v5572_v26 }
 0x3f9   : > { %3736 = vmatprep.subr.mxu0 %v6277_v42  ;;  %3779 = vmatprep.subr.mxu1 %v6277_v42 }
 0x3fa   : > { %3737 = vmatpush3.msra.mxu0 %v6363_v19  ;;  %3780 = vmatpush3.msra.mxu1 %v5594_v35 }
 0x3fb   : > { %3738 = vmatprep.subr.mxu0 %v6277_v42  ;;  %3781 = vmatprep.subr.mxu1 %v6277_v42 }
 0x3fc   : > { %3739 = vmatpush3.msra.mxu0 %v6364_v51  ;;  %3782 = vmatpush3.msra.mxu1 %v6365_v55 }
 0x3fd   : > { %3740 = vmatprep.subr.mxu0 %v6277_v42  ;;  %3783 = vmatprep.subr.mxu1 %v6277_v42 }
 0x3fe   : > { %3741 = vmatpush3.msra.mxu0 %v6366_v52  ;;  %3784 = vmatpush3.msra.mxu1 %v6367_v53 }
 0x3ff   : > { %3742 = vmatprep.subr.mxu0 %v6277_v42  ;;  %3785 = vmatprep.subr.mxu1 %v6277_v42 }
 0x400   : > { %3743 = vmatpush3.msra.mxu0 %v6368_v21  ;;  %3786 = vmatpush3.msra.mxu1 %v6369_v10 }
 0x401   : > { %3744 = vmatprep.subr.mxu0 %v6277_v42  ;;  %3787 = vmatprep.subr.mxu1 %v6277_v42 }
 0x402   : > { %3745 = vmatpush3.msra.mxu0 %v6370_v43  ;;  %3788 = vmatpush3.msra.mxu1 %v6371_v49 }
 0x403   : > { %3746 = vmatprep.subr.mxu0 %v6277_v42  ;;  %3789 = vmatprep.subr.mxu1 %v6277_v42 }
 0x404   : > { %3747 = vmatpush3.msra.mxu0 %v6372_v11  ;;  %3790 = vmatpush3.msra.mxu1 %v6373_v9 }
 0x405   : > { %3748 = vmatprep.subr.mxu0 %v6277_v42  ;;  %3791 = vmatprep.subr.mxu1 %v6277_v42 }
 0x406   : > { %3749 = vmatpush3.msra.mxu0 %v6374_v61  ;;  %3792 = vmatpush3.msra.mxu1 %v6375_v57 }
 0x407   : > { %3750 = vmatprep.subr.mxu0 %v6277_v42  ;;  %3794 = vmatmul.mubr.f32.vlgmr.msra.gmra.mxu1 %v2830_v56 }
 0x408   : > { %3831 = vmatprep.subr.mxu1 %v6277_v42  ;;  %3751 = vmatpush3.msra.mxu0 %v6376_v36 }
 0x409   : > { %3832 = vmatpush3.msra.mxu1 %v5448_v54  ;;  %3752 = vmatprep.subr.mxu0 %v6277_v42  ;;  %v6379_v54 = vld [vmem:[#allocation35_spill] sm:$0xff] }
 0x40a   : > { %3833 = vmatprep.subr.mxu1 %v6277_v42  ;;  %3753 = vmatpush3.msra.mxu0 %v6377_v27  ;;  %v6395_v0 = vand.u32 4294901760, %v6379_v54 }
 0x40b   : > { %3834 = vmatpush3.msra.mxu1 %v5466_v29  ;;  %3754 = vmatprep.subr.mxu0 %v6277_v42  ;;  %v6380_v29 = vand.u32 4294901760, %v5464_v60  ;;  %v6383_v60 = vand.u32 4294901760, %v5515_v13  ;;  %v6387_v13 = vand.u32 4294901760, %v6366_v52 }
 0x40c   : > { %3835 = vmatprep.subr.mxu1 %v6277_v42  ;;  %3755 = vmatpush3.msra.mxu0 %v6378_v32 }
 0x40d   : > { %3836 = vmatpush3.msra.mxu1 %v5478_v6  ;;  %3756 = vmatprep.subr.mxu0 %v6277_v42  ;;  %v6381_v6 = vand.u32 4294901760, %v5476_v45  ;;  %v6384_v45 = vand.u32 4294901760, %v5521_v23  ;;  %v6388_v23 = vand.u32 4294901760, %v6368_v21 }
 0x40e   : > { %3837 = vmatprep.subr.mxu1 %v6277_v42  ;;  %3757 = vmatpush3.msra.mxu0 %v6379_v54 }
 0x40f   : > { %3758 = vmatprep.mubr.msk.f32.mxu0 %vm4264_vm5, %v6277_v42  ;;  %3838 = vmatpush3.msra.mxu1 %v5500_v31  ;;  %v6382_v31 = vand.u32 4294901760, %v5494_v37  ;;  %v6385_v37 = vand.u32 4294901760, %v6363_v19 }
 0x410   : > { %3759 = vmatmul.mubr.f32.vlgmr.msra.gmra.mxu0 %v5877_v34  ;;  %3796 = vmatprep.subr.mxu0 %v6277_v42 }
 0x411   : > { %3839 = vmatprep.subr.mxu1 %v6277_v42  ;;  %3797 = vmatpush3.msra.mxu0 %v6380_v29 }
 0x412   : > { %3840 = vmatpush3.msra.mxu1 %v5507_v16  ;;  %3798 = vmatprep.subr.mxu0 %v6277_v42  ;;  %v6386_v16 = vand.u32 4294901760, %v6364_v51 }
 0x413   : > { %3841 = vmatprep.subr.mxu1 %v6277_v42  ;;  %3799 = vmatpush3.msra.mxu0 %v6381_v6 }
 0x414   : > { %3842 = vmatpush3.msra.mxu1 %v5523_v63  ;;  %3800 = vmatprep.subr.mxu0 %v6277_v42  ;;  %v6389_v63 = vand.u32 4294901760, %v6370_v43 }
 0x415   : > { %3843 = vmatprep.subr.mxu1 %v6277_v42  ;;  %3801 = vmatpush3.msra.mxu0 %v6382_v31 }
 0x416   : > { %3844 = vmatpush3.msra.mxu1 %v5536_v15  ;;  %3802 = vmatprep.subr.mxu0 %v6277_v42  ;;  %v6390_v15 = vand.u32 4294901760, %v6372_v11 }
 0x417   : > { %3845 = vmatprep.subr.mxu1 %v6277_v42  ;;  %3803 = vmatpush3.msra.mxu0 %v6383_v60 }
 0x418   : > { %3846 = vmatpush3.msra.mxu1 %v5570_v46  ;;  %3804 = vmatprep.subr.mxu0 %v6277_v42  ;;  %v6391_v46 = vand.u32 4294901760, %v6374_v61 }
 0x419   : > { %3847 = vmatprep.subr.mxu1 %v6277_v42  ;;  %3805 = vmatpush3.msra.mxu0 %v6384_v45 }
 0x41a   : > { %3848 = vmatpush3.msra.mxu1 %v5572_v26  ;;  %3806 = vmatprep.subr.mxu0 %v6277_v42  ;;  %v6392_v26 = vand.u32 4294901760, %v6376_v36 }
 0x41b   : > { %3849 = vmatprep.subr.mxu1 %v6277_v42  ;;  %3807 = vmatpush3.msra.mxu0 %v6385_v37 }
 0x41c   : > { %3850 = vmatpush3.msra.mxu1 %v5594_v35  ;;  %3808 = vmatprep.subr.mxu0 %v6277_v42  ;;  %v6393_v35 = vand.u32 4294901760, %v6377_v27 }
 0x41d   : > { %3851 = vmatprep.subr.mxu1 %v6277_v42  ;;  %3809 = vmatpush3.msra.mxu0 %v6386_v16 }
 0x41e   : > { %3852 = vmatpush3.msra.mxu1 %v6365_v55  ;;  %3810 = vmatprep.subr.mxu0 %v6277_v42 }
 0x41f   : > { %3853 = vmatprep.subr.mxu1 %v6277_v42  ;;  %3811 = vmatpush3.msra.mxu0 %v6387_v13 }
 0x420   : > { %3854 = vmatpush3.msra.mxu1 %v6367_v53  ;;  %3812 = vmatprep.subr.mxu0 %v6277_v42 }
 0x421   : > { %3855 = vmatprep.subr.mxu1 %v6277_v42  ;;  %3813 = vmatpush3.msra.mxu0 %v6388_v23 }
 0x422   : > { %3856 = vmatpush3.msra.mxu1 %v6369_v10  ;;  %3814 = vmatprep.subr.mxu0 %v6277_v42 }
 0x423   : > { %3857 = vmatprep.subr.mxu1 %v6277_v42  ;;  %3815 = vmatpush3.msra.mxu0 %v6389_v63 }
 0x424   : > { %3858 = vmatpush3.msra.mxu1 %v6371_v49  ;;  %3816 = vmatprep.subr.mxu0 %v6277_v42 }
 0x425   : > { %3859 = vmatprep.subr.mxu1 %v6277_v42  ;;  %3817 = vmatpush3.msra.mxu0 %v6390_v15 }
 0x426   : > { %3860 = vmatpush3.msra.mxu1 %v6373_v9  ;;  %3818 = vmatprep.subr.mxu0 %v6277_v42 }
 0x427   : > { %3861 = vmatprep.subr.mxu1 %v6277_v42  ;;  %3819 = vmatpush3.msra.mxu0 %v6391_v46 }
 0x428   : > { %3862 = vmatpush3.msra.mxu1 %v6375_v57  ;;  %3863 = vmatprep.mubr.msk.f32.mxu1 %vm4264_vm5, %v6277_v42 }
 0x429   : > { %3820 = vmatprep.subr.mxu0 %v6277_v42  ;;  %3864 = vmatmul.mubr.f32.vlgmr.msra.gmra.mxu1 %v5874_v62 }
 0x42a   : > { %3821 = vmatpush3.msra.mxu0 %v6392_v26  ;;  %3828 = vmatprep.mubr.msk.f32.mxu0 %vm4264_vm5, %v6277_v42 }
 0x42b   : > { %3822 = vmatprep.subr.mxu0 %v6277_v42 }
 0x42c   : > { %3823 = vmatpush3.msra.mxu0 %v6393_v35 }
 0x42d   : > { %3824 = vmatprep.subr.mxu0 %v6277_v42 }
 0x42e   : > { %3825 = vmatpush3.msra.mxu0 %v6394_v5 }
 0x42f   : > { %3826 = vmatprep.subr.mxu0 %v6277_v42 }
 0x430   : > { %3827 = vmatpush3.msra.mxu0 %v6395_v0 }
 0x431   : > { %3829 = vmatmul.mubr.f32.vlgmr.msra.gmra.mxu0 %v5874_v62 }
 0x4a7   : > { %v2985_v18 = vpop.f32.mrf.mxu1 }
 0x4a9   : > { %v3725_v1 = vpop.f32.mrf.mxu1 }
 0x4af   : > { %v2834_v59 = vpop.f32.mrf.mxu0 }
 0x4b0   : > { %v2986_v47 = vadd.f32 %v2985_v18, %v2834_v59 }
 0x4b1   : > { %v3690_v24 = vpop.f32.mrf.mxu0 }
 0x4c7   : > { %v3178_v48 = vpop.f32.mrf.mxu1 }
 0x4c9   : > { %v3795_v17 = vpop.f32.mrf.mxu1 }
 0x4d0   : > { %v3089_v25 = vpop.f32.mrf.mxu0 }
 0x4d1   : > { %v3090_v42 = vadd.f32 %v3089_v25, %v2986_v47 }
 0x4d2   : > { %v3760_v58 = vpop.f32.mrf.mxu0 }
 0x4d3   : > { %v3179_v41 = vadd.f32 %v3178_v48, %v3090_v42 }
 0x4e9   : > { %v3384_v40 = vpop.f32.mrf.mxu1 }
 0x4eb   : > { %v3865_v8 = vpop.f32.mrf.mxu1 }
 0x4f1   : > { %v3297_v3 = vpop.f32.mrf.mxu0 }
 0x4f2   : > { %v3298_v12 = vadd.f32 %v3297_v3, %v3179_v41 }
 0x4f3   : > { %v3830_v2 = vpop.f32.mrf.mxu0 }
 0x4f4   : > { %v3385_v7 = vadd.f32 %v3384_v40, %v3298_v12 }
 0x4f6   : > { %3388 = vst [vmem:[%s391_s17] sm:$0xff] %v3385_v7 }
 0x4f7   : > { %4186 = shalt.err (!%p4183_p1)
}
 0x4f8   : > { %s4187_s12 = scalar_lea.hbm %s3401_s26, 128  ;;  %s4191_s25 = scalar_lea.hbm %s6080_s8, 256 }
 0x4f9   : > { %p4188_p3 = scmp.ne.s32.totalorder %s3401_s26, %s4187_s12  ;;  %p4192_p6 = scmp.lt.s32.totalorder %s3401_s26, %s6080_s8 }
 0x4fa   : > { %p4193_p5 = scmp.lt.s32.totalorder %s4191_s25, %s4187_s12 }
 0x4fb   : > { %p4189_p4 = pnand %p4188_p3, %p6396_p11 }
 0x4fc   : > { %p4194_p7 = por %p4193_p5, %p4192_p6 }
 0x4fd   : > { %p4190_p12 = pneg %p4189_p4 }
 0x4ff   : > { %p4195_p8 = pnand %p4194_p7, %p4190_p12 }
 0x501   : > { %4198 = shalt.err (!%p4195_p8)
}
 0x502   : > { %3888 = dma.vmem_to_hbm [thread:$0]  (%p6396_p11), %s3404_s23, 128, %s3401_s26, %s3390_s20  }
 0x503 PF: > { %s3415_s10 = sand.u32 1, %s4237_s27   ;;  %p6397_p13 = scmp.ne.s32.totalorder %s6237_s21, 0 }
 0x504   : > { %p6398_p0 = scmp.ge.s32.totalorder %s4249_s30, 2  ;;  %s3416_s17 = scalar_lea.sflag [#allocation8], %s3415_s10 }
 0x506   : > { %p3911_p2 = pnand %p6398_p0, %p6397_p13 }
 0x508   : > { %p3912_p9 = pneg %p3911_p2 }
 0x50a   : > { %4232 = dma.done.wait (%p3912_p9), %s3416_s17, 128  }
 0x50b   : > { %4234 = vsyncadd (%p3912_p9), %s3416_s17, 4294967168  ;;  %p24_p10 = scmp.ge.s32.totalorder %s4407_s15, 4   ;;  %s6399_s27 = smov %s4241_s28 }
 0x50c   : > { %s6400_s28 = smov %s4245_s29  ;;  %s6401_s29 = smov %s4419_s14 }
 0x50d   : > { %s6402_s30 = smov %s4407_s15  ;;  %26 = sbr.rel (!%p24_p10) target bundleno = 12 (0xc), region = 124 }
 0x512   :  { %3421 = vsyncpa [#allocation7], 1 }
 0x513   :  { %3423 = vsyncpa [#allocation7 + $0x1], 1 }
 0x514   :  { %3424 = vsyncpa [#allocation10], 1 }
 0x515   :  { %3425 = vsyncpa [#allocation13], 1 }
 0x516   :  { %3426 = vsyncpa [#allocation16], 1 }
 0x517   :  { %3427 = vsyncpa [#allocation8], 1 }
 0x518   :  { %3429 = vsyncpa [#allocation8 + $0x1], 1 }

</bundles_post_ra>
